<compile_context>
chip_gen: v7x
topology: tpu7x:2x2x1
jax: 0.10.0
libtpu: 0.0.40
codegen_flags: <defaults>
</compile_context>

<pallas_src>
import functools

import jax
import jax.numpy as jnp
from jax import lax
from jax.experimental import pallas as pl
from jax.experimental.pallas import tpu as pltpu


def _round_up(x, m):
    return (x + m - 1) // m * m


# --------------------------------------------------------------------------
# Pallas kernel 1: M-tiled GEMM + bias + ReLU (used for both conv layers via
# im2col).  x/w are bf16 (MXU native), accumulation and bias in f32.
# --------------------------------------------------------------------------
def _gemm_bias_relu_kernel(x_ref, w_ref, b_ref, o_ref):
    acc = jnp.dot(x_ref[...], w_ref[...], preferred_element_type=jnp.float32)
    o_ref[...] = jnp.maximum(acc + b_ref[...], 0.0)


def gemm_bias_relu(x_pad, w_pad, b_pad, tm):
    Mp, Kp = x_pad.shape
    Kp2, Np = w_pad.shape
    assert Kp == Kp2 and Mp % tm == 0 and Kp % 128 == 0 and Np % 128 == 0
    return pl.pallas_call(
        _gemm_bias_relu_kernel,
        out_shape=jax.ShapeDtypeStruct((Mp, Np), jnp.float32),
        grid_spec=pltpu.PrefetchScalarGridSpec(
            num_scalar_prefetch=0,
            grid=(Mp // tm,),
            in_specs=[
                pl.BlockSpec((tm, Kp), lambda i: (i, 0)),
                # constant index_map -> weight/bias blocks stay resident
                pl.BlockSpec((Kp, Np), lambda i: (0, 0)),
                pl.BlockSpec((1, Np), lambda i: (0, 0)),
            ],
            out_specs=pl.BlockSpec((tm, Np), lambda i: (i, 0)),
        ),
        compiler_params=pltpu.CompilerParams(
            dimension_semantics=("parallel",),
            vmem_limit_bytes=32 * 1024 * 1024,
        ),
    )(x_pad, w_pad, b_pad)


# --------------------------------------------------------------------------
# Pallas kernel 2: fused tail.
#   BatchNorm1d(affine=False, eps=1e-5) with batch statistics (training-mode
#   forward; momentum only affects running stats, not the output)
#   -> Euclidean projection of each row onto the unit L1 ball (bisection)
#   -> fc1 + ReLU -> fc2 + ReLU -> fc3.
# All weights are zero-padded to 128-lane multiples and live in VMEM.
# Zero-padded feature columns normalize to exactly 0, so they do not perturb
# the L1 sum / max, and the padded weight rows/cols are zero, so the padded
# lanes carry exact zeros through every layer.
#
# TODO(synk): projections.LP_Stage3_SchemeC_Perturbed source is unavailable;
# the forward here is the standard Euclidean projection onto the radius-1 L1
# ball (scheme / perturbation variants differ in the backward pass).
# --------------------------------------------------------------------------
def _tail_kernel(x_ref, w1_ref, b1_ref, w2_ref, b2_ref, w3_ref, b3_ref,
                 o_ref, *, eps, radius, n_iter):
    x = x_ref[...]                                            # (B, Fp) f32
    mean = jnp.mean(x, axis=0, keepdims=True)
    var = jnp.mean((x - mean) ** 2, axis=0, keepdims=True)    # biased variance
    xn = (x - mean) * lax.rsqrt(var + eps)

    ax = jnp.abs(xn)
    l1 = jnp.sum(ax, axis=1, keepdims=True)
    lo0 = jnp.zeros_like(l1)
    hi0 = jnp.max(ax, axis=1, keepdims=True)

    def body(_, carry):
        lo, hi = carry
        mid = 0.5 * (lo + hi)
        s = jnp.sum(jnp.maximum(ax - mid, 0.0), axis=1, keepdims=True)
        too_big = s > radius
        return jnp.where(too_big, mid, lo), jnp.where(too_big, hi, mid)

    lo, hi = lax.fori_loop(0, n_iter, body, (lo0, hi0), unroll=True)
    theta = 0.5 * (lo + hi)
    sgn = jnp.where(xn >= 0.0, 1.0, -1.0)
    proj = sgn * jnp.maximum(ax - theta, 0.0)
    h = jnp.where(l1 <= radius, xn, proj)

    h1 = jnp.maximum(
        jnp.dot(h, w1_ref[...], preferred_element_type=jnp.float32) + b1_ref[...], 0.0)
    h2 = jnp.maximum(
        jnp.dot(h1, w2_ref[...], preferred_element_type=jnp.float32) + b2_ref[...], 0.0)
    o_ref[...] = (
        jnp.dot(h2, w3_ref[...], preferred_element_type=jnp.float32) + b3_ref[...])


def bn_proj_fc_tail(x_flat, params, eps=1e-5, radius=1.0, n_iter=30):
    B, F = x_flat.shape                                       # (B, 400)
    H1, H2, H3 = 120, 84, 10
    Fp = _round_up(F, 128)                                    # 512
    H1p, H2p, H3p = _round_up(H1, 128), _round_up(H2, 128), _round_up(H3, 128)

    xp = jnp.pad(x_flat.astype(jnp.float32), ((0, 0), (0, Fp - F)))
    w1 = jnp.pad(params["fc1_w"].T.astype(jnp.float32), ((0, Fp - F), (0, H1p - H1)))
    b1 = jnp.pad(params["fc1_b"].astype(jnp.float32).reshape(1, H1), ((0, 0), (0, H1p - H1)))
    w2 = jnp.pad(params["fc2_w"].T.astype(jnp.float32), ((0, H1p - H1), (0, H2p - H2)))
    b2 = jnp.pad(params["fc2_b"].astype(jnp.float32).reshape(1, H2), ((0, 0), (0, H2p - H2)))
    w3 = jnp.pad(params["fc3_w"].T.astype(jnp.float32), ((0, H2p - H2), (0, H3p - H3)))
    b3 = jnp.pad(params["fc3_b"].astype(jnp.float32).reshape(1, H3), ((0, 0), (0, H3p - H3)))

    kernel = functools.partial(_tail_kernel, eps=eps, radius=radius, n_iter=n_iter)
    out = pl.pallas_call(
        kernel,
        out_shape=jax.ShapeDtypeStruct((B, H3p), jnp.float32),
        grid_spec=pltpu.PrefetchScalarGridSpec(
            num_scalar_prefetch=0,
            grid=(1,),
            in_specs=[
                pl.BlockSpec((B, Fp), lambda i: (0, 0)),
                pl.BlockSpec((Fp, H1p), lambda i: (0, 0)),
                pl.BlockSpec((1, H1p), lambda i: (0, 0)),
                pl.BlockSpec((H1p, H2p), lambda i: (0, 0)),
                pl.BlockSpec((1, H2p), lambda i: (0, 0)),
                pl.BlockSpec((H2p, H3p), lambda i: (0, 0)),
                pl.BlockSpec((1, H3p), lambda i: (0, 0)),
            ],
            out_specs=pl.BlockSpec((B, H3p), lambda i: (0, 0)),
        ),
        compiler_params=pltpu.CompilerParams(
            dimension_semantics=("arbitrary",),
            vmem_limit_bytes=32 * 1024 * 1024,
        ),
    )(xp, w1, b1, w2, b2, w3, b3)
    return out[:, :H3]


# --------------------------------------------------------------------------
# Glue: im2col, conv wrapper (pads K/N/M for lane-dense GEMM), 2x2 max-pool,
# parameter init, full forward pass.
# --------------------------------------------------------------------------
def _im2col(x_nhwc, kh, kw):
    B, H, W, C = x_nhwc.shape
    oh, ow = H - kh + 1, W - kw + 1
    cols = [x_nhwc[:, i:i + oh, j:j + ow, :] for i in range(kh) for j in range(kw)]
    patches = jnp.concatenate(cols, axis=-1)                  # (B, oh, ow, kh*kw*C)
    return patches.reshape(B * oh * ow, kh * kw * C), oh, ow


def conv2d_bias_relu(x_nhwc, w_oihw, b, kh=5, kw=5, tm_max=512):
    B = x_nhwc.shape[0]
    OC = w_oihw.shape[0]
    patches, oh, ow = _im2col(x_nhwc, kh, kw)
    M, K = patches.shape
    Kp, Np = _round_up(K, 128), _round_up(OC, 128)
    tm = min(tm_max, _round_up(M, 8))
    Mp = _round_up(M, tm)

    xp = jnp.pad(patches, ((0, Mp - M), (0, Kp - K))).astype(jnp.bfloat16)
    wk = jnp.transpose(w_oihw, (2, 3, 1, 0)).reshape(K, OC)   # tap-major, C inner
    wp = jnp.pad(wk, ((0, Kp - K), (0, Np - OC))).astype(jnp.bfloat16)
    bp = jnp.pad(b.astype(jnp.float32).reshape(1, OC), ((0, 0), (0, Np - OC)))

    y = gemm_bias_relu(xp, wp, bp, tm)                        # (Mp, Np) f32
    return y[:M, :OC].reshape(B, oh, ow, OC)


def maxpool2x2(x_nhwc):
    B, H, W, C = x_nhwc.shape
    return jnp.max(x_nhwc.reshape(B, H // 2, 2, W // 2, 2, C), axis=(2, 4))


def _uniform(key, shape, fan_in):
    bound = 1.0 / jnp.sqrt(float(fan_in))
    return jax.random.uniform(key, shape, jnp.float32, -bound, bound)


def init_params(key):
    ks = jax.random.split(key, 10)
    p = {}
    p["conv1_w"] = _uniform(ks[0], (6, 3, 5, 5), 3 * 5 * 5)
    p["conv1_b"] = _uniform(ks[1], (6,), 3 * 5 * 5)
    p["conv2_w"] = _uniform(ks[2], (16, 6, 5, 5), 6 * 5 * 5)
    p["conv2_b"] = _uniform(ks[3], (16,), 6 * 5 * 5)
    p["fc1_w"] = _uniform(ks[4], (120, 400), 400)             # PyTorch (out, in)
    p["fc1_b"] = _uniform(ks[5], (120,), 400)
    p["fc2_w"] = _uniform(ks[6], (84, 120), 120)
    p["fc2_b"] = _uniform(ks[7], (84,), 120)
    p["fc3_w"] = _uniform(ks[8], (10, 84), 84)
    p["fc3_b"] = _uniform(ks[9], (10,), 84)
    return p


def net_forward(params, x_nchw):
    x = jnp.transpose(x_nchw, (0, 2, 3, 1))                   # NCHW -> NHWC
    x = maxpool2x2(conv2d_bias_relu(x, params["conv1_w"], params["conv1_b"]))
    x = maxpool2x2(conv2d_bias_relu(x, params["conv2_w"], params["conv2_b"]))
    # flatten in PyTorch (channel-major NCHW) order -> (B, 16*5*5) = (B, 400)
    x = jnp.transpose(x, (0, 3, 1, 2)).reshape(x.shape[0], -1)
    # fused BatchNorm + projection + fc1/fc2/fc3 in one Pallas kernel
    return bn_proj_fc_tail(x, params)


if __name__ == "__main__":
    key = jax.random.PRNGKey(0)
    k_x, k_p = jax.random.split(key)
    # 32x32x3 input is required by the module (fc1 expects 16*5*5 = 400).
    x = jax.random.normal(k_x, (4, 3, 32, 32), jnp.float32)
    params = init_params(k_p)

    out = jax.jit(net_forward)(params, x)
    jax.block_until_ready(out)
    assert out.shape == (4, 10) and out.dtype == jnp.float32
    print("KERNEL_OK")
</pallas_src>

<mosaic_0001>
module attributes {stable_mosaic.version = 11 : i64} {
  func.func @_gemm_bias_relu_kernel(%arg0: i32, %arg1: memref<512x128xbf16, #tpu.memory_space<vmem>>, %arg2: memref<128x128xbf16, #tpu.memory_space<vmem>>, %arg3: memref<1x128xf32, #tpu.memory_space<vmem>>, %arg4: memref<512x128xf32, #tpu.memory_space<vmem>>) attributes {dimension_semantics = [#tpu.dimension_semantics<parallel>], iteration_bounds = array<i64: 7>, scalar_prefetch = 0 : i64, scratch_operands = 0 : i64, tpu.core_type = #tpu.core_type<tc>, window_params = [{transform_indices = @transform_0, window_bounds = array<i64: 512, 128>}, {pipeline_mode = #tpu.pipeline_mode<synchronous>, transform_indices = @transform_1, window_bounds = array<i64: 128, 128>}, {pipeline_mode = #tpu.pipeline_mode<synchronous>, transform_indices = @transform_2, window_bounds = array<i64: 1, 128>}, {transform_indices = @transform_3, window_bounds = array<i64: 512, 128>}]} {
    %c0 = arith.constant 0 : index
    %c0_0 = arith.constant 0 : index
    %0 = vector.load %arg1[%c0, %c0_0] : memref<512x128xbf16, #tpu.memory_space<vmem>>, vector<512x128xbf16>
    %c0_1 = arith.constant 0 : index
    %c0_2 = arith.constant 0 : index
    %1 = vector.load %arg2[%c0_1, %c0_2] : memref<128x128xbf16, #tpu.memory_space<vmem>>, vector<128x128xbf16>
    %cst = arith.constant dense<0.000000e+00> : vector<512x128xf32>
    %2 = tpu.matmul %0, %1, %cst {dimension_numbers = #tpu.dot_dimension_numbers<[1], [0], [0], [1], [0, 0, 1, 1], [], []>} : vector<512x128xbf16>, vector<128x128xbf16>, vector<512x128xf32> -> vector<512x128xf32>
    %c0_3 = arith.constant 0 : index
    %c0_4 = arith.constant 0 : index
    %3 = vector.load %arg3[%c0_3, %c0_4] : memref<1x128xf32, #tpu.memory_space<vmem>>, vector<1x128xf32>
    %4 = vector.broadcast %3 : vector<1x128xf32> to vector<512x128xf32>
    %5 = arith.addf %2, %4 : vector<512x128xf32>
    %cst_5 = arith.constant 0.000000e+00 : f32
    %6 = vector.broadcast %cst_5 : f32 to vector<512x128xf32>
    %7 = arith.maximumf %5, %6 : vector<512x128xf32>
    %c0_6 = arith.constant 0 : index
    %c0_7 = arith.constant 0 : index
    %8 = vector.load %arg4[%c0_6, %c0_7] : memref<512x128xf32, #tpu.memory_space<vmem>>, vector<512x128xf32>
    tpu.vector_store %arg4[%c0_6, %c0_7], %7 {strides = array<i32>} : memref<512x128xf32, #tpu.memory_space<vmem>>, vector<512x128xf32>,
    return
  }
  func.func @transform_0(%arg0: i32) -> (i32, i32) {
    %c0_i32 = arith.constant 0 : i32
    %c0_i32_0 = arith.constant 0 : i32
    return %arg0, %c0_i32 : i32, i32
  }
  func.func @transform_1(%arg0: i32) -> (i32, i32) {
    %c0_i32 = arith.constant 0 : i32
    %c0_i32_0 = arith.constant 0 : i32
    %c0_i32_1 = arith.constant 0 : i32
    return %c0_i32, %c0_i32_0 : i32, i32
  }
  func.func @transform_2(%arg0: i32) -> (i32, i32) {
    %c0_i32 = arith.constant 0 : i32
    %c0_i32_0 = arith.constant 0 : i32
    %c0_i32_1 = arith.constant 0 : i32
    return %c0_i32, %c0_i32_0 : i32, i32
  }
  func.func @transform_3(%arg0: i32) -> (i32, i32) {
    %c0_i32 = arith.constant 0 : i32
    %c0_i32_0 = arith.constant 0 : i32
    return %arg0, %c0_i32 : i32, i32
  }
}

module attributes {stable_mosaic.version = 11 : i64} {
  func.func @_gemm_bias_relu_kernel(%arg0: i32, %arg1: memref<400x256xbf16, #tpu.memory_space<vmem>>, %arg2: memref<256x128xbf16, #tpu.memory_space<vmem>>, %arg3: memref<1x128xf32, #tpu.memory_space<vmem>>, %arg4: memref<400x128xf32, #tpu.memory_space<vmem>>) attributes {dimension_semantics = [#tpu.dimension_semantics<parallel>], iteration_bounds = array<i64: 1>, scalar_prefetch = 0 : i64, scratch_operands = 0 : i64, tpu.core_type = #tpu.core_type<tc>, window_params = [{transform_indices = @transform_0, window_bounds = array<i64: 400, 256>}, {pipeline_mode = #tpu.pipeline_mode<synchronous>, transform_indices = @transform_1, window_bounds = array<i64: 256, 128>}, {pipeline_mode = #tpu.pipeline_mode<synchronous>, transform_indices = @transform_2, window_bounds = array<i64: 1, 128>}, {transform_indices = @transform_3, window_bounds = array<i64: 400, 128>}]} {
    %c0 = arith.constant 0 : index
    %c0_0 = arith.constant 0 : index
    %0 = vector.load %arg1[%c0, %c0_0] : memref<400x256xbf16, #tpu.memory_space<vmem>>, vector<400x256xbf16>
    %c0_1 = arith.constant 0 : index
    %c0_2 = arith.constant 0 : index
    %1 = vector.load %arg2[%c0_1, %c0_2] : memref<256x128xbf16, #tpu.memory_space<vmem>>, vector<256x128xbf16>
    %cst = arith.constant dense<0.000000e+00> : vector<400x128xf32>
    %2 = tpu.matmul %0, %1, %cst {dimension_numbers = #tpu.dot_dimension_numbers<[1], [0], [0], [1], [0, 0, 1, 1], [], []>} : vector<400x256xbf16>, vector<256x128xbf16>, vector<400x128xf32> -> vector<400x128xf32>
    %c0_3 = arith.constant 0 : index
    %c0_4 = arith.constant 0 : index
    %3 = vector.load %arg3[%c0_3, %c0_4] : memref<1x128xf32, #tpu.memory_space<vmem>>, vector<1x128xf32>
    %4 = vector.broadcast %3 : vector<1x128xf32> to vector<400x128xf32>
    %5 = arith.addf %2, %4 : vector<400x128xf32>
    %cst_5 = arith.constant 0.000000e+00 : f32
    %6 = vector.broadcast %cst_5 : f32 to vector<400x128xf32>
    %7 = arith.maximumf %5, %6 : vector<400x128xf32>
    %c0_6 = arith.constant 0 : index
    %c0_7 = arith.constant 0 : index
    %8 = vector.load %arg4[%c0_6, %c0_7] : memref<400x128xf32, #tpu.memory_space<vmem>>, vector<400x128xf32>
    tpu.vector_store %arg4[%c0_6, %c0_7], %7 {strides = array<i32>} : memref<400x128xf32, #tpu.memory_space<vmem>>, vector<400x128xf32>,
    return
  }
  func.func @transform_0(%arg0: i32) -> (i32, i32) {
    %c0_i32 = arith.constant 0 : i32
    %c0_i32_0 = arith.constant 0 : i32
    return %arg0, %c0_i32 : i32, i32
  }
  func.func @transform_1(%arg0: i32) -> (i32, i32) {
    %c0_i32 = arith.constant 0 : i32
    %c0_i32_0 = arith.constant 0 : i32
    %c0_i32_1 = arith.constant 0 : i32
    return %c0_i32, %c0_i32_0 : i32, i32
  }
  func.func @transform_2(%arg0: i32) -> (i32, i32) {
    %c0_i32 = arith.constant 0 : i32
    %c0_i32_0 = arith.constant 0 : i32
    %c0_i32_1 = arith.constant 0 : i32
    return %c0_i32, %c0_i32_0 : i32, i32
  }
  func.func @transform_3(%arg0: i32) -> (i32, i32) {
    %c0_i32 = arith.constant 0 : i32
    %c0_i32_0 = arith.constant 0 : i32
    return %arg0, %c0_i32 : i32, i32
  }
}

module attributes {stable_mosaic.version = 11 : i64} {
  func.func @_tail_kernel(%arg0: i32, %arg1: memref<4x512xf32, #tpu.memory_space<vmem>>, %arg2: memref<512x128xf32, #tpu.memory_space<vmem>>, %arg3: memref<1x128xf32, #tpu.memory_space<vmem>>, %arg4: memref<128x128xf32, #tpu.memory_space<vmem>>, %arg5: memref<1x128xf32, #tpu.memory_space<vmem>>, %arg6: memref<128x128xf32, #tpu.memory_space<vmem>>, %arg7: memref<1x128xf32, #tpu.memory_space<vmem>>, %arg8: memref<4x128xf32, #tpu.memory_space<vmem>>) attributes {dimension_semantics = [#tpu.dimension_semantics<arbitrary>], iteration_bounds = array<i64: 1>, scalar_prefetch = 0 : i64, scratch_operands = 0 : i64, tpu.core_type = #tpu.core_type<tc>, window_params = [{pipeline_mode = #tpu.pipeline_mode<synchronous>, transform_indices = @transform_0, window_bounds = array<i64: 4, 512>}, {pipeline_mode = #tpu.pipeline_mode<synchronous>, transform_indices = @transform_1, window_bounds = array<i64: 512, 128>}, {pipeline_mode = #tpu.pipeline_mode<synchronous>, transform_indices = @transform_2, window_bounds = array<i64: 1, 128>}, {pipeline_mode = #tpu.pipeline_mode<synchronous>, transform_indices = @transform_3, window_bounds = array<i64: 128, 128>}, {pipeline_mode = #tpu.pipeline_mode<synchronous>, transform_indices = @transform_4, window_bounds = array<i64: 1, 128>}, {pipeline_mode = #tpu.pipeline_mode<synchronous>, transform_indices = @transform_5, window_bounds = array<i64: 128, 128>}, {pipeline_mode = #tpu.pipeline_mode<synchronous>, transform_indices = @transform_6, window_bounds = array<i64: 1, 128>}, {pipeline_mode = #tpu.pipeline_mode<synchronous>, transform_indices = @transform_7, window_bounds = array<i64: 4, 128>}]} {
    %c0 = arith.constant 0 : index
    %c0_0 = arith.constant 0 : index
    %0 = vector.load %arg1[%c0, %c0_0] : memref<4x512xf32, #tpu.memory_space<vmem>>, vector<4x512xf32>
    %cst = arith.constant dense<0.000000e+00> : vector<512xf32>
    %1 = vector.multi_reduction <add>, %0, %cst [0] : vector<4x512xf32> to vector<512xf32>
    %2 = vector.shape_cast %1 : vector<512xf32> to vector<1x512xf32>
    %cst_1 = arith.constant 4.000000e+00 : f32
    %3 = vector.broadcast %cst_1 : f32 to vector<1x512xf32>
    %4 = arith.divf %2, %3 : vector<1x512xf32>
    %5 = vector.broadcast %4 : vector<1x512xf32> to vector<4x512xf32>
    %6 = arith.subf %0, %5 : vector<4x512xf32>
    %7 = arith.mulf %6, %6 : vector<4x512xf32>
    %cst_2 = arith.constant dense<0.000000e+00> : vector<512xf32>
    %8 = vector.multi_reduction <add>, %7, %cst_2 [0] : vector<4x512xf32> to vector<512xf32>
    %9 = vector.shape_cast %8 : vector<512xf32> to vector<1x512xf32>
    %cst_3 = arith.constant 4.000000e+00 : f32
    %10 = vector.broadcast %cst_3 : f32 to vector<1x512xf32>
    %11 = arith.divf %9, %10 : vector<1x512xf32>
    %12 = vector.broadcast %4 : vector<1x512xf32> to vector<4x512xf32>
    %13 = arith.subf %0, %12 : vector<4x512xf32>
    %cst_4 = arith.constant 9.99999974E-6 : f32
    %14 = vector.broadcast %cst_4 : f32 to vector<1x512xf32>
    %15 = arith.addf %11, %14 : vector<1x512xf32>
    %16 = math.rsqrt %15 : vector<1x512xf32>
    %17 = vector.broadcast %16 : vector<1x512xf32> to vector<4x512xf32>
    %18 = arith.mulf %13, %17 : vector<4x512xf32>
    %19 = math.absf %18 : vector<4x512xf32>
    %cst_5 = arith.constant dense<0.000000e+00> : vector<4xf32>
    %20 = vector.multi_reduction <add>, %19, %cst_5 [1] : vector<4x512xf32> to vector<4xf32>
    %21 = vector.shape_cast %20 : vector<4xf32> to vector<4x1xf32>
    %cst_6 = arith.constant 0.000000e+00 : f32
    %22 = vector.broadcast %cst_6 : f32 to vector<4x1xf32>
    %cst_7 = arith.constant dense<0xFF800000> : vector<4xf32>
    %23 = vector.multi_reduction <maximumf>, %19, %cst_7 [1] : vector<4x512xf32> to vector<4xf32>
    %24 = vector.shape_cast %23 : vector<4xf32> to vector<4x1xf32>
    %c0_i32 = arith.constant 0 : i32
    %25 = arith.addf %22, %24 : vector<4x1xf32>
    %cst_8 = arith.constant 5.000000e-01 : f32
    %26 = vector.broadcast %cst_8 : f32 to vector<4x1xf32>
    %27 = arith.mulf %26, %25 : vector<4x1xf32>
    %28 = vector.broadcast %27 : vector<4x1xf32> to vector<4x512xf32>
    %29 = arith.subf %19, %28 : vector<4x512xf32>
    %cst_9 = arith.constant 0.000000e+00 : f32
    %30 = vector.broadcast %cst_9 : f32 to vector<4x512xf32>
    %31 = arith.maximumf %29, %30 : vector<4x512xf32>
    %cst_10 = arith.constant dense<0.000000e+00> : vector<4xf32>
    %32 = vector.multi_reduction <add>, %31, %cst_10 [1] : vector<4x512xf32> to vector<4xf32>
    %33 = vector.shape_cast %32 : vector<4xf32> to vector<4x1xf32>
    %cst_11 = arith.constant 1.000000e+00 : f32
    %34 = vector.broadcast %cst_11 : f32 to vector<4x1xf32>
    %35 = arith.cmpf ogt, %33, %34 : vector<4x1xf32>
    %36 = arith.select %35, %27, %22 : vector<4x1xi1>, vector<4x1xf32>
    %37 = arith.select %35, %24, %27 : vector<4x1xi1>, vector<4x1xf32>
    %c1_i32 = arith.constant 1 : i32
    %38 = arith.addf %36, %37 : vector<4x1xf32>
    %cst_12 = arith.constant 5.000000e-01 : f32
    %39 = vector.broadcast %cst_12 : f32 to vector<4x1xf32>
    %40 = arith.mulf %39, %38 : vector<4x1xf32>
    %41 = vector.broadcast %40 : vector<4x1xf32> to vector<4x512xf32>
    %42 = arith.subf %19, %41 : vector<4x512xf32>
    %cst_13 = arith.constant 0.000000e+00 : f32
    %43 = vector.broadcast %cst_13 : f32 to vector<4x512xf32>
    %44 = arith.maximumf %42, %43 : vector<4x512xf32>
    %cst_14 = arith.constant dense<0.000000e+00> : vector<4xf32>
    %45 = vector.multi_reduction <add>, %44, %cst_14 [1] : vector<4x512xf32> to vector<4xf32>
    %46 = vector.shape_cast %45 : vector<4xf32> to vector<4x1xf32>
    %cst_15 = arith.constant 1.000000e+00 : f32
    %47 = vector.broadcast %cst_15 : f32 to vector<4x1xf32>
    %48 = arith.cmpf ogt, %46, %47 : vector<4x1xf32>
    %49 = arith.select %48, %40, %36 : vector<4x1xi1>, vector<4x1xf32>
    %50 = arith.select %48, %37, %40 : vector<4x1xi1>, vector<4x1xf32>
    %c2_i32 = arith.constant 2 : i32
    %51 = arith.addf %49, %50 : vector<4x1xf32>
    %cst_16 = arith.constant 5.000000e-01 : f32
    %52 = vector.broadcast %cst_16 : f32 to vector<4x1xf32>
    %53 = arith.mulf %52, %51 : vector<4x1xf32>
    %54 = vector.broadcast %53 : vector<4x1xf32> to vector<4x512xf32>
    %55 = arith.subf %19, %54 : vector<4x512xf32>
    %cst_17 = arith.constant 0.000000e+00 : f32
    %56 = vector.broadcast %cst_17 : f32 to vector<4x512xf32>
    %57 = arith.maximumf %55, %56 : vector<4x512xf32>
    %cst_18 = arith.constant dense<0.000000e+00> : vector<4xf32>
    %58 = vector.multi_reduction <add>, %57, %cst_18 [1] : vector<4x512xf32> to vector<4xf32>
    %59 = vector.shape_cast %58 : vector<4xf32> to vector<4x1xf32>
    %cst_19 = arith.constant 1.000000e+00 : f32
    %60 = vector.broadcast %cst_19 : f32 to vector<4x1xf32>
    %61 = arith.cmpf ogt, %59, %60 : vector<4x1xf32>
    %62 = arith.select %61, %53, %49 : vector<4x1xi1>, vector<4x1xf32>
    %63 = arith.select %61, %50, %53 : vector<4x1xi1>, vector<4x1xf32>
    %c3_i32 = arith.constant 3 : i32
    %64 = arith.addf %62, %63 : vector<4x1xf32>
    %cst_20 = arith.constant 5.000000e-01 : f32
    %65 = vector.broadcast %cst_20 : f32 to vector<4x1xf32>
    %66 = arith.mulf %65, %64 : vector<4x1xf32>
    %67 = vector.broadcast %66 : vector<4x1xf32> to vector<4x512xf32>
    %68 = arith.subf %19, %67 : vector<4x512xf32>
    %cst_21 = arith.constant 0.000000e+00 : f32
    %69 = vector.broadcast %cst_21 : f32 to vector<4x512xf32>
    %70 = arith.maximumf %68, %69 : vector<4x512xf32>
    %cst_22 = arith.constant dense<0.000000e+00> : vector<4xf32>
    %71 = vector.multi_reduction <add>, %70, %cst_22 [1] : vector<4x512xf32> to vector<4xf32>
    %72 = vector.shape_cast %71 : vector<4xf32> to vector<4x1xf32>
    %cst_23 = arith.constant 1.000000e+00 : f32
    %73 = vector.broadcast %cst_23 : f32 to vector<4x1xf32>
    %74 = arith.cmpf ogt, %72, %73 : vector<4x1xf32>
    %75 = arith.select %74, %66, %62 : vector<4x1xi1>, vector<4x1xf32>
    %76 = arith.select %74, %63, %66 : vector<4x1xi1>, vector<4x1xf32>
    %c4_i32 = arith.constant 4 : i32
    %77 = arith.addf %75, %76 : vector<4x1xf32>
    %cst_24 = arith.constant 5.000000e-01 : f32
    %78 = vector.broadcast %cst_24 : f32 to vector<4x1xf32>
    %79 = arith.mulf %78, %77 : vector<4x1xf32>
    %80 = vector.broadcast %79 : vector<4x1xf32> to vector<4x512xf32>
    %81 = arith.subf %19, %80 : vector<4x512xf32>
    %cst_25 = arith.constant 0.000000e+00 : f32
    %82 = vector.broadcast %cst_25 : f32 to vector<4x512xf32>
    %83 = arith.maximumf %81, %82 : vector<4x512xf32>
    %cst_26 = arith.constant dense<0.000000e+00> : vector<4xf32>
    %84 = vector.multi_reduction <add>, %83, %cst_26 [1] : vector<4x512xf32> to vector<4xf32>
    %85 = vector.shape_cast %84 : vector<4xf32> to vector<4x1xf32>
    %cst_27 = arith.constant 1.000000e+00 : f32
    %86 = vector.broadcast %cst_27 : f32 to vector<4x1xf32>
    %87 = arith.cmpf ogt, %85, %86 : vector<4x1xf32>
    %88 = arith.select %87, %79, %75 : vector<4x1xi1>, vector<4x1xf32>
    %89 = arith.select %87, %76, %79 : vector<4x1xi1>, vector<4x1xf32>
    %c5_i32 = arith.constant 5 : i32
    %90 = arith.addf %88, %89 : vector<4x1xf32>
    %cst_28 = arith.constant 5.000000e-01 : f32
    %91 = vector.broadcast %cst_28 : f32 to vector<4x1xf32>
    %92 = arith.mulf %91, %90 : vector<4x1xf32>
    %93 = vector.broadcast %92 : vector<4x1xf32> to vector<4x512xf32>
    %94 = arith.subf %19, %93 : vector<4x512xf32>
    %cst_29 = arith.constant 0.000000e+00 : f32
    %95 = vector.broadcast %cst_29 : f32 to vector<4x512xf32>
    %96 = arith.maximumf %94, %95 : vector<4x512xf32>
    %cst_30 = arith.constant dense<0.000000e+00> : vector<4xf32>
    %97 = vector.multi_reduction <add>, %96, %cst_30 [1] : vector<4x512xf32> to vector<4xf32>
    %98 = vector.shape_cast %97 : vector<4xf32> to vector<4x1xf32>
    %cst_31 = arith.constant 1.000000e+00 : f32
    %99 = vector.broadcast %cst_31 : f32 to vector<4x1xf32>
    %100 = arith.cmpf ogt, %98, %99 : vector<4x1xf32>
    %101 = arith.select %100, %92, %88 : vector<4x1xi1>, vector<4x1xf32>
    %102 = arith.select %100, %89, %92 : vector<4x1xi1>, vector<4x1xf32>
    %c6_i32 = arith.constant 6 : i32
    %103 = arith.addf %101, %102 : vector<4x1xf32>
    %cst_32 = arith.constant 5.000000e-01 : f32
    %104 = vector.broadcast %cst_32 : f32 to vector<4x1xf32>
    %105 = arith.mulf %104, %103 : vector<4x1xf32>
    %106 = vector.broadcast %105 : vector<4x1xf32> to vector<4x512xf32>
    %107 = arith.subf %19, %106 : vector<4x512xf32>
    %cst_33 = arith.constant 0.000000e+00 : f32
    %108 = vector.broadcast %cst_33 : f32 to vector<4x512xf32>
    %109 = arith.maximumf %107, %108 : vector<4x512xf32>
    %cst_34 = arith.constant dense<0.000000e+00> : vector<4xf32>
    %110 = vector.multi_reduction <add>, %109, %cst_34 [1] : vector<4x512xf32> to vector<4xf32>
    %111 = vector.shape_cast %110 : vector<4xf32> to vector<4x1xf32>
    %cst_35 = arith.constant 1.000000e+00 : f32
    %112 = vector.broadcast %cst_35 : f32 to vector<4x1xf32>
    %113 = arith.cmpf ogt, %111, %112 : vector<4x1xf32>
    %114 = arith.select %113, %105, %101 : vector<4x1xi1>, vector<4x1xf32>
    %115 = arith.select %113, %102, %105 : vector<4x1xi1>, vector<4x1xf32>
    %c7_i32 = arith.constant 7 : i32
    %116 = arith.addf %114, %115 : vector<4x1xf32>
    %cst_36 = arith.constant 5.000000e-01 : f32
    %117 = vector.broadcast %cst_36 : f32 to vector<4x1xf32>
    %118 = arith.mulf %117, %116 : vector<4x1xf32>
    %119 = vector.broadcast %118 : vector<4x1xf32> to vector<4x512xf32>
    %120 = arith.subf %19, %119 : vector<4x512xf32>
    %cst_37 = arith.constant 0.000000e+00 : f32
    %121 = vector.broadcast %cst_37 : f32 to vector<4x512xf32>
    %122 = arith.maximumf %120, %121 : vector<4x512xf32>
    %cst_38 = arith.constant dense<0.000000e+00> : vector<4xf32>
    %123 = vector.multi_reduction <add>, %122, %cst_38 [1] : vector<4x512xf32> to vector<4xf32>
    %124 = vector.shape_cast %123 : vector<4xf32> to vector<4x1xf32>
    %cst_39 = arith.constant 1.000000e+00 : f32
    %125 = vector.broadcast %cst_39 : f32 to vector<4x1xf32>
    %126 = arith.cmpf ogt, %124, %125 : vector<4x1xf32>
    %127 = arith.select %126, %118, %114 : vector<4x1xi1>, vector<4x1xf32>
    %128 = arith.select %126, %115, %118 : vector<4x1xi1>, vector<4x1xf32>
    %c8_i32 = arith.constant 8 : i32
    %129 = arith.addf %127, %128 : vector<4x1xf32>
    %cst_40 = arith.constant 5.000000e-01 : f32
    %130 = vector.broadcast %cst_40 : f32 to vector<4x1xf32>
    %131 = arith.mulf %130, %129 : vector<4x1xf32>
    %132 = vector.broadcast %131 : vector<4x1xf32> to vector<4x512xf32>
    %133 = arith.subf %19, %132 : vector<4x512xf32>
    %cst_41 = arith.constant 0.000000e+00 : f32
    %134 = vector.broadcast %cst_41 : f32 to vector<4x512xf32>
    %135 = arith.maximumf %133, %134 : vector<4x512xf32>
    %cst_42 = arith.constant dense<0.000000e+00> : vector<4xf32>
    %136 = vector.multi_reduction <add>, %135, %cst_42 [1] : vector<4x512xf32> to vector<4xf32>
    %137 = vector.shape_cast %136 : vector<4xf32> to vector<4x1xf32>
    %cst_43 = arith.constant 1.000000e+00 : f32
    %138 = vector.broadcast %cst_43 : f32 to vector<4x1xf32>
    %139 = arith.cmpf ogt, %137, %138 : vector<4x1xf32>
    %140 = arith.select %139, %131, %127 : vector<4x1xi1>, vector<4x1xf32>
    %141 = arith.select %139, %128, %131 : vector<4x1xi1>, vector<4x1xf32>
    %c9_i32 = arith.constant 9 : i32
    %142 = arith.addf %140, %141 : vector<4x1xf32>
    %cst_44 = arith.constant 5.000000e-01 : f32
    %143 = vector.broadcast %cst_44 : f32 to vector<4x1xf32>
    %144 = arith.mulf %143, %142 : vector<4x1xf32>
    %145 = vector.broadcast %144 : vector<4x1xf32> to vector<4x512xf32>
    %146 = arith.subf %19, %145 : vector<4x512xf32>
    %cst_45 = arith.constant 0.000000e+00 : f32
    %147 = vector.broadcast %cst_45 : f32 to vector<4x512xf32>
    %148 = arith.maximumf %146, %147 : vector<4x512xf32>
    %cst_46 = arith.constant dense<0.000000e+00> : vector<4xf32>
    %149 = vector.multi_reduction <add>, %148, %cst_46 [1] : vector<4x512xf32> to vector<4xf32>
    %150 = vector.shape_cast %149 : vector<4xf32> to vector<4x1xf32>
    %cst_47 = arith.constant 1.000000e+00 : f32
    %151 = vector.broadcast %cst_47 : f32 to vector<4x1xf32>
    %152 = arith.cmpf ogt, %150, %151 : vector<4x1xf32>
    %153 = arith.select %152, %144, %140 : vector<4x1xi1>, vector<4x1xf32>
    %154 = arith.select %152, %141, %144 : vector<4x1xi1>, vector<4x1xf32>
    %c10_i32 = arith.constant 10 : i32
    %155 = arith.addf %153, %154 : vector<4x1xf32>
    %cst_48 = arith.constant 5.000000e-01 : f32
    %156 = vector.broadcast %cst_48 : f32 to vector<4x1xf32>
    %157 = arith.mulf %156, %155 : vector<4x1xf32>
    %158 = vector.broadcast %157 : vector<4x1xf32> to vector<4x512xf32>
    %159 = arith.subf %19, %158 : vector<4x512xf32>
    %cst_49 = arith.constant 0.000000e+00 : f32
    %160 = vector.broadcast %cst_49 : f32 to vector<4x512xf32>
    %161 = arith.maximumf %159, %160 : vector<4x512xf32>
    %cst_50 = arith.constant dense<0.000000e+00> : vector<4xf32>
    %162 = vector.multi_reduction <add>, %161, %cst_50 [1] : vector<4x512xf32> to vector<4xf32>
    %163 = vector.shape_cast %162 : vector<4xf32> to vector<4x1xf32>
    %cst_51 = arith.constant 1.000000e+00 : f32
    %164 = vector.broadcast %cst_51 : f32 to vector<4x1xf32>
    %165 = arith.cmpf ogt, %163, %164 : vector<4x1xf32>
    %166 = arith.select %165, %157, %153 : vector<4x1xi1>, vector<4x1xf32>
    %167 = arith.select %165, %154, %157 : vector<4x1xi1>, vector<4x1xf32>
    %c11_i32 = arith.constant 11 : i32
    %168 = arith.addf %166, %167 : vector<4x1xf32>
    %cst_52 = arith.constant 5.000000e-01 : f32
    %169 = vector.broadcast %cst_52 : f32 to vector<4x1xf32>
    %170 = arith.mulf %169, %168 : vector<4x1xf32>
    %171 = vector.broadcast %170 : vector<4x1xf32> to vector<4x512xf32>
    %172 = arith.subf %19, %171 : vector<4x512xf32>
    %cst_53 = arith.constant 0.000000e+00 : f32
    %173 = vector.broadcast %cst_53 : f32 to vector<4x512xf32>
    %174 = arith.maximumf %172, %173 : vector<4x512xf32>
    %cst_54 = arith.constant dense<0.000000e+00> : vector<4xf32>
    %175 = vector.multi_reduction <add>, %174, %cst_54 [1] : vector<4x512xf32> to vector<4xf32>
    %176 = vector.shape_cast %175 : vector<4xf32> to vector<4x1xf32>
    %cst_55 = arith.constant 1.000000e+00 : f32
    %177 = vector.broadcast %cst_55 : f32 to vector<4x1xf32>
    %178 = arith.cmpf ogt, %176, %177 : vector<4x1xf32>
    %179 = arith.select %178, %170, %166 : vector<4x1xi1>, vector<4x1xf32>
    %180 = arith.select %178, %167, %170 : vector<4x1xi1>, vector<4x1xf32>
    %c12_i32 = arith.constant 12 : i32
    %181 = arith.addf %179, %180 : vector<4x1xf32>
    %cst_56 = arith.constant 5.000000e-01 : f32
    %182 = vector.broadcast %cst_56 : f32 to vector<4x1xf32>
    %183 = arith.mulf %182, %181 : vector<4x1xf32>
    %184 = vector.broadcast %183 : vector<4x1xf32> to vector<4x512xf32>
    %185 = arith.subf %19, %184 : vector<4x512xf32>
    %cst_57 = arith.constant 0.000000e+00 : f32
    %186 = vector.broadcast %cst_57 : f32 to vector<4x512xf32>
    %187 = arith.maximumf %185, %186 : vector<4x512xf32>
    %cst_58 = arith.constant dense<0.000000e+00> : vector<4xf32>
    %188 = vector.multi_reduction <add>, %187, %cst_58 [1] : vector<4x512xf32> to vector<4xf32>
    %189 = vector.shape_cast %188 : vector<4xf32> to vector<4x1xf32>
    %cst_59 = arith.constant 1.000000e+00 : f32
    %190 = vector.broadcast %cst_59 : f32 to vector<4x1xf32>
    %191 = arith.cmpf ogt, %189, %190 : vector<4x1xf32>
    %192 = arith.select %191, %183, %179 : vector<4x1xi1>, vector<4x1xf32>
    %193 = arith.select %191, %180, %183 : vector<4x1xi1>, vector<4x1xf32>
    %c13_i32 = arith.constant 13 : i32
    %194 = arith.addf %192, %193 : vector<4x1xf32>
    %cst_60 = arith.constant 5.000000e-01 : f32
    %195 = vector.broadcast %cst_60 : f32 to vector<4x1xf32>
    %196 = arith.mulf %195, %194 : vector<4x1xf32>
    %197 = vector.broadcast %196 : vector<4x1xf32> to vector<4x512xf32>
    %198 = arith.subf %19, %197 : vector<4x512xf32>
    %cst_61 = arith.constant 0.000000e+00 : f32
    %199 = vector.broadcast %cst_61 : f32 to vector<4x512xf32>
    %200 = arith.maximumf %198, %199 : vector<4x512xf32>
    %cst_62 = arith.constant dense<0.000000e+00> : vector<4xf32>
    %201 = vector.multi_reduction <add>, %200, %cst_62 [1] : vector<4x512xf32> to vector<4xf32>
    %202 = vector.shape_cast %201 : vector<4xf32> to vector<4x1xf32>
    %cst_63 = arith.constant 1.000000e+00 : f32
    %203 = vector.broadcast %cst_63 : f32 to vector<4x1xf32>
    %204 = arith.cmpf ogt, %202, %203 : vector<4x1xf32>
    %205 = arith.select %204, %196, %192 : vector<4x1xi1>, vector<4x1xf32>
    %206 = arith.select %204, %193, %196 : vector<4x1xi1>, vector<4x1xf32>
    %c14_i32 = arith.constant 14 : i32
    %207 = arith.addf %205, %206 : vector<4x1xf32>
    %cst_64 = arith.constant 5.000000e-01 : f32
    %208 = vector.broadcast %cst_64 : f32 to vector<4x1xf32>
    %209 = arith.mulf %208, %207 : vector<4x1xf32>
    %210 = vector.broadcast %209 : vector<4x1xf32> to vector<4x512xf32>
    %211 = arith.subf %19, %210 : vector<4x512xf32>
    %cst_65 = arith.constant 0.000000e+00 : f32
    %212 = vector.broadcast %cst_65 : f32 to vector<4x512xf32>
    %213 = arith.maximumf %211, %212 : vector<4x512xf32>
    %cst_66 = arith.constant dense<0.000000e+00> : vector<4xf32>
    %214 = vector.multi_reduction <add>, %213, %cst_66 [1] : vector<4x512xf32> to vector<4xf32>
    %215 = vector.shape_cast %214 : vector<4xf32> to vector<4x1xf32>
    %cst_67 = arith.constant 1.000000e+00 : f32
    %216 = vector.broadcast %cst_67 : f32 to vector<4x1xf32>
    %217 = arith.cmpf ogt, %215, %216 : vector<4x1xf32>
    %218 = arith.select %217, %209, %205 : vector<4x1xi1>, vector<4x1xf32>
    %219 = arith.select %217, %206, %209 : vector<4x1xi1>, vector<4x1xf32>
    %c15_i32 = arith.constant 15 : i32
    %220 = arith.addf %218, %219 : vector<4x1xf32>
    %cst_68 = arith.constant 5.000000e-01 : f32
    %221 = vector.broadcast %cst_68 : f32 to vector<4x1xf32>
    %222 = arith.mulf %221, %220 : vector<4x1xf32>
    %223 = vector.broadcast %222 : vector<4x1xf32> to vector<4x512xf32>
    %224 = arith.subf %19, %223 : vector<4x512xf32>
    %cst_69 = arith.constant 0.000000e+00 : f32
    %225 = vector.broadcast %cst_69 : f32 to vector<4x512xf32>
    %226 = arith.maximumf %224, %225 : vector<4x512xf32>
    %cst_70 = arith.constant dense<0.000000e+00> : vector<4xf32>
    %227 = vector.multi_reduction <add>, %226, %cst_70 [1] : vector<4x512xf32> to vector<4xf32>
    %228 = vector.shape_cast %227 : vector<4xf32> to vector<4x1xf32>
    %cst_71 = arith.constant 1.000000e+00 : f32
    %229 = vector.broadcast %cst_71 : f32 to vector<4x1xf32>
    %230 = arith.cmpf ogt, %228, %229 : vector<4x1xf32>
    %231 = arith.select %230, %222, %218 : vector<4x1xi1>, vector<4x1xf32>
    %232 = arith.select %230, %219, %222 : vector<4x1xi1>, vector<4x1xf32>
    %c16_i32 = arith.constant 16 : i32
    %233 = arith.addf %231, %232 : vector<4x1xf32>
    %cst_72 = arith.constant 5.000000e-01 : f32
    %234 = vector.broadcast %cst_72 : f32 to vector<4x1xf32>
    %235 = arith.mulf %234, %233 : vector<4x1xf32>
    %236 = vector.broadcast %235 : vector<4x1xf32> to vector<4x512xf32>
    %237 = arith.subf %19, %236 : vector<4x512xf32>
    %cst_73 = arith.constant 0.000000e+00 : f32
    %238 = vector.broadcast %cst_73 : f32 to vector<4x512xf32>
    %239 = arith.maximumf %237, %238 : vector<4x512xf32>
    %cst_74 = arith.constant dense<0.000000e+00> : vector<4xf32>
    %240 = vector.multi_reduction <add>, %239, %cst_74 [1] : vector<4x512xf32> to vector<4xf32>
    %241 = vector.shape_cast %240 : vector<4xf32> to vector<4x1xf32>
    %cst_75 = arith.constant 1.000000e+00 : f32
    %242 = vector.broadcast %cst_75 : f32 to vector<4x1xf32>
    %243 = arith.cmpf ogt, %241, %242 : vector<4x1xf32>
    %244 = arith.select %243, %235, %231 : vector<4x1xi1>, vector<4x1xf32>
    %245 = arith.select %243, %232, %235 : vector<4x1xi1>, vector<4x1xf32>
    %c17_i32 = arith.constant 17 : i32
    %246 = arith.addf %244, %245 : vector<4x1xf32>
    %cst_76 = arith.constant 5.000000e-01 : f32
    %247 = vector.broadcast %cst_76 : f32 to vector<4x1xf32>
    %248 = arith.mulf %247, %246 : vector<4x1xf32>
    %249 = vector.broadcast %248 : vector<4x1xf32> to vector<4x512xf32>
    %250 = arith.subf %19, %249 : vector<4x512xf32>
    %cst_77 = arith.constant 0.000000e+00 : f32
    %251 = vector.broadcast %cst_77 : f32 to vector<4x512xf32>
    %252 = arith.maximumf %250, %251 : vector<4x512xf32>
    %cst_78 = arith.constant dense<0.000000e+00> : vector<4xf32>
    %253 = vector.multi_reduction <add>, %252, %cst_78 [1] : vector<4x512xf32> to vector<4xf32>
    %254 = vector.shape_cast %253 : vector<4xf32> to vector<4x1xf32>
    %cst_79 = arith.constant 1.000000e+00 : f32
    %255 = vector.broadcast %cst_79 : f32 to vector<4x1xf32>
    %256 = arith.cmpf ogt, %254, %255 : vector<4x1xf32>
    %257 = arith.select %256, %248, %244 : vector<4x1xi1>, vector<4x1xf32>
    %258 = arith.select %256, %245, %248 : vector<4x1xi1>, vector<4x1xf32>
    %c18_i32 = arith.constant 18 : i32
    %259 = arith.addf %257, %258 : vector<4x1xf32>
    %cst_80 = arith.constant 5.000000e-01 : f32
    %260 = vector.broadcast %cst_80 : f32 to vector<4x1xf32>
    %261 = arith.mulf %260, %259 : vector<4x1xf32>
    %262 = vector.broadcast %261 : vector<4x1xf32> to vector<4x512xf32>
    %263 = arith.subf %19, %262 : vector<4x512xf32>
    %cst_81 = arith.constant 0.000000e+00 : f32
    %264 = vector.broadcast %cst_81 : f32 to vector<4x512xf32>
    %265 = arith.maximumf %263, %264 : vector<4x512xf32>
    %cst_82 = arith.constant dense<0.000000e+00> : vector<4xf32>
    %266 = vector.multi_reduction <add>, %265, %cst_82 [1] : vector<4x512xf32> to vector<4xf32>
    %267 = vector.shape_cast %266 : vector<4xf32> to vector<4x1xf32>
    %cst_83 = arith.constant 1.000000e+00 : f32
    %268 = vector.broadcast %cst_83 : f32 to vector<4x1xf32>
    %269 = arith.cmpf ogt, %267, %268 : vector<4x1xf32>
    %270 = arith.select %269, %261, %257 : vector<4x1xi1>, vector<4x1xf32>
    %271 = arith.select %269, %258, %261 : vector<4x1xi1>, vector<4x1xf32>
    %c19_i32 = arith.constant 19 : i32
    %272 = arith.addf %270, %271 : vector<4x1xf32>
    %cst_84 = arith.constant 5.000000e-01 : f32
    %273 = vector.broadcast %cst_84 : f32 to vector<4x1xf32>
    %274 = arith.mulf %273, %272 : vector<4x1xf32>
    %275 = vector.broadcast %274 : vector<4x1xf32> to vector<4x512xf32>
    %276 = arith.subf %19, %275 : vector<4x512xf32>
    %cst_85 = arith.constant 0.000000e+00 : f32
    %277 = vector.broadcast %cst_85 : f32 to vector<4x512xf32>
    %278 = arith.maximumf %276, %277 : vector<4x512xf32>
    %cst_86 = arith.constant dense<0.000000e+00> : vector<4xf32>
    %279 = vector.multi_reduction <add>, %278, %cst_86 [1] : vector<4x512xf32> to vector<4xf32>
    %280 = vector.shape_cast %279 : vector<4xf32> to vector<4x1xf32>
    %cst_87 = arith.constant 1.000000e+00 : f32
    %281 = vector.broadcast %cst_87 : f32 to vector<4x1xf32>
    %282 = arith.cmpf ogt, %280, %281 : vector<4x1xf32>
    %283 = arith.select %282, %274, %270 : vector<4x1xi1>, vector<4x1xf32>
    %284 = arith.select %282, %271, %274 : vector<4x1xi1>, vector<4x1xf32>
    %c20_i32 = arith.constant 20 : i32
    %285 = arith.addf %283, %284 : vector<4x1xf32>
    %cst_88 = arith.constant 5.000000e-01 : f32
    %286 = vector.broadcast %cst_88 : f32 to vector<4x1xf32>
    %287 = arith.mulf %286, %285 : vector<4x1xf32>
    %288 = vector.broadcast %287 : vector<4x1xf32> to vector<4x512xf32>
    %289 = arith.subf %19, %288 : vector<4x512xf32>
    %cst_89 = arith.constant 0.000000e+00 : f32
    %290 = vector.broadcast %cst_89 : f32 to vector<4x512xf32>
    %291 = arith.maximumf %289, %290 : vector<4x512xf32>
    %cst_90 = arith.constant dense<0.000000e+00> : vector<4xf32>
    %292 = vector.multi_reduction <add>, %291, %cst_90 [1] : vector<4x512xf32> to vector<4xf32>
    %293 = vector.shape_cast %292 : vector<4xf32> to vector<4x1xf32>
    %cst_91 = arith.constant 1.000000e+00 : f32
    %294 = vector.broadcast %cst_91 : f32 to vector<4x1xf32>
    %295 = arith.cmpf ogt, %293, %294 : vector<4x1xf32>
    %296 = arith.select %295, %287, %283 : vector<4x1xi1>, vector<4x1xf32>
    %297 = arith.select %295, %284, %287 : vector<4x1xi1>, vector<4x1xf32>
    %c21_i32 = arith.constant 21 : i32
    %298 = arith.addf %296, %297 : vector<4x1xf32>
    %cst_92 = arith.constant 5.000000e-01 : f32
    %299 = vector.broadcast %cst_92 : f32 to vector<4x1xf32>
    %300 = arith.mulf %299, %298 : vector<4x1xf32>
    %301 = vector.broadcast %300 : vector<4x1xf32> to vector<4x512xf32>
    %302 = arith.subf %19, %301 : vector<4x512xf32>
    %cst_93 = arith.constant 0.000000e+00 : f32
    %303 = vector.broadcast %cst_93 : f32 to vector<4x512xf32>
    %304 = arith.maximumf %302, %303 : vector<4x512xf32>
    %cst_94 = arith.constant dense<0.000000e+00> : vector<4xf32>
    %305 = vector.multi_reduction <add>, %304, %cst_94 [1] : vector<4x512xf32> to vector<4xf32>
    %306 = vector.shape_cast %305 : vector<4xf32> to vector<4x1xf32>
    %cst_95 = arith.constant 1.000000e+00 : f32
    %307 = vector.broadcast %cst_95 : f32 to vector<4x1xf32>
    %308 = arith.cmpf ogt, %306, %307 : vector<4x1xf32>
    %309 = arith.select %308, %300, %296 : vector<4x1xi1>, vector<4x1xf32>
    %310 = arith.select %308, %297, %300 : vector<4x1xi1>, vector<4x1xf32>
    %c22_i32 = arith.constant 22 : i32
    %311 = arith.addf %309, %310 : vector<4x1xf32>
    %cst_96 = arith.constant 5.000000e-01 : f32
    %312 = vector.broadcast %cst_96 : f32 to vector<4x1xf32>
    %313 = arith.mulf %312, %311 : vector<4x1xf32>
    %314 = vector.broadcast %313 : vector<4x1xf32> to vector<4x512xf32>
    %315 = arith.subf %19, %314 : vector<4x512xf32>
    %cst_97 = arith.constant 0.000000e+00 : f32
    %316 = vector.broadcast %cst_97 : f32 to vector<4x512xf32>
    %317 = arith.maximumf %315, %316 : vector<4x512xf32>
    %cst_98 = arith.constant dense<0.000000e+00> : vector<4xf32>
    %318 = vector.multi_reduction <add>, %317, %cst_98 [1] : vector<4x512xf32> to vector<4xf32>
    %319 = vector.shape_cast %318 : vector<4xf32> to vector<4x1xf32>
    %cst_99 = arith.constant 1.000000e+00 : f32
    %320 = vector.broadcast %cst_99 : f32 to vector<4x1xf32>
    %321 = arith.cmpf ogt, %319, %320 : vector<4x1xf32>
    %322 = arith.select %321, %313, %309 : vector<4x1xi1>, vector<4x1xf32>
    %323 = arith.select %321, %310, %313 : vector<4x1xi1>, vector<4x1xf32>
    %c23_i32 = arith.constant 23 : i32
    %324 = arith.addf %322, %323 : vector<4x1xf32>
    %cst_100 = arith.constant 5.000000e-01 : f32
    %325 = vector.broadcast %cst_100 : f32 to vector<4x1xf32>
    %326 = arith.mulf %325, %324 : vector<4x1xf32>
    %327 = vector.broadcast %326 : vector<4x1xf32> to vector<4x512xf32>
    %328 = arith.subf %19, %327 : vector<4x512xf32>
    %cst_101 = arith.constant 0.000000e+00 : f32
    %329 = vector.broadcast %cst_101 : f32 to vector<4x512xf32>
    %330 = arith.maximumf %328, %329 : vector<4x512xf32>
    %cst_102 = arith.constant dense<0.000000e+00> : vector<4xf32>
    %331 = vector.multi_reduction <add>, %330, %cst_102 [1] : vector<4x512xf32> to vector<4xf32>
    %332 = vector.shape_cast %331 : vector<4xf32> to vector<4x1xf32>
    %cst_103 = arith.constant 1.000000e+00 : f32
    %333 = vector.broadcast %cst_103 : f32 to vector<4x1xf32>
    %334 = arith.cmpf ogt, %332, %333 : vector<4x1xf32>
    %335 = arith.select %334, %326, %322 : vector<4x1xi1>, vector<4x1xf32>
    %336 = arith.select %334, %323, %326 : vector<4x1xi1>, vector<4x1xf32>
    %c24_i32 = arith.constant 24 : i32
    %337 = arith.addf %335, %336 : vector<4x1xf32>
    %cst_104 = arith.constant 5.000000e-01 : f32
    %338 = vector.broadcast %cst_104 : f32 to vector<4x1xf32>
    %339 = arith.mulf %338, %337 : vector<4x1xf32>
    %340 = vector.broadcast %339 : vector<4x1xf32> to vector<4x512xf32>
    %341 = arith.subf %19, %340 : vector<4x512xf32>
    %cst_105 = arith.constant 0.000000e+00 : f32
    %342 = vector.broadcast %cst_105 : f32 to vector<4x512xf32>
    %343 = arith.maximumf %341, %342 : vector<4x512xf32>
    %cst_106 = arith.constant dense<0.000000e+00> : vector<4xf32>
    %344 = vector.multi_reduction <add>, %343, %cst_106 [1] : vector<4x512xf32> to vector<4xf32>
    %345 = vector.shape_cast %344 : vector<4xf32> to vector<4x1xf32>
    %cst_107 = arith.constant 1.000000e+00 : f32
    %346 = vector.broadcast %cst_107 : f32 to vector<4x1xf32>
    %347 = arith.cmpf ogt, %345, %346 : vector<4x1xf32>
    %348 = arith.select %347, %339, %335 : vector<4x1xi1>, vector<4x1xf32>
    %349 = arith.select %347, %336, %339 : vector<4x1xi1>, vector<4x1xf32>
    %c25_i32 = arith.constant 25 : i32
    %350 = arith.addf %348, %349 : vector<4x1xf32>
    %cst_108 = arith.constant 5.000000e-01 : f32
    %351 = vector.broadcast %cst_108 : f32 to vector<4x1xf32>
    %352 = arith.mulf %351, %350 : vector<4x1xf32>
    %353 = vector.broadcast %352 : vector<4x1xf32> to vector<4x512xf32>
    %354 = arith.subf %19, %353 : vector<4x512xf32>
    %cst_109 = arith.constant 0.000000e+00 : f32
    %355 = vector.broadcast %cst_109 : f32 to vector<4x512xf32>
    %356 = arith.maximumf %354, %355 : vector<4x512xf32>
    %cst_110 = arith.constant dense<0.000000e+00> : vector<4xf32>
    %357 = vector.multi_reduction <add>, %356, %cst_110 [1] : vector<4x512xf32> to vector<4xf32>
    %358 = vector.shape_cast %357 : vector<4xf32> to vector<4x1xf32>
    %cst_111 = arith.constant 1.000000e+00 : f32
    %359 = vector.broadcast %cst_111 : f32 to vector<4x1xf32>
    %360 = arith.cmpf ogt, %358, %359 : vector<4x1xf32>
    %361 = arith.select %360, %352, %348 : vector<4x1xi1>, vector<4x1xf32>
    %362 = arith.select %360, %349, %352 : vector<4x1xi1>, vector<4x1xf32>
    %c26_i32 = arith.constant 26 : i32
    %363 = arith.addf %361, %362 : vector<4x1xf32>
    %cst_112 = arith.constant 5.000000e-01 : f32
    %364 = vector.broadcast %cst_112 : f32 to vector<4x1xf32>
    %365 = arith.mulf %364, %363 : vector<4x1xf32>
    %366 = vector.broadcast %365 : vector<4x1xf32> to vector<4x512xf32>
    %367 = arith.subf %19, %366 : vector<4x512xf32>
    %cst_113 = arith.constant 0.000000e+00 : f32
    %368 = vector.broadcast %cst_113 : f32 to vector<4x512xf32>
    %369 = arith.maximumf %367, %368 : vector<4x512xf32>
    %cst_114 = arith.constant dense<0.000000e+00> : vector<4xf32>
    %370 = vector.multi_reduction <add>, %369, %cst_114 [1] : vector<4x512xf32> to vector<4xf32>
    %371 = vector.shape_cast %370 : vector<4xf32> to vector<4x1xf32>
    %cst_115 = arith.constant 1.000000e+00 : f32
    %372 = vector.broadcast %cst_115 : f32 to vector<4x1xf32>
    %373 = arith.cmpf ogt, %371, %372 : vector<4x1xf32>
    %374 = arith.select %373, %365, %361 : vector<4x1xi1>, vector<4x1xf32>
    %375 = arith.select %373, %362, %365 : vector<4x1xi1>, vector<4x1xf32>
    %c27_i32 = arith.constant 27 : i32
    %376 = arith.addf %374, %375 : vector<4x1xf32>
    %cst_116 = arith.constant 5.000000e-01 : f32
    %377 = vector.broadcast %cst_116 : f32 to vector<4x1xf32>
    %378 = arith.mulf %377, %376 : vector<4x1xf32>
    %379 = vector.broadcast %378 : vector<4x1xf32> to vector<4x512xf32>
    %380 = arith.subf %19, %379 : vector<4x512xf32>
    %cst_117 = arith.constant 0.000000e+00 : f32
    %381 = vector.broadcast %cst_117 : f32 to vector<4x512xf32>
    %382 = arith.maximumf %380, %381 : vector<4x512xf32>
    %cst_118 = arith.constant dense<0.000000e+00> : vector<4xf32>
    %383 = vector.multi_reduction <add>, %382, %cst_118 [1] : vector<4x512xf32> to vector<4xf32>
    %384 = vector.shape_cast %383 : vector<4xf32> to vector<4x1xf32>
    %cst_119 = arith.constant 1.000000e+00 : f32
    %385 = vector.broadcast %cst_119 : f32 to vector<4x1xf32>
    %386 = arith.cmpf ogt, %384, %385 : vector<4x1xf32>
    %387 = arith.select %386, %378, %374 : vector<4x1xi1>, vector<4x1xf32>
    %388 = arith.select %386, %375, %378 : vector<4x1xi1>, vector<4x1xf32>
    %c28_i32 = arith.constant 28 : i32
    %389 = arith.addf %387, %388 : vector<4x1xf32>
    %cst_120 = arith.constant 5.000000e-01 : f32
    %390 = vector.broadcast %cst_120 : f32 to vector<4x1xf32>
    %391 = arith.mulf %390, %389 : vector<4x1xf32>
    %392 = vector.broadcast %391 : vector<4x1xf32> to vector<4x512xf32>
    %393 = arith.subf %19, %392 : vector<4x512xf32>
    %cst_121 = arith.constant 0.000000e+00 : f32
    %394 = vector.broadcast %cst_121 : f32 to vector<4x512xf32>
    %395 = arith.maximumf %393, %394 : vector<4x512xf32>
    %cst_122 = arith.constant dense<0.000000e+00> : vector<4xf32>
    %396 = vector.multi_reduction <add>, %395, %cst_122 [1] : vector<4x512xf32> to vector<4xf32>
    %397 = vector.shape_cast %396 : vector<4xf32> to vector<4x1xf32>
    %cst_123 = arith.constant 1.000000e+00 : f32
    %398 = vector.broadcast %cst_123 : f32 to vector<4x1xf32>
    %399 = arith.cmpf ogt, %397, %398 : vector<4x1xf32>
    %400 = arith.select %399, %391, %387 : vector<4x1xi1>, vector<4x1xf32>
    %401 = arith.select %399, %388, %391 : vector<4x1xi1>, vector<4x1xf32>
    %c29_i32 = arith.constant 29 : i32
    %402 = arith.addf %400, %401 : vector<4x1xf32>
    %cst_124 = arith.constant 5.000000e-01 : f32
    %403 = vector.broadcast %cst_124 : f32 to vector<4x1xf32>
    %404 = arith.mulf %403, %402 : vector<4x1xf32>
    %405 = vector.broadcast %404 : vector<4x1xf32> to vector<4x512xf32>
    %406 = arith.subf %19, %405 : vector<4x512xf32>
    %cst_125 = arith.constant 0.000000e+00 : f32
    %407 = vector.broadcast %cst_125 : f32 to vector<4x512xf32>
    %408 = arith.maximumf %406, %407 : vector<4x512xf32>
    %cst_126 = arith.constant dense<0.000000e+00> : vector<4xf32>
    %409 = vector.multi_reduction <add>, %408, %cst_126 [1] : vector<4x512xf32> to vector<4xf32>
    %410 = vector.shape_cast %409 : vector<4xf32> to vector<4x1xf32>
    %cst_127 = arith.constant 1.000000e+00 : f32
    %411 = vector.broadcast %cst_127 : f32 to vector<4x1xf32>
    %412 = arith.cmpf ogt, %410, %411 : vector<4x1xf32>
    %413 = arith.select %412, %404, %400 : vector<4x1xi1>, vector<4x1xf32>
    %414 = arith.select %412, %401, %404 : vector<4x1xi1>, vector<4x1xf32>
    %415 = arith.addf %413, %414 : vector<4x1xf32>
    %cst_128 = arith.constant 5.000000e-01 : f32
    %416 = vector.broadcast %cst_128 : f32 to vector<4x1xf32>
    %417 = arith.mulf %416, %415 : vector<4x1xf32>
    %cst_129 = arith.constant 0.000000e+00 : f32
    %418 = vector.broadcast %cst_129 : f32 to vector<4x512xf32>
    %419 = arith.cmpf oge, %18, %418 : vector<4x512xf32>
    %cst_130 = arith.constant 1.000000e+00 : f32
    %cst_131 = arith.constant -1.000000e+00 : f32
    %420 = vector.broadcast %cst_130 : f32 to vector<4x512xf32>
    %421 = vector.broadcast %cst_131 : f32 to vector<4x512xf32>
    %422 = arith.select %419, %420, %421 : vector<4x512xi1>, vector<4x512xf32>
    %423 = vector.broadcast %417 : vector<4x1xf32> to vector<4x512xf32>
    %424 = arith.subf %19, %423 : vector<4x512xf32>
    %cst_132 = arith.constant 0.000000e+00 : f32
    %425 = vector.broadcast %cst_132 : f32 to vector<4x512xf32>
    %426 = arith.maximumf %424, %425 : vector<4x512xf32>
    %427 = arith.mulf %422, %426 : vector<4x512xf32>
    %cst_133 = arith.constant 1.000000e+00 : f32
    %428 = vector.broadcast %cst_133 : f32 to vector<4x1xf32>
    %429 = arith.cmpf ole, %21, %428 : vector<4x1xf32>
    %430 = vector.shape_cast %429 : vector<4x1xi1> to vector<4x1xi1>
    %431 = vector.broadcast %430 : vector<4x1xi1> to vector<4x512xi1>
    %432 = arith.select %431, %18, %427 : vector<4x512xi1>, vector<4x512xf32>
    %c0_134 = arith.constant 0 : index
    %c0_135 = arith.constant 0 : index
    %433 = vector.load %arg2[%c0_134, %c0_135] : memref<512x128xf32, #tpu.memory_space<vmem>>, vector<512x128xf32>
    %cst_136 = arith.constant dense<0.000000e+00> : vector<4x128xf32>
    %434 = tpu.matmul %432, %433, %cst_136 {dimension_numbers = #tpu.dot_dimension_numbers<[1], [0], [0], [1], [0, 0, 1, 1], [], []>} : vector<4x512xf32>, vector<512x128xf32>, vector<4x128xf32> -> vector<4x128xf32>
    %c0_137 = arith.constant 0 : index
    %c0_138 = arith.constant 0 : index
    %435 = vector.load %arg3[%c0_137, %c0_138] : memref<1x128xf32, #tpu.memory_space<vmem>>, vector<1x128xf32>
    %436 = vector.broadcast %435 : vector<1x128xf32> to vector<4x128xf32>
    %437 = arith.addf %434, %436 : vector<4x128xf32>
    %cst_139 = arith.constant 0.000000e+00 : f32
    %438 = vector.broadcast %cst_139 : f32 to vector<4x128xf32>
    %439 = arith.maximumf %437, %438 : vector<4x128xf32>
    %c0_140 = arith.constant 0 : index
    %c0_141 = arith.constant 0 : index
    %440 = vector.load %arg4[%c0_140, %c0_141] : memref<128x128xf32, #tpu.memory_space<vmem>>, vector<128x128xf32>
    %cst_142 = arith.constant dense<0.000000e+00> : vector<4x128xf32>
    %441 = tpu.matmul %439, %440, %cst_142 {dimension_numbers = #tpu.dot_dimension_numbers<[1], [0], [0], [1], [0, 0, 1, 1], [], []>} : vector<4x128xf32>, vector<128x128xf32>, vector<4x128xf32> -> vector<4x128xf32>
    %c0_143 = arith.constant 0 : index
    %c0_144 = arith.constant 0 : index
    %442 = vector.load %arg5[%c0_143, %c0_144] : memref<1x128xf32, #tpu.memory_space<vmem>>, vector<1x128xf32>
    %443 = vector.broadcast %442 : vector<1x128xf32> to vector<4x128xf32>
    %444 = arith.addf %441, %443 : vector<4x128xf32>
    %cst_145 = arith.constant 0.000000e+00 : f32
    %445 = vector.broadcast %cst_145 : f32 to vector<4x128xf32>
    %446 = arith.maximumf %444, %445 : vector<4x128xf32>
    %c0_146 = arith.constant 0 : index
    %c0_147 = arith.constant 0 : index
    %447 = vector.load %arg6[%c0_146, %c0_147] : memref<128x128xf32, #tpu.memory_space<vmem>>, vector<128x128xf32>
    %cst_148 = arith.constant dense<0.000000e+00> : vector<4x128xf32>
    %448 = tpu.matmul %446, %447, %cst_148 {dimension_numbers = #tpu.dot_dimension_numbers<[1], [0], [0], [1], [0, 0, 1, 1], [], []>} : vector<4x128xf32>, vector<128x128xf32>, vector<4x128xf32> -> vector<4x128xf32>
    %c0_149 = arith.constant 0 : index
    %c0_150 = arith.constant 0 : index
    %449 = vector.load %arg7[%c0_149, %c0_150] : memref<1x128xf32, #tpu.memory_space<vmem>>, vector<1x128xf32>
    %450 = vector.broadcast %449 : vector<1x128xf32> to vector<4x128xf32>
    %451 = arith.addf %448, %450 : vector<4x128xf32>
    %c0_151 = arith.constant 0 : index
    %c0_152 = arith.constant 0 : index
    %452 = vector.load %arg8[%c0_151, %c0_152] : memref<4x128xf32, #tpu.memory_space<vmem>>, vector<4x128xf32>
    tpu.vector_store %arg8[%c0_151, %c0_152], %451 {strides = array<i32>} : memref<4x128xf32, #tpu.memory_space<vmem>>, vector<4x128xf32>,
    return
  }
  func.func @transform_0(%arg0: i32) -> (i32, i32) {
    %c0_i32 = arith.constant 0 : i32
    %c0_i32_0 = arith.constant 0 : i32
    %c0_i32_1 = arith.constant 0 : i32
    return %c0_i32, %c0_i32_0 : i32, i32
  }
  func.func @transform_1(%arg0: i32) -> (i32, i32) {
    %c0_i32 = arith.constant 0 : i32
    %c0_i32_0 = arith.constant 0 : i32
    %c0_i32_1 = arith.constant 0 : i32
    return %c0_i32, %c0_i32_0 : i32, i32
  }
  func.func @transform_2(%arg0: i32) -> (i32, i32) {
    %c0_i32 = arith.constant 0 : i32
    %c0_i32_0 = arith.constant 0 : i32
    %c0_i32_1 = arith.constant 0 : i32
    return %c0_i32, %c0_i32_0 : i32, i32
  }
  func.func @transform_3(%arg0: i32) -> (i32, i32) {
    %c0_i32 = arith.constant 0 : i32
    %c0_i32_0 = arith.constant 0 : i32
    %c0_i32_1 = arith.constant 0 : i32
    return %c0_i32, %c0_i32_0 : i32, i32
  }
  func.func @transform_4(%arg0: i32) -> (i32, i32) {
    %c0_i32 = arith.constant 0 : i32
    %c0_i32_0 = arith.constant 0 : i32
    %c0_i32_1 = arith.constant 0 : i32
    return %c0_i32, %c0_i32_0 : i32, i32
  }
  func.func @transform_5(%arg0: i32) -> (i32, i32) {
    %c0_i32 = arith.constant 0 : i32
    %c0_i32_0 = arith.constant 0 : i32
    %c0_i32_1 = arith.constant 0 : i32
    return %c0_i32, %c0_i32_0 : i32, i32
  }
  func.func @transform_6(%arg0: i32) -> (i32, i32) {
    %c0_i32 = arith.constant 0 : i32
    %c0_i32_0 = arith.constant 0 : i32
    %c0_i32_1 = arith.constant 0 : i32
    return %c0_i32, %c0_i32_0 : i32, i32
  }
  func.func @transform_7(%arg0: i32) -> (i32, i32) {
    %c0_i32 = arith.constant 0 : i32
    %c0_i32_0 = arith.constant 0 : i32
    %c0_i32_1 = arith.constant 0 : i32
    return %c0_i32, %c0_i32_0 : i32, i32
  }
}

</mosaic_0001>

<bundles_post_ra>
// kernel: net_forward.3
= control target key start
LH: loop header
LB: loop body
LE: loop exit
PB: predicated region body
PF: predicated region fallthrough
CT: control target
= control target key end

     0   :  { %s1239_s12 = smov 0   ;;  %s1453_s0 = inlined_call_operand.vmem [shape: bf16[3584,128], index: 0, kind: input, shape index: {}]   ;;  %s1454_s1 = inlined_call_operand.vmem [shape: bf16[128,128], index: 1, kind: input, shape index: {}]   ;;  %s1455_s2 = inlined_call_operand.vmem [shape: f32[1,128], index: 2, kind: input, shape index: {}]   ;;  %s1456_s3 = inlined_call_operand.vmem [shape: f32[3584,128], index: 3, kind: output, shape index: {}]  }
   0x1 LB: > { %s975_s13 = sadd.s32 4294967295, %s1217_s12   ;;  %p979_p0 = scmp.ge.s32.totalorder %s1217_s12, 1  ;;  %s1217_s12 = sphi %s1239_s12, %s13_s12  }
   0x2   : > { %p138_p1 = scmp.lt.s32.totalorder %s1217_s12, 8 }
   0x4   : > { %p139_p2 = pnand %p979_p0, %p138_p1 }
   0x5   : > { %v1171_v0 = vld [vmem:[%s1454_s1] sm:$0xff] (!%p139_p2)   ;;  %s980_s16 = sshll.u32 (!%p139_p2), %s975_s13, 6  ;;  %v1172_v1 = vld [vmem:[%s1454_s1 + $0x8] sm:$0xff] (!%p139_p2)   ;;  %v1173_v2 = vld [vmem:[%s1454_s1 + $0x10] sm:$0xff] (!%p139_p2)  }
   0x6   : > { %142 = sbr.rel (%p139_p2) target bundleno = 314 (0x13a), region = 32  ;;  %p163_p3 = scmp.lt.s32.totalorder (!%p139_p2), %s980_s16, 447  ;;  %1067 = vmatprep.subr.bf16.mxu0 (!%p139_p2), %v1171_v0  ;;  %1147 = vmatprep.subr.bf16.mxu1 (!%p139_p2), %v1171_v0  ;;  %v1174_v3 = vld [vmem:[%s1454_s1 + $0x18] sm:$0xff] (!%p139_p2)   ;;  %v1175_v6 = vld [vmem:[%s1454_s1 + $0x20] sm:$0xff] (!%p139_p2)   ;;  %v1176_v7 = vld [vmem:[%s1454_s1 + $0x28] sm:$0xff] (!%p139_p2)  }
   0x7   : > { %1068 = vmatpush3.bf16.msra.mxu0 (!%p139_p2), %v1171_v0  ;;  %1155 = vmatpush3.bf16.msra.mxu1 (!%p139_p2), %v1171_v0  ;;  %v1177_v8 = vld [vmem:[%s1454_s1 + $0x30] sm:$0xff] (!%p139_p2)   ;;  %v1178_v9 = vld [vmem:[%s1454_s1 + $0x38] sm:$0xff] (!%p139_p2)   ;;  %v1314_v40 = vld [vmem:[%s1455_s2] ss:$0 sm:$0xff] (!%p139_p2) }
   0x8   : > { %1069 = vmatprep.subr.bf16.mxu0 (!%p139_p2), %v1172_v1  ;;  %1148 = vmatprep.subr.bf16.mxu1 (!%p139_p2), %v1172_v1 }
   0xb   : > { %1070 = vmatpush3.bf16.msra.mxu0 (!%p139_p2), %v1172_v1  ;;  %1156 = vmatpush3.bf16.msra.mxu1 (!%p139_p2), %v1172_v1 }
   0xc   : > { %1071 = vmatprep.subr.bf16.mxu0 (!%p139_p2), %v1173_v2  ;;  %1149 = vmatprep.subr.bf16.mxu1 (!%p139_p2), %v1173_v2 }
   0xd   : > { %s1458_s16 = smov (!%p163_p3, %s980_s16), 447 }
   0xe   : > { %s981_s21 = sshll.u32 %s1458_s16, 2  ;;  %s983_s10 = sshll.u32 %s1458_s16, 3 }
   0xf   : > { %s1262_s24 = scalar_lea.vmem %s1453_s0, %s981_s21  ;;  %1072 = vmatpush3.bf16.msra.mxu0 %v1173_v2  ;;  %1157 = vmatpush3.bf16.msra.mxu1 %v1173_v2  ;;  %s1322_s14 = scalar_lea.vmem %s1456_s3, %s983_s10 }
  0x10   : > { %v1179_v4 = vld [vmem:[%s1262_s24] sm:$0xff]   ;;  %1073 = vmatprep.subr.bf16.mxu0 %v1174_v3  ;;  %1150 = vmatprep.subr.bf16.mxu1 %v1174_v3  ;;  %v1181_v10 = vld [vmem:[%s1262_s24 + $0x8] sm:$0xff]   ;;  %v1183_v12 = vld [vmem:[%s1262_s24 + $0x10] sm:$0xff]  }
  0x11   : > { %v1180_v5 = vld [vmem:[%s1262_s24 + $0x80] sm:$0xff]   ;;  %1083 = vmatprep.mubr.bf16.mxu0 %v1179_v4  ;;  %v1182_v11 = vld [vmem:[%s1262_s24 + $0x88] sm:$0xff]   ;;  %v1184_v13 = vld [vmem:[%s1262_s24 + $0x90] sm:$0xff]  }
  0x12   : > { %1115 = vmatprep.mubr.bf16.mxu1 %v1180_v5  ;;  %v1185_v14 = vld [vmem:[%s1262_s24 + $0x18] sm:$0xff]   ;;  %v1187_v16 = vld [vmem:[%s1262_s24 + $0x20] sm:$0xff]   ;;  %v1189_v18 = vld [vmem:[%s1262_s24 + $0x28] sm:$0xff]  }
  0x13   : > { %1074 = vmatpush3.bf16.msra.mxu0 %v1174_v3  ;;  %1158 = vmatpush3.bf16.msra.mxu1 %v1174_v3  ;;  %v1186_v15 = vld [vmem:[%s1262_s24 + $0x98] sm:$0xff]   ;;  %v1188_v17 = vld [vmem:[%s1262_s24 + $0xa0] sm:$0xff]   ;;  %v1190_v19 = vld [vmem:[%s1262_s24 + $0xa8] sm:$0xff]  }
  0x14   : > { %1075 = vmatprep.subr.bf16.mxu0 %v1175_v6  ;;  %1151 = vmatprep.subr.bf16.mxu1 %v1175_v6  ;;  %v1191_v20 = vld [vmem:[%s1262_s24 + $0x30] sm:$0xff]   ;;  %v1193_v22 = vld [vmem:[%s1262_s24 + $0x38] sm:$0xff]   ;;  %v1195_v24 = vld [vmem:[%s1262_s24 + $0x40] sm:$0xff]  }
  0x15   : > { %v1192_v21 = vld [vmem:[%s1262_s24 + $0xb0] sm:$0xff]   ;;  %v1194_v23 = vld [vmem:[%s1262_s24 + $0xb8] sm:$0xff]   ;;  %v1196_v25 = vld [vmem:[%s1262_s24 + $0xc0] sm:$0xff]  }
  0x16   : > { %v1197_v26 = vld [vmem:[%s1262_s24 + $0x48] sm:$0xff]   ;;  %v1199_v28 = vld [vmem:[%s1262_s24 + $0x50] sm:$0xff]   ;;  %v1201_v30 = vld [vmem:[%s1262_s24 + $0x58] sm:$0xff]  }
  0x17   : > { %1076 = vmatpush3.bf16.msra.mxu0 %v1175_v6  ;;  %1159 = vmatpush3.bf16.msra.mxu1 %v1175_v6  ;;  %v1198_v27 = vld [vmem:[%s1262_s24 + $0xc8] sm:$0xff]   ;;  %v1200_v29 = vld [vmem:[%s1262_s24 + $0xd0] sm:$0xff]   ;;  %v1202_v31 = vld [vmem:[%s1262_s24 + $0xd8] sm:$0xff]  }
  0x18   : > { %1077 = vmatprep.subr.bf16.mxu0 %v1176_v7  ;;  %1152 = vmatprep.subr.bf16.mxu1 %v1176_v7  ;;  %v1203_v32 = vld [vmem:[%s1262_s24 + $0x60] sm:$0xff]   ;;  %v1205_v34 = vld [vmem:[%s1262_s24 + $0x68] sm:$0xff]   ;;  %v1207_v36 = vld [vmem:[%s1262_s24 + $0x70] sm:$0xff]  }
  0x19   : > { %v1204_v33 = vld [vmem:[%s1262_s24 + $0xe0] sm:$0xff]   ;;  %v1206_v35 = vld [vmem:[%s1262_s24 + $0xe8] sm:$0xff]   ;;  %v1208_v37 = vld [vmem:[%s1262_s24 + $0xf0] sm:$0xff]  }
  0x1a   : > { %v1209_v38 = vld [vmem:[%s1262_s24 + $0x78] sm:$0xff]  }
  0x1b   : > { %1078 = vmatpush3.bf16.msra.mxu0 %v1176_v7  ;;  %1160 = vmatpush3.bf16.msra.mxu1 %v1176_v7  ;;  %v1210_v39 = vld [vmem:[%s1262_s24 + $0xf8] sm:$0xff]  }
  0x1c   : > { %1079 = vmatprep.subr.bf16.mxu0 %v1177_v8  ;;  %1153 = vmatprep.subr.bf16.mxu1 %v1177_v8 }
  0x1f   : > { %1080 = vmatpush3.bf16.msra.mxu0 %v1177_v8  ;;  %1161 = vmatpush3.bf16.msra.mxu1 %v1177_v8 }
  0x20   : > { %1081 = vmatprep.subr.bf16.mxu0 %v1178_v9  ;;  %1154 = vmatprep.subr.bf16.mxu1 %v1178_v9 }
  0x23   : > { %1082 = vmatpush3.bf16.msra.mxu0 %v1178_v9  ;;  %1162 = vmatpush3.bf16.msra.mxu1 %v1178_v9 }
  0x26   : > { %1084 = vmatmul.mubr.bf16.vlgmr.msra.gmra.mrb[0].mxu0 %v1181_v10  ;;  %1116 = vmatmul.mubr.bf16.vlgmr.msra.gmra.mrb[0].mxu1 %v1182_v11 }
  0x27   : > { %1087 = vmatprep.mubr.bf16.mxu0 %v1183_v12  ;;  %1119 = vmatprep.mubr.bf16.mxu1 %v1184_v13 }
  0x2e   : > { %1088 = vmatmul.mubr.bf16.gmra.mrb[4].mxu0 %v1185_v14  ;;  %1120 = vmatmul.mubr.bf16.gmra.mrb[4].mxu1 %v1186_v15 }
  0x2f   : > { %1091 = vmatprep.mubr.bf16.mxu0 %v1187_v16  ;;  %1123 = vmatprep.mubr.bf16.mxu1 %v1188_v17 }
  0x36   : > { %1092 = vmatmul.mubr.bf16.gmra.mrb[8].mxu0 %v1189_v18  ;;  %1124 = vmatmul.mubr.bf16.gmra.mrb[8].mxu1 %v1190_v19 }
  0x37   : > { %1095 = vmatprep.mubr.bf16.mxu0 %v1191_v20  ;;  %1127 = vmatprep.mubr.bf16.mxu1 %v1192_v21 }
  0x3e   : > { %1096 = vmatmul.mubr.bf16.gmra.mrb[12].mxu0 %v1193_v22  ;;  %1128 = vmatmul.mubr.bf16.gmra.mrb[12].mxu1 %v1194_v23 }
  0x3f   : > { %1099 = vmatprep.mubr.bf16.mxu0 %v1195_v24  ;;  %1131 = vmatprep.mubr.bf16.mxu1 %v1196_v25 }
  0x46   : > { %1100 = vmatmul.mubr.bf16.gmra.mrb[16].mxu0 %v1197_v26  ;;  %1132 = vmatmul.mubr.bf16.gmra.mrb[16].mxu1 %v1198_v27 }
  0x47   : > { %1103 = vmatprep.mubr.bf16.mxu0 %v1199_v28  ;;  %1135 = vmatprep.mubr.bf16.mxu1 %v1200_v29 }
  0x4e   : > { %1104 = vmatmul.mubr.bf16.gmra.mrb[20].mxu0 %v1201_v30  ;;  %1136 = vmatmul.mubr.bf16.gmra.mrb[20].mxu1 %v1202_v31 }
  0x4f   : > { %1107 = vmatprep.mubr.bf16.mxu0 %v1203_v32  ;;  %1139 = vmatprep.mubr.bf16.mxu1 %v1204_v33 }
  0x56   : > { %1108 = vmatmul.mubr.bf16.gmra.mrb[24].mxu0 %v1205_v34  ;;  %1140 = vmatmul.mubr.bf16.gmra.mrb[24].mxu1 %v1206_v35 }
  0x57   : > { %1111 = vmatprep.mubr.bf16.mxu0 %v1207_v36  ;;  %1143 = vmatprep.mubr.bf16.mxu1 %v1208_v37 }
  0x5e   : > { %1112 = vmatmul.mubr.bf16.gmra.mrb[28].mxu0 %v1209_v38  ;;  %1144 = vmatmul.mubr.bf16.gmra.mrb[28].mxu1 %v1210_v39 }
  0xf9   : > { %v1085_v41 = vpop.f32.mrb[0].mxu0  ;;  %v1117_v42 = vpop.f32.mrb[0].mxu1 }
  0xfa   : > { %v545_v43 = vadd.f32 %v1085_v41, %v1314_v40  ;;  %v673_v44 = vadd.f32 %v1117_v42, %v1314_v40  ;;  %v536_v45 = vpop.f32.mrb[1].mxu0  ;;  %v664_v46 = vpop.f32.mrb[1].mxu1 }
  0xfb   : > { %v537_v47 = vadd.f32 %v1314_v40, %v536_v45  ;;  %v665_v48 = vadd.f32 %v1314_v40, %v664_v46  ;;  %v1086_v49 = vpop.f32.mrb[2].mxu0  ;;  %v1118_v50 = vpop.f32.mrb[2].mxu1 }
  0xfc   : > { %v793_v51 = vmax.f32 %v545_v43, 0.0  ;;  %v825_v52 = vmax.f32 %v673_v44, 0.0  ;;  %v548_v53 = vadd.f32 %v1086_v49, %v1314_v40  ;;  %v676_v54 = vadd.f32 %v1118_v50, %v1314_v40  ;;  %v539_v55 = vpop.f32.mrb[3].mxu0  ;;  %v667_v56 = vpop.f32.mrb[3].mxu1 }
  0xfd   : > { %v791_v57 = vmax.f32 %v537_v47, 0.0  ;;  %v823_v58 = vmax.f32 %v665_v48, 0.0  ;;  %v540_v59 = vadd.f32 %v1314_v40, %v539_v55  ;;  %v668_v60 = vadd.f32 %v1314_v40, %v667_v56 }
  0xfe   : > { %857 = vst [vmem:[%s1322_s14 + $0x10] sm:$0xff] %v793_v51  ;;  %889 = vst [vmem:[%s1322_s14 + $0x110] sm:$0xff] %v825_v52  ;;  %v794_v61 = vmax.f32 %v548_v53, 0.0  ;;  %v826_v62 = vmax.f32 %v676_v54, 0.0 }
  0xff   : > { %855 = vst [vmem:[%s1322_s14] sm:$0xff] %v791_v57  ;;  %887 = vst [vmem:[%s1322_s14 + $0x100] sm:$0xff] %v823_v58  ;;  %v792_v63 = vmax.f32 %v540_v59, 0.0  ;;  %v824_v0 = vmax.f32 %v668_v60, 0.0 }
 0x100   : > { %858 = vst [vmem:[%s1322_s14 + $0x18] sm:$0xff] %v794_v61  ;;  %890 = vst [vmem:[%s1322_s14 + $0x118] sm:$0xff] %v826_v62 }
 0x101   : > { %856 = vst [vmem:[%s1322_s14 + $0x8] sm:$0xff] %v792_v63  ;;  %888 = vst [vmem:[%s1322_s14 + $0x108] sm:$0xff] %v824_v0  ;;  %v1089_v1 = vpop.f32.mrb[4].mxu0  ;;  %v1121_v2 = vpop.f32.mrb[4].mxu1 }
 0x102   : > { %v561_v3 = vadd.f32 %v1089_v1, %v1314_v40  ;;  %v689_v4 = vadd.f32 %v1121_v2, %v1314_v40  ;;  %v552_v5 = vpop.f32.mrb[5].mxu0  ;;  %v680_v6 = vpop.f32.mrb[5].mxu1 }
 0x103   : > { %v553_v7 = vadd.f32 %v1314_v40, %v552_v5  ;;  %v681_v8 = vadd.f32 %v1314_v40, %v680_v6  ;;  %v1090_v9 = vpop.f32.mrb[6].mxu0  ;;  %v1122_v10 = vpop.f32.mrb[6].mxu1 }
 0x104   : > { %v797_v11 = vmax.f32 %v561_v3, 0.0  ;;  %v829_v12 = vmax.f32 %v689_v4, 0.0  ;;  %v564_v13 = vadd.f32 %v1090_v9, %v1314_v40  ;;  %v692_v14 = vadd.f32 %v1122_v10, %v1314_v40  ;;  %v555_v15 = vpop.f32.mrb[7].mxu0  ;;  %v683_v16 = vpop.f32.mrb[7].mxu1 }
 0x105   : > { %v795_v17 = vmax.f32 %v553_v7, 0.0  ;;  %v827_v18 = vmax.f32 %v681_v8, 0.0  ;;  %v556_v19 = vadd.f32 %v1314_v40, %v555_v15  ;;  %v684_v20 = vadd.f32 %v1314_v40, %v683_v16 }
 0x106   : > { %861 = vst [vmem:[%s1322_s14 + $0x30] sm:$0xff] %v797_v11  ;;  %893 = vst [vmem:[%s1322_s14 + $0x130] sm:$0xff] %v829_v12  ;;  %v798_v21 = vmax.f32 %v564_v13, 0.0  ;;  %v830_v22 = vmax.f32 %v692_v14, 0.0 }
 0x107   : > { %859 = vst [vmem:[%s1322_s14 + $0x20] sm:$0xff] %v795_v17  ;;  %891 = vst [vmem:[%s1322_s14 + $0x120] sm:$0xff] %v827_v18  ;;  %v796_v23 = vmax.f32 %v556_v19, 0.0  ;;  %v828_v24 = vmax.f32 %v684_v20, 0.0 }
 0x108   : > { %862 = vst [vmem:[%s1322_s14 + $0x38] sm:$0xff] %v798_v21  ;;  %894 = vst [vmem:[%s1322_s14 + $0x138] sm:$0xff] %v830_v22 }
 0x109   : > { %860 = vst [vmem:[%s1322_s14 + $0x28] sm:$0xff] %v796_v23  ;;  %892 = vst [vmem:[%s1322_s14 + $0x128] sm:$0xff] %v828_v24  ;;  %v1093_v25 = vpop.f32.mrb[8].mxu0  ;;  %v1125_v26 = vpop.f32.mrb[8].mxu1 }
 0x10a   : > { %v577_v27 = vadd.f32 %v1093_v25, %v1314_v40  ;;  %v705_v28 = vadd.f32 %v1125_v26, %v1314_v40  ;;  %v568_v29 = vpop.f32.mrb[9].mxu0  ;;  %v696_v30 = vpop.f32.mrb[9].mxu1 }
 0x10b   : > { %v569_v31 = vadd.f32 %v1314_v40, %v568_v29  ;;  %v697_v32 = vadd.f32 %v1314_v40, %v696_v30  ;;  %v1094_v33 = vpop.f32.mrb[10].mxu0  ;;  %v1126_v34 = vpop.f32.mrb[10].mxu1 }
 0x10c   : > { %v801_v35 = vmax.f32 %v577_v27, 0.0  ;;  %v833_v36 = vmax.f32 %v705_v28, 0.0  ;;  %v580_v37 = vadd.f32 %v1094_v33, %v1314_v40  ;;  %v708_v38 = vadd.f32 %v1126_v34, %v1314_v40  ;;  %v571_v39 = vpop.f32.mrb[11].mxu0  ;;  %v699_v41 = vpop.f32.mrb[11].mxu1 }
 0x10d   : > { %v799_v42 = vmax.f32 %v569_v31, 0.0  ;;  %v831_v43 = vmax.f32 %v697_v32, 0.0  ;;  %v572_v44 = vadd.f32 %v1314_v40, %v571_v39  ;;  %v700_v45 = vadd.f32 %v1314_v40, %v699_v41 }
 0x10e   : > { %865 = vst [vmem:[%s1322_s14 + $0x50] sm:$0xff] %v801_v35  ;;  %897 = vst [vmem:[%s1322_s14 + $0x150] sm:$0xff] %v833_v36  ;;  %v802_v46 = vmax.f32 %v580_v37, 0.0  ;;  %v834_v47 = vmax.f32 %v708_v38, 0.0 }
 0x10f   : > { %863 = vst [vmem:[%s1322_s14 + $0x40] sm:$0xff] %v799_v42  ;;  %895 = vst [vmem:[%s1322_s14 + $0x140] sm:$0xff] %v831_v43  ;;  %v800_v48 = vmax.f32 %v572_v44, 0.0  ;;  %v832_v49 = vmax.f32 %v700_v45, 0.0 }
 0x110   : > { %866 = vst [vmem:[%s1322_s14 + $0x58] sm:$0xff] %v802_v46  ;;  %898 = vst [vmem:[%s1322_s14 + $0x158] sm:$0xff] %v834_v47 }
 0x111   : > { %864 = vst [vmem:[%s1322_s14 + $0x48] sm:$0xff] %v800_v48  ;;  %896 = vst [vmem:[%s1322_s14 + $0x148] sm:$0xff] %v832_v49  ;;  %v1097_v50 = vpop.f32.mrb[12].mxu0  ;;  %v1129_v51 = vpop.f32.mrb[12].mxu1 }
 0x112   : > { %v593_v52 = vadd.f32 %v1097_v50, %v1314_v40  ;;  %v721_v53 = vadd.f32 %v1129_v51, %v1314_v40  ;;  %v584_v54 = vpop.f32.mrb[13].mxu0  ;;  %v712_v55 = vpop.f32.mrb[13].mxu1 }
 0x113   : > { %v585_v56 = vadd.f32 %v1314_v40, %v584_v54  ;;  %v713_v57 = vadd.f32 %v1314_v40, %v712_v55  ;;  %v1098_v58 = vpop.f32.mrb[14].mxu0  ;;  %v1130_v59 = vpop.f32.mrb[14].mxu1 }
 0x114   : > { %v805_v60 = vmax.f32 %v593_v52, 0.0  ;;  %v837_v61 = vmax.f32 %v721_v53, 0.0  ;;  %v596_v62 = vadd.f32 %v1098_v58, %v1314_v40  ;;  %v724_v63 = vadd.f32 %v1130_v59, %v1314_v40  ;;  %v587_v0 = vpop.f32.mrb[15].mxu0  ;;  %v715_v1 = vpop.f32.mrb[15].mxu1 }
 0x115   : > { %v803_v2 = vmax.f32 %v585_v56, 0.0  ;;  %v835_v3 = vmax.f32 %v713_v57, 0.0  ;;  %v588_v4 = vadd.f32 %v1314_v40, %v587_v0  ;;  %v716_v5 = vadd.f32 %v1314_v40, %v715_v1 }
 0x116   : > { %869 = vst [vmem:[%s1322_s14 + $0x70] sm:$0xff] %v805_v60  ;;  %901 = vst [vmem:[%s1322_s14 + $0x170] sm:$0xff] %v837_v61  ;;  %v806_v6 = vmax.f32 %v596_v62, 0.0  ;;  %v838_v7 = vmax.f32 %v724_v63, 0.0 }
 0x117   : > { %867 = vst [vmem:[%s1322_s14 + $0x60] sm:$0xff] %v803_v2  ;;  %899 = vst [vmem:[%s1322_s14 + $0x160] sm:$0xff] %v835_v3  ;;  %v804_v8 = vmax.f32 %v588_v4, 0.0  ;;  %v836_v9 = vmax.f32 %v716_v5, 0.0 }
 0x118   : > { %870 = vst [vmem:[%s1322_s14 + $0x78] sm:$0xff] %v806_v6  ;;  %902 = vst [vmem:[%s1322_s14 + $0x178] sm:$0xff] %v838_v7 }
 0x119   : > { %868 = vst [vmem:[%s1322_s14 + $0x68] sm:$0xff] %v804_v8  ;;  %900 = vst [vmem:[%s1322_s14 + $0x168] sm:$0xff] %v836_v9  ;;  %v1101_v10 = vpop.f32.mrb[16].mxu0  ;;  %v1133_v11 = vpop.f32.mrb[16].mxu1 }
 0x11a   : > { %v609_v12 = vadd.f32 %v1101_v10, %v1314_v40  ;;  %v737_v13 = vadd.f32 %v1133_v11, %v1314_v40  ;;  %v600_v14 = vpop.f32.mrb[17].mxu0  ;;  %v728_v15 = vpop.f32.mrb[17].mxu1 }
 0x11b   : > { %v601_v16 = vadd.f32 %v1314_v40, %v600_v14  ;;  %v729_v17 = vadd.f32 %v1314_v40, %v728_v15  ;;  %v1102_v18 = vpop.f32.mrb[18].mxu0  ;;  %v1134_v19 = vpop.f32.mrb[18].mxu1 }
 0x11c   : > { %v809_v20 = vmax.f32 %v609_v12, 0.0  ;;  %v841_v21 = vmax.f32 %v737_v13, 0.0  ;;  %v612_v22 = vadd.f32 %v1102_v18, %v1314_v40  ;;  %v740_v23 = vadd.f32 %v1134_v19, %v1314_v40  ;;  %v603_v24 = vpop.f32.mrb[19].mxu0  ;;  %v731_v25 = vpop.f32.mrb[19].mxu1 }
 0x11d   : > { %v807_v26 = vmax.f32 %v601_v16, 0.0  ;;  %v839_v27 = vmax.f32 %v729_v17, 0.0  ;;  %v604_v28 = vadd.f32 %v1314_v40, %v603_v24  ;;  %v732_v29 = vadd.f32 %v1314_v40, %v731_v25 }
 0x11e   : > { %873 = vst [vmem:[%s1322_s14 + $0x90] sm:$0xff] %v809_v20  ;;  %905 = vst [vmem:[%s1322_s14 + $0x190] sm:$0xff] %v841_v21  ;;  %v810_v30 = vmax.f32 %v612_v22, 0.0  ;;  %v842_v31 = vmax.f32 %v740_v23, 0.0 }
 0x11f   : > { %871 = vst [vmem:[%s1322_s14 + $0x80] sm:$0xff] %v807_v26  ;;  %903 = vst [vmem:[%s1322_s14 + $0x180] sm:$0xff] %v839_v27  ;;  %v808_v32 = vmax.f32 %v604_v28, 0.0  ;;  %v840_v33 = vmax.f32 %v732_v29, 0.0 }
 0x120   : > { %874 = vst [vmem:[%s1322_s14 + $0x98] sm:$0xff] %v810_v30  ;;  %906 = vst [vmem:[%s1322_s14 + $0x198] sm:$0xff] %v842_v31 }
 0x121   : > { %872 = vst [vmem:[%s1322_s14 + $0x88] sm:$0xff] %v808_v32  ;;  %904 = vst [vmem:[%s1322_s14 + $0x188] sm:$0xff] %v840_v33  ;;  %v1105_v34 = vpop.f32.mrb[20].mxu0  ;;  %v1137_v35 = vpop.f32.mrb[20].mxu1 }
 0x122   : > { %v625_v36 = vadd.f32 %v1105_v34, %v1314_v40  ;;  %v753_v37 = vadd.f32 %v1137_v35, %v1314_v40  ;;  %v616_v38 = vpop.f32.mrb[21].mxu0  ;;  %v744_v39 = vpop.f32.mrb[21].mxu1 }
 0x123   : > { %v617_v41 = vadd.f32 %v1314_v40, %v616_v38  ;;  %v745_v42 = vadd.f32 %v1314_v40, %v744_v39  ;;  %v1106_v43 = vpop.f32.mrb[22].mxu0  ;;  %v1138_v44 = vpop.f32.mrb[22].mxu1 }
 0x124   : > { %v813_v45 = vmax.f32 %v625_v36, 0.0  ;;  %v845_v46 = vmax.f32 %v753_v37, 0.0  ;;  %v628_v47 = vadd.f32 %v1106_v43, %v1314_v40  ;;  %v756_v48 = vadd.f32 %v1138_v44, %v1314_v40  ;;  %v619_v49 = vpop.f32.mrb[23].mxu0  ;;  %v747_v50 = vpop.f32.mrb[23].mxu1 }
 0x125   : > { %v811_v51 = vmax.f32 %v617_v41, 0.0  ;;  %v843_v52 = vmax.f32 %v745_v42, 0.0  ;;  %v620_v53 = vadd.f32 %v1314_v40, %v619_v49  ;;  %v748_v54 = vadd.f32 %v1314_v40, %v747_v50 }
 0x126   : > { %877 = vst [vmem:[%s1322_s14 + $0xb0] sm:$0xff] %v813_v45  ;;  %909 = vst [vmem:[%s1322_s14 + $0x1b0] sm:$0xff] %v845_v46  ;;  %v814_v55 = vmax.f32 %v628_v47, 0.0  ;;  %v846_v56 = vmax.f32 %v756_v48, 0.0 }
 0x127   : > { %875 = vst [vmem:[%s1322_s14 + $0xa0] sm:$0xff] %v811_v51  ;;  %907 = vst [vmem:[%s1322_s14 + $0x1a0] sm:$0xff] %v843_v52  ;;  %v812_v57 = vmax.f32 %v620_v53, 0.0  ;;  %v844_v58 = vmax.f32 %v748_v54, 0.0 }
 0x128   : > { %878 = vst [vmem:[%s1322_s14 + $0xb8] sm:$0xff] %v814_v55  ;;  %910 = vst [vmem:[%s1322_s14 + $0x1b8] sm:$0xff] %v846_v56 }
 0x129   : > { %876 = vst [vmem:[%s1322_s14 + $0xa8] sm:$0xff] %v812_v57  ;;  %908 = vst [vmem:[%s1322_s14 + $0x1a8] sm:$0xff] %v844_v58  ;;  %v1109_v59 = vpop.f32.mrb[24].mxu0  ;;  %v1141_v60 = vpop.f32.mrb[24].mxu1 }
 0x12a   : > { %v641_v61 = vadd.f32 %v1109_v59, %v1314_v40  ;;  %v769_v62 = vadd.f32 %v1141_v60, %v1314_v40  ;;  %v632_v63 = vpop.f32.mrb[25].mxu0  ;;  %v760_v0 = vpop.f32.mrb[25].mxu1 }
 0x12b   : > { %v633_v1 = vadd.f32 %v1314_v40, %v632_v63  ;;  %v761_v2 = vadd.f32 %v1314_v40, %v760_v0  ;;  %v1110_v3 = vpop.f32.mrb[26].mxu0  ;;  %v1142_v4 = vpop.f32.mrb[26].mxu1 }
 0x12c   : > { %v817_v5 = vmax.f32 %v641_v61, 0.0  ;;  %v849_v6 = vmax.f32 %v769_v62, 0.0  ;;  %v644_v7 = vadd.f32 %v1110_v3, %v1314_v40  ;;  %v772_v8 = vadd.f32 %v1142_v4, %v1314_v40  ;;  %v635_v9 = vpop.f32.mrb[27].mxu0  ;;  %v763_v10 = vpop.f32.mrb[27].mxu1 }
 0x12d   : > { %v815_v11 = vmax.f32 %v633_v1, 0.0  ;;  %v847_v12 = vmax.f32 %v761_v2, 0.0  ;;  %v636_v13 = vadd.f32 %v1314_v40, %v635_v9  ;;  %v764_v14 = vadd.f32 %v1314_v40, %v763_v10 }
 0x12e   : > { %881 = vst [vmem:[%s1322_s14 + $0xd0] sm:$0xff] %v817_v5  ;;  %913 = vst [vmem:[%s1322_s14 + $0x1d0] sm:$0xff] %v849_v6  ;;  %v818_v15 = vmax.f32 %v644_v7, 0.0  ;;  %v850_v16 = vmax.f32 %v772_v8, 0.0 }
 0x12f   : > { %879 = vst [vmem:[%s1322_s14 + $0xc0] sm:$0xff] %v815_v11  ;;  %911 = vst [vmem:[%s1322_s14 + $0x1c0] sm:$0xff] %v847_v12  ;;  %v816_v17 = vmax.f32 %v636_v13, 0.0  ;;  %v848_v18 = vmax.f32 %v764_v14, 0.0 }
 0x130   : > { %882 = vst [vmem:[%s1322_s14 + $0xd8] sm:$0xff] %v818_v15  ;;  %914 = vst [vmem:[%s1322_s14 + $0x1d8] sm:$0xff] %v850_v16 }
 0x131   : > { %880 = vst [vmem:[%s1322_s14 + $0xc8] sm:$0xff] %v816_v17  ;;  %912 = vst [vmem:[%s1322_s14 + $0x1c8] sm:$0xff] %v848_v18  ;;  %v1113_v19 = vpop.f32.mrb[28].mxu0  ;;  %v1145_v20 = vpop.f32.mrb[28].mxu1 }
 0x132   : > { %v657_v21 = vadd.f32 %v1113_v19, %v1314_v40  ;;  %v785_v22 = vadd.f32 %v1145_v20, %v1314_v40  ;;  %v648_v23 = vpop.f32.mrb[29].mxu0  ;;  %v776_v24 = vpop.f32.mrb[29].mxu1 }
 0x133   : > { %v649_v25 = vadd.f32 %v1314_v40, %v648_v23  ;;  %v777_v26 = vadd.f32 %v1314_v40, %v776_v24  ;;  %v1114_v27 = vpop.f32.mrb[30].mxu0  ;;  %v1146_v28 = vpop.f32.mrb[30].mxu1 }
 0x134   : > { %v821_v29 = vmax.f32 %v657_v21, 0.0  ;;  %v853_v30 = vmax.f32 %v785_v22, 0.0  ;;  %v660_v31 = vadd.f32 %v1114_v27, %v1314_v40  ;;  %v788_v32 = vadd.f32 %v1146_v28, %v1314_v40  ;;  %v651_v33 = vpop.f32.mrb[31].mxu0  ;;  %v779_v34 = vpop.f32.mrb[31].mxu1 }
 0x135   : > { %v819_v35 = vmax.f32 %v649_v25, 0.0  ;;  %v851_v36 = vmax.f32 %v777_v26, 0.0  ;;  %v652_v37 = vadd.f32 %v1314_v40, %v651_v33  ;;  %v780_v38 = vadd.f32 %v1314_v40, %v779_v34 }
 0x136   : > { %885 = vst [vmem:[%s1322_s14 + $0xf0] sm:$0xff] %v821_v29  ;;  %917 = vst [vmem:[%s1322_s14 + $0x1f0] sm:$0xff] %v853_v30  ;;  %v822_v39 = vmax.f32 %v660_v31, 0.0  ;;  %v854_v41 = vmax.f32 %v788_v32, 0.0 }
 0x137   : > { %883 = vst [vmem:[%s1322_s14 + $0xe0] sm:$0xff] %v819_v35  ;;  %915 = vst [vmem:[%s1322_s14 + $0x1e0] sm:$0xff] %v851_v36  ;;  %v820_v42 = vmax.f32 %v652_v37, 0.0  ;;  %v852_v43 = vmax.f32 %v780_v38, 0.0 }
 0x138   : > { %886 = vst [vmem:[%s1322_s14 + $0xf8] sm:$0xff] %v822_v39  ;;  %918 = vst [vmem:[%s1322_s14 + $0x1f8] sm:$0xff] %v854_v41 }
 0x139   : > { %884 = vst [vmem:[%s1322_s14 + $0xe8] sm:$0xff] %v820_v42  ;;  %916 = vst [vmem:[%s1322_s14 + $0x1e8] sm:$0xff] %v852_v43 }
 0x13a PF: > { %s13_s12 = sadd.s32 1, %s1217_s12  }
 0x13b   : > { %p10_p4 = scmp.ge.s32.totalorder %s13_s12, 9  }
 0x13d   :  { %12 = sbr.rel (!%p10_p4) target bundleno = 1 (0x1), region = 62 }

// kernel: net_forward.4
= control target key start
LH: loop header
LB: loop body
LE: loop exit
PB: predicated region body
PF: predicated region fallthrough
CT: control target
= control target key end

     0   :  { %v978_v0 = vmov 0   ;;  %s1434_s1 = inlined_call_operand.vmem [shape: bf16[256,128], index: 1, kind: input, shape index: {}]   ;;  %s1435_s0 = inlined_call_operand.vmem [shape: bf16[400,256], index: 0, kind: input, shape index: {}]   ;;  %s1436_s2 = inlined_call_operand.vmem [shape: f32[1,128], index: 2, kind: input, shape index: {}]   ;;  %s1437_s3 = inlined_call_operand.vmem [shape: f32[400,128], index: 3, kind: output, shape index: {}]  }
   0x1   :  { %450 = vmatprep.subr.bf16.mxu0 %v978_v0  ;;  %v887_v1 = vld [vmem:[%s1434_s1] sm:$0xff]   ;;  %854 = vmatprep.subr.bf16.mxu1 %v978_v0  ;;  %v888_v2 = vld [vmem:[%s1434_s1 + $0x8] sm:$0xff]   ;;  %v889_v3 = vld [vmem:[%s1434_s1 + $0x10] sm:$0xff]  }
   0x2   :  { %451 = vmatpush1.bf16.msra.mxu0 %v887_v1  ;;  %870 = vmatpush1.bf16.msra.mxu1 %v887_v1  ;;  %v890_v4 = vld [vmem:[%s1434_s1 + $0x18] sm:$0xff]   ;;  %v891_v5 = vld [vmem:[%s1434_s1 + $0x20] sm:$0xff]   ;;  %v892_v7 = vld [vmem:[%s1434_s1 + $0x28] sm:$0xff]  }
   0x3   :  { %452 = vmatprep.subr.bf16.mxu0 %v978_v0  ;;  %855 = vmatprep.subr.bf16.mxu1 %v978_v0  ;;  %v905_v6 = vld [vmem:[%s1435_s0 + $0x4] ss:$8 sps:$4 sm:$0xff]   ;;  %v908_v8 = vld [vmem:[%s1435_s0 + $0xd4] ss:$8 sps:$4 sm:$0xff]   ;;  %v903_v19 = vld [vmem:[%s1435_s0] ss:$8 sps:$4 sm:$0xff]  }
   0x4   :  { %482 = vmatprep.mubr.bf16.mxu0 %v905_v6  ;;  %586 = vmatprep.mubr.bf16.mxu1 %v908_v8  ;;  %v893_v9 = vld [vmem:[%s1434_s1 + $0x30] sm:$0xff]   ;;  %v894_v10 = vld [vmem:[%s1434_s1 + $0x38] sm:$0xff]   ;;  %v895_v11 = vld [vmem:[%s1434_s1 + $0x40] sm:$0xff]  }
   0x5   :  { %v896_v12 = vld [vmem:[%s1434_s1 + $0x48] sm:$0xff]   ;;  %v897_v13 = vld [vmem:[%s1434_s1 + $0x50] sm:$0xff]   ;;  %v898_v14 = vld [vmem:[%s1434_s1 + $0x58] sm:$0xff]  }
   0x6   :  { %453 = vmatpush1.bf16.msra.mxu0 %v888_v2  ;;  %871 = vmatpush1.bf16.msra.mxu1 %v888_v2  ;;  %v899_v15 = vld [vmem:[%s1434_s1 + $0x60] sm:$0xff]   ;;  %v900_v16 = vld [vmem:[%s1434_s1 + $0x68] sm:$0xff]   ;;  %v901_v17 = vld [vmem:[%s1434_s1 + $0x70] sm:$0xff]  }
   0x7   :  { %454 = vmatprep.subr.bf16.mxu0 %v978_v0  ;;  %856 = vmatprep.subr.bf16.mxu1 %v978_v0  ;;  %v902_v18 = vld [vmem:[%s1434_s1 + $0x78] sm:$0xff]   ;;  %v912_v22 = vld [vmem:[%s1435_s0 + $0xe4] ss:$8 sps:$4 sm:$0xff]   ;;  %v914_v24 = vld [vmem:[%s1435_s0 + $0xe0] ss:$8 sps:$4 sm:$0xff]  }
   0x8   :  { %v906_v20 = vld [vmem:[%s1435_s0 + $0xd0] ss:$8 sps:$4 sm:$0xff]   ;;  %v909_v21 = vld [vmem:[%s1435_s0 + $0x14] ss:$8 sps:$4 sm:$0xff]   ;;  %v915_v25 = vld [vmem:[%s1435_s0 + $0x24] ss:$8 sps:$4 sm:$0xff]  }
   0x9   :  { %v911_v23 = vld [vmem:[%s1435_s0 + $0x10] ss:$8 sps:$4 sm:$0xff]   ;;  %v918_v26 = vld [vmem:[%s1435_s0 + $0xf4] ss:$8 sps:$4 sm:$0xff]   ;;  %v917_v27 = vld [vmem:[%s1435_s0 + $0x20] ss:$8 sps:$4 sm:$0xff]  }
   0xa   :  { %455 = vmatpush1.bf16.msra.mxu0 %v889_v3  ;;  %872 = vmatpush1.bf16.msra.mxu1 %v889_v3  ;;  %v920_v28 = vld [vmem:[%s1435_s0 + $0xf0] ss:$8 sps:$4 sm:$0xff]   ;;  %v921_v29 = vld [vmem:[%s1435_s0 + $0x34] ss:$8 sps:$4 sm:$0xff]   ;;  %v924_v30 = vld [vmem:[%s1435_s0 + $0x104] ss:$8 sps:$4 sm:$0xff]  }
   0xb   :  { %456 = vmatprep.subr.bf16.mxu0 %v978_v0  ;;  %857 = vmatprep.subr.bf16.mxu1 %v978_v0  ;;  %v923_v31 = vld [vmem:[%s1435_s0 + $0x30] ss:$8 sps:$4 sm:$0xff]   ;;  %v926_v32 = vld [vmem:[%s1435_s0 + $0x100] ss:$8 sps:$4 sm:$0xff]   ;;  %v927_v33 = vld [vmem:[%s1435_s0 + $0x44] ss:$8 sps:$4 sm:$0xff]  }
   0xc   :  { %v930_v34 = vld [vmem:[%s1435_s0 + $0x114] ss:$8 sps:$4 sm:$0xff]   ;;  %v929_v35 = vld [vmem:[%s1435_s0 + $0x40] ss:$8 sps:$4 sm:$0xff]   ;;  %v932_v36 = vld [vmem:[%s1435_s0 + $0x110] ss:$8 sps:$4 sm:$0xff]  }
   0xd   :  { %v933_v37 = vld [vmem:[%s1435_s0 + $0x54] ss:$8 sps:$4 sm:$0xff]   ;;  %v936_v38 = vld [vmem:[%s1435_s0 + $0x124] ss:$8 sps:$4 sm:$0xff]   ;;  %v935_v39 = vld [vmem:[%s1435_s0 + $0x50] ss:$8 sps:$4 sm:$0xff]  }
   0xe   :  { %457 = vmatpush1.bf16.msra.mxu0 %v890_v4  ;;  %873 = vmatpush1.bf16.msra.mxu1 %v890_v4  ;;  %v938_v40 = vld [vmem:[%s1435_s0 + $0x120] ss:$8 sps:$4 sm:$0xff]   ;;  %v939_v41 = vld [vmem:[%s1435_s0 + $0x64] ss:$8 sps:$4 sm:$0xff]   ;;  %v942_v42 = vld [vmem:[%s1435_s0 + $0x134] ss:$8 sps:$4 sm:$0xff]  }
   0xf   :  { %458 = vmatprep.subr.bf16.mxu0 %v978_v0  ;;  %858 = vmatprep.subr.bf16.mxu1 %v978_v0  ;;  %v941_v43 = vld [vmem:[%s1435_s0 + $0x60] ss:$8 sps:$4 sm:$0xff]   ;;  %v944_v44 = vld [vmem:[%s1435_s0 + $0x130] ss:$8 sps:$4 sm:$0xff]   ;;  %v945_v45 = vld [vmem:[%s1435_s0 + $0x74] ss:$8 sps:$4 sm:$0xff]  }
  0x10   :  { %v948_v46 = vld [vmem:[%s1435_s0 + $0x144] ss:$8 sps:$4 sm:$0xff]   ;;  %v947_v47 = vld [vmem:[%s1435_s0 + $0x70] ss:$8 sps:$4 sm:$0xff]   ;;  %v950_v48 = vld [vmem:[%s1435_s0 + $0x140] ss:$8 sps:$4 sm:$0xff]  }
  0x11   :  { %v951_v49 = vld [vmem:[%s1435_s0 + $0x84] ss:$8 sps:$4 sm:$0xff]   ;;  %v954_v50 = vld [vmem:[%s1435_s0 + $0x154] ss:$8 sps:$4 sm:$0xff]   ;;  %v953_v51 = vld [vmem:[%s1435_s0 + $0x80] ss:$8 sps:$4 sm:$0xff]  }
  0x12   :  { %459 = vmatpush1.bf16.msra.mxu0 %v891_v5  ;;  %874 = vmatpush1.bf16.msra.mxu1 %v891_v5  ;;  %v956_v52 = vld [vmem:[%s1435_s0 + $0x150] ss:$8 sps:$4 sm:$0xff]   ;;  %v957_v53 = vld [vmem:[%s1435_s0 + $0x94] ss:$8 sps:$4 sm:$0xff]   ;;  %v960_v54 = vld [vmem:[%s1435_s0 + $0x164] ss:$8 sps:$4 sm:$0xff]  }
  0x13   :  { %460 = vmatprep.subr.bf16.mxu0 %v978_v0  ;;  %859 = vmatprep.subr.bf16.mxu1 %v978_v0  ;;  %v959_v55 = vld [vmem:[%s1435_s0 + $0x90] ss:$8 sps:$4 sm:$0xff]   ;;  %v962_v56 = vld [vmem:[%s1435_s0 + $0x160] ss:$8 sps:$4 sm:$0xff]   ;;  %v963_v57 = vld [vmem:[%s1435_s0 + $0xa4] ss:$8 sps:$4 sm:$0xff]  }
  0x14   :  { %v966_v58 = vld [vmem:[%s1435_s0 + $0x174] ss:$8 sps:$4 sm:$0xff]   ;;  %v965_v59 = vld [vmem:[%s1435_s0 + $0xa0] ss:$8 sps:$4 sm:$0xff]   ;;  %v968_v60 = vld [vmem:[%s1435_s0 + $0x170] ss:$8 sps:$4 sm:$0xff]  }
  0x15   :  { %v969_v61 = vld [vmem:[%s1435_s0 + $0xb4] ss:$8 sps:$4 sm:$0xff]   ;;  %v972_v62 = vld [vmem:[%s1435_s0 + $0x184] ss:$8 sps:$4 sm:$0xff]   ;;  %v971_v63 = vld [vmem:[%s1435_s0 + $0xb0] ss:$8 sps:$4 sm:$0xff]  }
  0x16   :  { %461 = vmatpush1.bf16.msra.mxu0 %v892_v7  ;;  %875 = vmatpush1.bf16.msra.mxu1 %v892_v7  ;;  %v975_v1 = vld [vmem:[%s1435_s0 + $0xc4] ss:$8 sps:$4 sm:$0xff]   ;;  %v977_v2 = vld [vmem:[%s1435_s0 + $0xc0] ss:$8 sps:$4 sm:$0xff]  }
  0x17   :  { %462 = vmatprep.subr.bf16.mxu0 %v978_v0  ;;  %860 = vmatprep.subr.bf16.mxu1 %v978_v0  ;;  %v1232_v3 = vld [vmem:[%s1436_s2] ss:$0 sm:$0xff] }
  0x1a   :  { %463 = vmatpush1.bf16.msra.mxu0 %v893_v9  ;;  %876 = vmatpush1.bf16.msra.mxu1 %v893_v9 }
  0x1b   :  { %464 = vmatprep.subr.bf16.mxu0 %v978_v0  ;;  %861 = vmatprep.subr.bf16.mxu1 %v978_v0 }
  0x1e   :  { %465 = vmatpush1.bf16.msra.mxu0 %v894_v10  ;;  %877 = vmatpush1.bf16.msra.mxu1 %v894_v10 }
  0x1f   :  { %466 = vmatprep.subr.bf16.mxu0 %v978_v0  ;;  %862 = vmatprep.subr.bf16.mxu1 %v978_v0 }
  0x22   :  { %467 = vmatpush1.bf16.msra.mxu0 %v895_v11  ;;  %878 = vmatpush1.bf16.msra.mxu1 %v895_v11 }
  0x23   :  { %468 = vmatprep.subr.bf16.mxu0 %v978_v0  ;;  %863 = vmatprep.subr.bf16.mxu1 %v978_v0 }
  0x26   :  { %469 = vmatpush1.bf16.msra.mxu0 %v896_v12  ;;  %879 = vmatpush1.bf16.msra.mxu1 %v896_v12 }
  0x27   :  { %470 = vmatprep.subr.bf16.mxu0 %v978_v0  ;;  %864 = vmatprep.subr.bf16.mxu1 %v978_v0 }
  0x2a   :  { %471 = vmatpush1.bf16.msra.mxu0 %v897_v13  ;;  %880 = vmatpush1.bf16.msra.mxu1 %v897_v13 }
  0x2b   :  { %472 = vmatprep.subr.bf16.mxu0 %v978_v0  ;;  %865 = vmatprep.subr.bf16.mxu1 %v978_v0 }
  0x2e   :  { %473 = vmatpush1.bf16.msra.mxu0 %v898_v14  ;;  %881 = vmatpush1.bf16.msra.mxu1 %v898_v14 }
  0x2f   :  { %474 = vmatprep.subr.bf16.mxu0 %v978_v0  ;;  %866 = vmatprep.subr.bf16.mxu1 %v978_v0 }
  0x32   :  { %475 = vmatpush1.bf16.msra.mxu0 %v899_v15  ;;  %882 = vmatpush1.bf16.msra.mxu1 %v899_v15 }
  0x33   :  { %476 = vmatprep.subr.bf16.mxu0 %v978_v0  ;;  %867 = vmatprep.subr.bf16.mxu1 %v978_v0 }
  0x36   :  { %477 = vmatpush1.bf16.msra.mxu0 %v900_v16  ;;  %883 = vmatpush1.bf16.msra.mxu1 %v900_v16 }
  0x37   :  { %478 = vmatprep.subr.bf16.mxu0 %v978_v0  ;;  %868 = vmatprep.subr.bf16.mxu1 %v978_v0 }
  0x3a   :  { %479 = vmatpush1.bf16.msra.mxu0 %v901_v17  ;;  %884 = vmatpush1.bf16.msra.mxu1 %v901_v17 }
  0x3b   :  { %480 = vmatprep.subr.bf16.mxu0 %v978_v0  ;;  %869 = vmatprep.subr.bf16.mxu1 %v978_v0  ;;  %v974_v0 = vld [vmem:[%s1435_s0 + $0x180] ss:$8 sps:$4 sm:$0xff]  }
  0x3e   :  { %481 = vmatpush1.bf16.msra.mxu0 %v902_v18  ;;  %885 = vmatpush1.bf16.msra.mxu1 %v902_v18 }
  0x41   :  { %483 = vmatmul.mubr.bf16.vlgmr.msra.gmra.mrb[0].mxu0 %v903_v19  ;;  %587 = vmatmul.mubr.bf16.vlgmr.msra.gmra.mrb[0].mxu1 %v906_v20 }
  0x42   :  { %490 = vmatprep.mubr.bf16.mxu0 %v909_v21  ;;  %594 = vmatprep.mubr.bf16.mxu1 %v912_v22 }
  0x49   :  { %491 = vmatmul.mubr.bf16.gmra.mrb[4].mxu0 %v911_v23  ;;  %595 = vmatmul.mubr.bf16.gmra.mrb[4].mxu1 %v914_v24 }
  0x4a   :  { %498 = vmatprep.mubr.bf16.mxu0 %v915_v25  ;;  %602 = vmatprep.mubr.bf16.mxu1 %v918_v26 }
  0x51   :  { %499 = vmatmul.mubr.bf16.gmra.mrb[8].mxu0 %v917_v27  ;;  %603 = vmatmul.mubr.bf16.gmra.mrb[8].mxu1 %v920_v28 }
  0x52   :  { %506 = vmatprep.mubr.bf16.mxu0 %v921_v29  ;;  %610 = vmatprep.mubr.bf16.mxu1 %v924_v30 }
  0x59   :  { %507 = vmatmul.mubr.bf16.gmra.mrb[12].mxu0 %v923_v31  ;;  %611 = vmatmul.mubr.bf16.gmra.mrb[12].mxu1 %v926_v32 }
  0x5a   :  { %514 = vmatprep.mubr.bf16.mxu0 %v927_v33  ;;  %618 = vmatprep.mubr.bf16.mxu1 %v930_v34 }
  0x61   :  { %515 = vmatmul.mubr.bf16.gmra.mrb[16].mxu0 %v929_v35  ;;  %619 = vmatmul.mubr.bf16.gmra.mrb[16].mxu1 %v932_v36 }
  0x62   :  { %522 = vmatprep.mubr.bf16.mxu0 %v933_v37  ;;  %626 = vmatprep.mubr.bf16.mxu1 %v936_v38 }
  0x69   :  { %523 = vmatmul.mubr.bf16.gmra.mrb[20].mxu0 %v935_v39  ;;  %627 = vmatmul.mubr.bf16.gmra.mrb[20].mxu1 %v938_v40 }
  0x6a   :  { %530 = vmatprep.mubr.bf16.mxu0 %v939_v41  ;;  %634 = vmatprep.mubr.bf16.mxu1 %v942_v42 }
  0x71   :  { %531 = vmatmul.mubr.bf16.gmra.mrb[24].mxu0 %v941_v43  ;;  %635 = vmatmul.mubr.bf16.gmra.mrb[24].mxu1 %v944_v44 }
  0x72   :  { %538 = vmatprep.mubr.bf16.mxu0 %v945_v45  ;;  %642 = vmatprep.mubr.bf16.mxu1 %v948_v46 }
  0x79   :  { %539 = vmatmul.mubr.bf16.gmra.mrb[28].mxu0 %v947_v47  ;;  %643 = vmatmul.mubr.bf16.gmra.mrb[28].mxu1 %v950_v48 }
  0x7a   :  { %546 = vmatprep.mubr.bf16.mxu0 %v951_v49  ;;  %650 = vmatprep.mubr.bf16.mxu1 %v954_v50 }
  0x81   :  { %547 = vmatmul.mubr.bf16.gmra.mrb[32].mxu0 %v953_v51  ;;  %651 = vmatmul.mubr.bf16.gmra.mrb[32].mxu1 %v956_v52 }
  0x82   :  { %554 = vmatprep.mubr.bf16.mxu0 %v957_v53  ;;  %658 = vmatprep.mubr.bf16.mxu1 %v960_v54 }
  0x89   :  { %555 = vmatmul.mubr.bf16.gmra.mrb[36].mxu0 %v959_v55  ;;  %659 = vmatmul.mubr.bf16.gmra.mrb[36].mxu1 %v962_v56 }
  0x8a   :  { %562 = vmatprep.mubr.bf16.mxu0 %v963_v57  ;;  %666 = vmatprep.mubr.bf16.mxu1 %v966_v58 }
  0x91   :  { %563 = vmatmul.mubr.bf16.gmra.mrb[40].mxu0 %v965_v59  ;;  %667 = vmatmul.mubr.bf16.gmra.mrb[40].mxu1 %v968_v60 }
  0x92   :  { %570 = vmatprep.mubr.bf16.mxu0 %v969_v61  ;;  %674 = vmatprep.mubr.bf16.mxu1 %v972_v62 }
  0x99   :  { %571 = vmatmul.mubr.bf16.gmra.mrb[44].mxu0 %v971_v63  ;;  %675 = vmatmul.mubr.bf16.gmra.mrb[44].mxu1 %v974_v0 }
  0x9a   :  { %578 = vmatprep.mubr.bf16.mxu0 %v975_v1 }
  0xa1   :  { %579 = vmatmul.mubr.bf16.gmra.mrb[48].mxu0 %v977_v2 }
 0x114   :  { %v484_v4 = vpop.f32.mrb[0].mxu0  ;;  %v588_v5 = vpop.f32.mrb[0].mxu1 }
 0x115   :  { %v485_v6 = vadd.f32 %v1232_v3, %v484_v4  ;;  %v486_v7 = vpop.f32.mrb[1].mxu0  ;;  %v589_v8 = vadd.f32 %v1232_v3, %v588_v5  ;;  %v590_v9 = vpop.f32.mrb[1].mxu1 }
 0x116   :  { %v487_v10 = vpop.f32.mrb[2].mxu0  ;;  %v591_v11 = vpop.f32.mrb[2].mxu1 }
 0x117   :  { %v683_v12 = vmax.f32 %v485_v6, 0.0  ;;  %v488_v13 = vadd.f32 %v1232_v3, %v487_v10  ;;  %v489_v14 = vpop.f32.mrb[3].mxu0  ;;  %v709_v15 = vmax.f32 %v589_v8, 0.0  ;;  %v592_v16 = vadd.f32 %v1232_v3, %v591_v11  ;;  %v593_v17 = vpop.f32.mrb[3].mxu1 }
 0x119   :  { %733 = vst [vmem:[%s1437_s3] sm:$0xff] %v683_v12  ;;  %v684_v18 = vmax.f32 %v488_v13, 0.0  ;;  %759 = vst [vmem:[%s1437_s3 + $0xd0] sm:$0xff] %v709_v15  ;;  %v710_v19 = vmax.f32 %v592_v16, 0.0 }
 0x11b   :  { %734 = vst [vmem:[%s1437_s3 + $0x8] sm:$0xff] %v684_v18  ;;  %760 = vst [vmem:[%s1437_s3 + $0xd8] sm:$0xff] %v710_v19 }
 0x11c   :  { %v492_v20 = vpop.f32.mrb[4].mxu0  ;;  %v596_v21 = vpop.f32.mrb[4].mxu1 }
 0x11d   :  { %v493_v22 = vadd.f32 %v1232_v3, %v492_v20  ;;  %v494_v23 = vpop.f32.mrb[5].mxu0  ;;  %v597_v24 = vadd.f32 %v1232_v3, %v596_v21  ;;  %v598_v25 = vpop.f32.mrb[5].mxu1 }
 0x11e   :  { %v495_v26 = vpop.f32.mrb[6].mxu0  ;;  %v599_v27 = vpop.f32.mrb[6].mxu1 }
 0x11f   :  { %v685_v28 = vmax.f32 %v493_v22, 0.0  ;;  %v496_v29 = vadd.f32 %v1232_v3, %v495_v26  ;;  %v497_v30 = vpop.f32.mrb[7].mxu0  ;;  %v711_v31 = vmax.f32 %v597_v24, 0.0  ;;  %v600_v32 = vadd.f32 %v1232_v3, %v599_v27  ;;  %v601_v33 = vpop.f32.mrb[7].mxu1 }
 0x121   :  { %735 = vst [vmem:[%s1437_s3 + $0x10] sm:$0xff] %v685_v28  ;;  %v686_v34 = vmax.f32 %v496_v29, 0.0  ;;  %761 = vst [vmem:[%s1437_s3 + $0xe0] sm:$0xff] %v711_v31  ;;  %v712_v35 = vmax.f32 %v600_v32, 0.0 }
 0x123   :  { %736 = vst [vmem:[%s1437_s3 + $0x18] sm:$0xff] %v686_v34  ;;  %762 = vst [vmem:[%s1437_s3 + $0xe8] sm:$0xff] %v712_v35 }
 0x124   :  { %v500_v36 = vpop.f32.mrb[8].mxu0  ;;  %v604_v37 = vpop.f32.mrb[8].mxu1 }
 0x125   :  { %v501_v38 = vadd.f32 %v1232_v3, %v500_v36  ;;  %v502_v39 = vpop.f32.mrb[9].mxu0  ;;  %v605_v40 = vadd.f32 %v1232_v3, %v604_v37  ;;  %v606_v41 = vpop.f32.mrb[9].mxu1 }
 0x126   :  { %v503_v42 = vpop.f32.mrb[10].mxu0  ;;  %v607_v43 = vpop.f32.mrb[10].mxu1 }
 0x127   :  { %v687_v44 = vmax.f32 %v501_v38, 0.0  ;;  %v504_v45 = vadd.f32 %v1232_v3, %v503_v42  ;;  %v505_v46 = vpop.f32.mrb[11].mxu0  ;;  %v713_v47 = vmax.f32 %v605_v40, 0.0  ;;  %v608_v48 = vadd.f32 %v1232_v3, %v607_v43  ;;  %v609_v49 = vpop.f32.mrb[11].mxu1 }
 0x129   :  { %737 = vst [vmem:[%s1437_s3 + $0x20] sm:$0xff] %v687_v44  ;;  %v688_v50 = vmax.f32 %v504_v45, 0.0  ;;  %763 = vst [vmem:[%s1437_s3 + $0xf0] sm:$0xff] %v713_v47  ;;  %v714_v51 = vmax.f32 %v608_v48, 0.0 }
 0x12b   :  { %738 = vst [vmem:[%s1437_s3 + $0x28] sm:$0xff] %v688_v50  ;;  %764 = vst [vmem:[%s1437_s3 + $0xf8] sm:$0xff] %v714_v51 }
 0x12c   :  { %v508_v52 = vpop.f32.mrb[12].mxu0  ;;  %v612_v53 = vpop.f32.mrb[12].mxu1 }
 0x12d   :  { %v509_v54 = vadd.f32 %v1232_v3, %v508_v52  ;;  %v510_v55 = vpop.f32.mrb[13].mxu0  ;;  %v613_v56 = vadd.f32 %v1232_v3, %v612_v53  ;;  %v614_v57 = vpop.f32.mrb[13].mxu1 }
 0x12e   :  { %v511_v58 = vpop.f32.mrb[14].mxu0  ;;  %v615_v59 = vpop.f32.mrb[14].mxu1 }
 0x12f   :  { %v689_v60 = vmax.f32 %v509_v54, 0.0  ;;  %v512_v61 = vadd.f32 %v1232_v3, %v511_v58  ;;  %v513_v62 = vpop.f32.mrb[15].mxu0  ;;  %v715_v63 = vmax.f32 %v613_v56, 0.0  ;;  %v616_v0 = vadd.f32 %v1232_v3, %v615_v59  ;;  %v617_v1 = vpop.f32.mrb[15].mxu1 }
 0x131   :  { %739 = vst [vmem:[%s1437_s3 + $0x30] sm:$0xff] %v689_v60  ;;  %v690_v2 = vmax.f32 %v512_v61, 0.0  ;;  %765 = vst [vmem:[%s1437_s3 + $0x100] sm:$0xff] %v715_v63  ;;  %v716_v4 = vmax.f32 %v616_v0, 0.0 }
 0x133   :  { %740 = vst [vmem:[%s1437_s3 + $0x38] sm:$0xff] %v690_v2  ;;  %766 = vst [vmem:[%s1437_s3 + $0x108] sm:$0xff] %v716_v4 }
 0x134   :  { %v516_v5 = vpop.f32.mrb[16].mxu0  ;;  %v620_v6 = vpop.f32.mrb[16].mxu1 }
 0x135   :  { %v517_v7 = vadd.f32 %v1232_v3, %v516_v5  ;;  %v518_v8 = vpop.f32.mrb[17].mxu0  ;;  %v621_v9 = vadd.f32 %v1232_v3, %v620_v6  ;;  %v622_v10 = vpop.f32.mrb[17].mxu1 }
 0x136   :  { %v519_v11 = vpop.f32.mrb[18].mxu0  ;;  %v623_v12 = vpop.f32.mrb[18].mxu1 }
 0x137   :  { %v691_v13 = vmax.f32 %v517_v7, 0.0  ;;  %v520_v14 = vadd.f32 %v1232_v3, %v519_v11  ;;  %v521_v15 = vpop.f32.mrb[19].mxu0  ;;  %v717_v16 = vmax.f32 %v621_v9, 0.0  ;;  %v624_v17 = vadd.f32 %v1232_v3, %v623_v12  ;;  %v625_v18 = vpop.f32.mrb[19].mxu1 }
 0x139   :  { %741 = vst [vmem:[%s1437_s3 + $0x40] sm:$0xff] %v691_v13  ;;  %v692_v19 = vmax.f32 %v520_v14, 0.0  ;;  %767 = vst [vmem:[%s1437_s3 + $0x110] sm:$0xff] %v717_v16  ;;  %v718_v20 = vmax.f32 %v624_v17, 0.0 }
 0x13b   :  { %742 = vst [vmem:[%s1437_s3 + $0x48] sm:$0xff] %v692_v19  ;;  %768 = vst [vmem:[%s1437_s3 + $0x118] sm:$0xff] %v718_v20 }
 0x13c   :  { %v524_v21 = vpop.f32.mrb[20].mxu0  ;;  %v628_v22 = vpop.f32.mrb[20].mxu1 }
 0x13d   :  { %v525_v23 = vadd.f32 %v1232_v3, %v524_v21  ;;  %v526_v24 = vpop.f32.mrb[21].mxu0  ;;  %v629_v25 = vadd.f32 %v1232_v3, %v628_v22  ;;  %v630_v26 = vpop.f32.mrb[21].mxu1 }
 0x13e   :  { %v527_v27 = vpop.f32.mrb[22].mxu0  ;;  %v631_v28 = vpop.f32.mrb[22].mxu1 }
 0x13f   :  { %v693_v29 = vmax.f32 %v525_v23, 0.0  ;;  %v528_v30 = vadd.f32 %v1232_v3, %v527_v27  ;;  %v529_v31 = vpop.f32.mrb[23].mxu0  ;;  %v719_v32 = vmax.f32 %v629_v25, 0.0  ;;  %v632_v33 = vadd.f32 %v1232_v3, %v631_v28  ;;  %v633_v34 = vpop.f32.mrb[23].mxu1 }
 0x141   :  { %743 = vst [vmem:[%s1437_s3 + $0x50] sm:$0xff] %v693_v29  ;;  %v694_v35 = vmax.f32 %v528_v30, 0.0  ;;  %769 = vst [vmem:[%s1437_s3 + $0x120] sm:$0xff] %v719_v32  ;;  %v720_v36 = vmax.f32 %v632_v33, 0.0 }
 0x143   :  { %744 = vst [vmem:[%s1437_s3 + $0x58] sm:$0xff] %v694_v35  ;;  %770 = vst [vmem:[%s1437_s3 + $0x128] sm:$0xff] %v720_v36 }
 0x144   :  { %v532_v37 = vpop.f32.mrb[24].mxu0  ;;  %v636_v38 = vpop.f32.mrb[24].mxu1 }
 0x145   :  { %v533_v39 = vadd.f32 %v1232_v3, %v532_v37  ;;  %v534_v40 = vpop.f32.mrb[25].mxu0  ;;  %v637_v41 = vadd.f32 %v1232_v3, %v636_v38  ;;  %v638_v42 = vpop.f32.mrb[25].mxu1 }
 0x146   :  { %v535_v43 = vpop.f32.mrb[26].mxu0  ;;  %v639_v44 = vpop.f32.mrb[26].mxu1 }
 0x147   :  { %v695_v45 = vmax.f32 %v533_v39, 0.0  ;;  %v536_v46 = vadd.f32 %v1232_v3, %v535_v43  ;;  %v537_v47 = vpop.f32.mrb[27].mxu0  ;;  %v721_v48 = vmax.f32 %v637_v41, 0.0  ;;  %v640_v49 = vadd.f32 %v1232_v3, %v639_v44  ;;  %v641_v50 = vpop.f32.mrb[27].mxu1 }
 0x149   :  { %745 = vst [vmem:[%s1437_s3 + $0x60] sm:$0xff] %v695_v45  ;;  %v696_v51 = vmax.f32 %v536_v46, 0.0  ;;  %771 = vst [vmem:[%s1437_s3 + $0x130] sm:$0xff] %v721_v48  ;;  %v722_v52 = vmax.f32 %v640_v49, 0.0 }
 0x14b   :  { %746 = vst [vmem:[%s1437_s3 + $0x68] sm:$0xff] %v696_v51  ;;  %772 = vst [vmem:[%s1437_s3 + $0x138] sm:$0xff] %v722_v52 }
 0x14c   :  { %v540_v53 = vpop.f32.mrb[28].mxu0  ;;  %v644_v54 = vpop.f32.mrb[28].mxu1 }
 0x14d   :  { %v541_v55 = vadd.f32 %v1232_v3, %v540_v53  ;;  %v542_v56 = vpop.f32.mrb[29].mxu0  ;;  %v645_v57 = vadd.f32 %v1232_v3, %v644_v54  ;;  %v646_v58 = vpop.f32.mrb[29].mxu1 }
 0x14e   :  { %v543_v59 = vpop.f32.mrb[30].mxu0  ;;  %v647_v60 = vpop.f32.mrb[30].mxu1 }
 0x14f   :  { %v697_v61 = vmax.f32 %v541_v55, 0.0  ;;  %v544_v62 = vadd.f32 %v1232_v3, %v543_v59  ;;  %v545_v63 = vpop.f32.mrb[31].mxu0  ;;  %v723_v0 = vmax.f32 %v645_v57, 0.0  ;;  %v648_v1 = vadd.f32 %v1232_v3, %v647_v60  ;;  %v649_v2 = vpop.f32.mrb[31].mxu1 }
 0x151   :  { %747 = vst [vmem:[%s1437_s3 + $0x70] sm:$0xff] %v697_v61  ;;  %v698_v4 = vmax.f32 %v544_v62, 0.0  ;;  %773 = vst [vmem:[%s1437_s3 + $0x140] sm:$0xff] %v723_v0  ;;  %v724_v5 = vmax.f32 %v648_v1, 0.0 }
 0x153   :  { %748 = vst [vmem:[%s1437_s3 + $0x78] sm:$0xff] %v698_v4  ;;  %774 = vst [vmem:[%s1437_s3 + $0x148] sm:$0xff] %v724_v5 }
 0x154   :  { %v548_v6 = vpop.f32.mrb[32].mxu0  ;;  %v652_v7 = vpop.f32.mrb[32].mxu1 }
 0x155   :  { %v549_v8 = vadd.f32 %v1232_v3, %v548_v6  ;;  %v550_v9 = vpop.f32.mrb[33].mxu0  ;;  %v653_v10 = vadd.f32 %v1232_v3, %v652_v7  ;;  %v654_v11 = vpop.f32.mrb[33].mxu1 }
 0x156   :  { %v551_v12 = vpop.f32.mrb[34].mxu0  ;;  %v655_v13 = vpop.f32.mrb[34].mxu1 }
 0x157   :  { %v699_v14 = vmax.f32 %v549_v8, 0.0  ;;  %v552_v15 = vadd.f32 %v1232_v3, %v551_v12  ;;  %v553_v16 = vpop.f32.mrb[35].mxu0  ;;  %v725_v17 = vmax.f32 %v653_v10, 0.0  ;;  %v656_v18 = vadd.f32 %v1232_v3, %v655_v13  ;;  %v657_v19 = vpop.f32.mrb[35].mxu1 }
 0x159   :  { %749 = vst [vmem:[%s1437_s3 + $0x80] sm:$0xff] %v699_v14  ;;  %v700_v20 = vmax.f32 %v552_v15, 0.0  ;;  %775 = vst [vmem:[%s1437_s3 + $0x150] sm:$0xff] %v725_v17  ;;  %v726_v21 = vmax.f32 %v656_v18, 0.0 }
 0x15b   :  { %750 = vst [vmem:[%s1437_s3 + $0x88] sm:$0xff] %v700_v20  ;;  %776 = vst [vmem:[%s1437_s3 + $0x158] sm:$0xff] %v726_v21 }
 0x15c   :  { %v556_v22 = vpop.f32.mrb[36].mxu0  ;;  %v660_v23 = vpop.f32.mrb[36].mxu1 }
 0x15d   :  { %v557_v24 = vadd.f32 %v1232_v3, %v556_v22  ;;  %v558_v25 = vpop.f32.mrb[37].mxu0  ;;  %v661_v26 = vadd.f32 %v1232_v3, %v660_v23  ;;  %v662_v27 = vpop.f32.mrb[37].mxu1 }
 0x15e   :  { %v559_v28 = vpop.f32.mrb[38].mxu0  ;;  %v663_v29 = vpop.f32.mrb[38].mxu1 }
 0x15f   :  { %v701_v30 = vmax.f32 %v557_v24, 0.0  ;;  %v560_v31 = vadd.f32 %v1232_v3, %v559_v28  ;;  %v561_v32 = vpop.f32.mrb[39].mxu0  ;;  %v727_v33 = vmax.f32 %v661_v26, 0.0  ;;  %v664_v34 = vadd.f32 %v1232_v3, %v663_v29  ;;  %v665_v35 = vpop.f32.mrb[39].mxu1 }
 0x161   :  { %751 = vst [vmem:[%s1437_s3 + $0x90] sm:$0xff] %v701_v30  ;;  %v702_v36 = vmax.f32 %v560_v31, 0.0  ;;  %777 = vst [vmem:[%s1437_s3 + $0x160] sm:$0xff] %v727_v33  ;;  %v728_v37 = vmax.f32 %v664_v34, 0.0 }
 0x163   :  { %752 = vst [vmem:[%s1437_s3 + $0x98] sm:$0xff] %v702_v36  ;;  %778 = vst [vmem:[%s1437_s3 + $0x168] sm:$0xff] %v728_v37 }
 0x164   :  { %v564_v38 = vpop.f32.mrb[40].mxu0  ;;  %v668_v39 = vpop.f32.mrb[40].mxu1 }
 0x165   :  { %v565_v40 = vadd.f32 %v1232_v3, %v564_v38  ;;  %v566_v41 = vpop.f32.mrb[41].mxu0  ;;  %v669_v42 = vadd.f32 %v1232_v3, %v668_v39  ;;  %v670_v43 = vpop.f32.mrb[41].mxu1 }
 0x166   :  { %v567_v44 = vpop.f32.mrb[42].mxu0  ;;  %v671_v45 = vpop.f32.mrb[42].mxu1 }
 0x167   :  { %v703_v46 = vmax.f32 %v565_v40, 0.0  ;;  %v568_v47 = vadd.f32 %v1232_v3, %v567_v44  ;;  %v569_v48 = vpop.f32.mrb[43].mxu0  ;;  %v729_v49 = vmax.f32 %v669_v42, 0.0  ;;  %v672_v50 = vadd.f32 %v1232_v3, %v671_v45  ;;  %v673_v51 = vpop.f32.mrb[43].mxu1 }
 0x169   :  { %753 = vst [vmem:[%s1437_s3 + $0xa0] sm:$0xff] %v703_v46  ;;  %v704_v52 = vmax.f32 %v568_v47, 0.0  ;;  %779 = vst [vmem:[%s1437_s3 + $0x170] sm:$0xff] %v729_v49  ;;  %v730_v53 = vmax.f32 %v672_v50, 0.0 }
 0x16b   :  { %754 = vst [vmem:[%s1437_s3 + $0xa8] sm:$0xff] %v704_v52  ;;  %780 = vst [vmem:[%s1437_s3 + $0x178] sm:$0xff] %v730_v53 }
 0x16c   :  { %v572_v54 = vpop.f32.mrb[44].mxu0  ;;  %v676_v55 = vpop.f32.mrb[44].mxu1 }
 0x16d   :  { %v573_v56 = vadd.f32 %v1232_v3, %v572_v54  ;;  %v574_v57 = vpop.f32.mrb[45].mxu0  ;;  %v677_v58 = vadd.f32 %v1232_v3, %v676_v55  ;;  %v678_v59 = vpop.f32.mrb[45].mxu1 }
 0x16e   :  { %v575_v60 = vpop.f32.mrb[46].mxu0  ;;  %v679_v61 = vpop.f32.mrb[46].mxu1 }
 0x16f   :  { %v705_v62 = vmax.f32 %v573_v56, 0.0  ;;  %v576_v63 = vadd.f32 %v1232_v3, %v575_v60  ;;  %v577_v0 = vpop.f32.mrb[47].mxu0  ;;  %v731_v1 = vmax.f32 %v677_v58, 0.0  ;;  %v680_v2 = vadd.f32 %v1232_v3, %v679_v61  ;;  %v681_v4 = vpop.f32.mrb[47].mxu1 }
 0x171   :  { %755 = vst [vmem:[%s1437_s3 + $0xb0] sm:$0xff] %v705_v62  ;;  %v706_v5 = vmax.f32 %v576_v63, 0.0  ;;  %781 = vst [vmem:[%s1437_s3 + $0x180] sm:$0xff] %v731_v1  ;;  %v732_v6 = vmax.f32 %v680_v2, 0.0 }
 0x173   :  { %756 = vst [vmem:[%s1437_s3 + $0xb8] sm:$0xff] %v706_v5  ;;  %782 = vst [vmem:[%s1437_s3 + $0x188] sm:$0xff] %v732_v6 }
 0x174   :  { %v580_v7 = vpop.f32.mrb[48].mxu0 }
 0x175   :  { %v581_v8 = vadd.f32 %v1232_v3, %v580_v7  ;;  %v582_v9 = vpop.f32.mrb[49].mxu0 }
 0x176   :  { %v583_v10 = vpop.f32.mrb[50].mxu0 }
 0x177   :  { %v707_v11 = vmax.f32 %v581_v8, 0.0  ;;  %v584_v12 = vadd.f32 %v1232_v3, %v583_v10  ;;  %v585_v13 = vpop.f32.mrb[51].mxu0 }
 0x179   :  { %757 = vst [vmem:[%s1437_s3 + $0xc0] sm:$0xff] %v707_v11  ;;  %v708_v14 = vmax.f32 %v584_v12, 0.0 }
 0x17b   :  { %758 = vst [vmem:[%s1437_s3 + $0xc8] sm:$0xff] %v708_v14 }

// kernel: net_forward.5
= control target key start
LH: loop header
LB: loop body
LE: loop exit
PB: predicated region body
PF: predicated region fallthrough
CT: control target
= control target key end

     0   :  { %vm35_vm0 = vcmask 1043456   ;;  %s2604_s0 = inlined_call_operand.vmem [shape: f32[4,512], index: 0, kind: input, shape index: {}]   ;;  %s2605_s1 = inlined_call_operand.vmem [shape: f32[512,128], index: 1, kind: input, shape index: {}]   ;;  %s2606_s2 = inlined_call_operand.vmem [shape: f32[1,128], index: 2, kind: input, shape index: {}]   ;;  %s2607_s3 = inlined_call_operand.vmem [shape: f32[128,128], index: 3, kind: input, shape index: {}]   ;;  %s2608_s4 = inlined_call_operand.vmem [shape: f32[1,128], index: 4, kind: input, shape index: {}]   ;;  %s2609_s5 = inlined_call_operand.vmem [shape: f32[128,128], index: 5, kind: input, shape index: {}]   ;;  %s2610_s6 = inlined_call_operand.vmem [shape: f32[1,128], index: 6, kind: input, shape index: {}]   ;;  %s2611_s7 = inlined_call_operand.hbm [shape: f32[4,128], index: 7, kind: output, shape index: {}]  }
   0x1   :  { %v27_v0 = vld [vmem:[%s2604_s0] sm:$0xff]  ;;  %v28_v1 = vld [vmem:[%s2604_s0 + $0x8] sm:$0xff] }
   0x2   :  { %v31_v2 = vcombine.high %v27_v0, %v27_v0  ;;  %v32_v3 = vcombine.high %v28_v1, %v28_v1  ;;  %v36_v4 = vsel %vm35_vm0, %v27_v0, 0.0  ;;  %v50_v5 = vsel %vm35_vm0, %v28_v1, 0.0 }
   0x3   :  { %12 = vsyncpa [#allocation3], 0  ;;  %v37_v6 = vrot.slane %v36_v4, 4  ;;  %v51_v7 = vrot.slane %v50_v5, 4  ;;  %s1941_s0 = smov [#allocation2]  }
   0x4   :  { %v43_v8 = vsel %vm35_vm0, %v31_v2, 0.0  ;;  %v57_v9 = vsel %vm35_vm0, %v32_v3, 0.0  ;;  %s1599_s28 = sshll.u32 %s1941_s0, 4  ;;  %s1600_s28 = int_to_ptr.vmem [resolvable:$true] %s1599_s28 }
   0x5   :  { %v38_v10 = vadd.f32 %v37_v6, %v36_v4  ;;  %v44_v11 = vrot.slane %v43_v8, 4  ;;  %v52_v12 = vadd.f32 %v51_v7, %v50_v5  ;;  %v58_v13 = vrot.slane %v57_v9, 4  ;;  %p1917_p1 = scmp.lt.s32.totalorder %s1600_s28, %s1600_s28 }
   0x7   :  { %v39_v14 = vrot.slane %v38_v10, 2  ;;  %v45_v15 = vadd.f32 %v44_v11, %v43_v8  ;;  %v53_v16 = vrot.slane %v52_v12, 2  ;;  %v59_v17 = vadd.f32 %v58_v13, %v57_v9 }
   0x9   :  { %v40_v18 = vadd.f32 %v39_v14, %v38_v10  ;;  %v46_v19 = vrot.slane %v45_v15, 2  ;;  %v54_v20 = vadd.f32 %v53_v16, %v52_v12  ;;  %v60_v21 = vrot.slane %v59_v17, 2 }
   0xb   :  { %v41_v22 = vrot.slane %v40_v18, 1  ;;  %v47_v23 = vadd.f32 %v46_v19, %v45_v15  ;;  %v55_v24 = vrot.slane %v54_v20, 1  ;;  %v61_v25 = vadd.f32 %v60_v21, %v59_v17 }
   0xd   :  { %v42_v26 = vadd.f32 %v41_v22, %v40_v18  ;;  %v48_v27 = vrot.slane %v47_v23, 1  ;;  %v56_v28 = vadd.f32 %v55_v24, %v54_v20  ;;  %v62_v29 = vrot.slane %v61_v25, 1 }
   0xf   :  { %v49_v30 = vadd.f32 %v48_v27, %v47_v23  ;;  %v63_v31 = vadd.f32 %v62_v29, %v61_v25  ;;  %v65_v32 = vmul.f32 0.25, %v42_v26  ;;  %v67_v33 = vmul.f32 0.25, %v56_v28 }
  0x11   :  { %v66_v34 = vmul.f32 0.25, %v49_v30  ;;  %v68_v35 = vmul.f32 0.25, %v63_v31 }
  0x13   :  { %v73_v36 = vcombine.low %v65_v32, %v66_v34  ;;  %v74_v37 = vcombine.low %v67_v33, %v68_v35  ;;  %v1936_v35 = vmov 839922192  }
  0x15   :  { %v77_v38 = vsub.f32 %v27_v0, %v73_v36  ;;  %v78_v39 = vsub.f32 %v28_v1, %v74_v37  ;;  %v167_v36 = vunpack.c.l.s4 %v1936_v35  ;;  %v169_v37 = vlaneseq }
  0x17   :  { %v79_v40 = vmul.f32 %v77_v38, %v77_v38  ;;  %v80_v41 = vmul.f32 %v78_v39, %v78_v39 }
  0x19   :  { %v83_v42 = vcombine.high %v79_v40, %v79_v40  ;;  %v84_v43 = vcombine.high %v80_v41, %v80_v41  ;;  %v87_v44 = vsel %vm35_vm0, %v79_v40, 0.0  ;;  %v101_v45 = vsel %vm35_vm0, %v80_v41, 0.0 }
  0x1a   :  { %v88_v46 = vrot.slane %v87_v44, 4  ;;  %v102_v47 = vrot.slane %v101_v45, 4 }
  0x1b   :  { %v94_v48 = vsel %vm35_vm0, %v83_v42, 0.0  ;;  %v108_v49 = vsel %vm35_vm0, %v84_v43, 0.0 }
  0x1c   :  { %v89_v50 = vadd.f32 %v88_v46, %v87_v44  ;;  %v95_v51 = vrot.slane %v94_v48, 4  ;;  %v103_v52 = vadd.f32 %v102_v47, %v101_v45  ;;  %v109_v53 = vrot.slane %v108_v49, 4 }
  0x1e   :  { %v90_v54 = vrot.slane %v89_v50, 2  ;;  %v96_v55 = vadd.f32 %v95_v51, %v94_v48  ;;  %v104_v56 = vrot.slane %v103_v52, 2  ;;  %v110_v57 = vadd.f32 %v109_v53, %v108_v49 }
  0x20   :  { %v91_v58 = vadd.f32 %v90_v54, %v89_v50  ;;  %v97_v59 = vrot.slane %v96_v55, 2  ;;  %v105_v60 = vadd.f32 %v104_v56, %v103_v52  ;;  %v111_v61 = vrot.slane %v110_v57, 2 }
  0x22   :  { %v92_v62 = vrot.slane %v91_v58, 1  ;;  %v98_v63 = vadd.f32 %v97_v59, %v96_v55  ;;  %v106_v0 = vrot.slane %v105_v60, 1  ;;  %v112_v1 = vadd.f32 %v111_v61, %v110_v57 }
  0x24   :  { %v93_v2 = vadd.f32 %v92_v62, %v91_v58  ;;  %v99_v3 = vrot.slane %v98_v63, 1  ;;  %v107_v4 = vadd.f32 %v106_v0, %v105_v60  ;;  %v113_v5 = vrot.slane %v112_v1, 1 }
  0x26   :  { %v100_v6 = vadd.f32 %v99_v3, %v98_v63  ;;  %v114_v7 = vadd.f32 %v113_v5, %v112_v1  ;;  %v115_v8 = vmul.f32 0.25, %v93_v2  ;;  %v117_v9 = vmul.f32 0.25, %v107_v4 }
  0x28   :  { %v116_v10 = vmul.f32 0.25, %v100_v6  ;;  %v118_v11 = vmul.f32 0.25, %v114_v7  ;;  %v119_v12 = vadd.f32 1e-05, %v115_v8  ;;  %v121_v13 = vadd.f32 1e-05, %v117_v9 }
  0x2a   :  { %v120_v14 = vadd.f32 1e-05, %v116_v10  ;;  %v122_v15 = vadd.f32 1e-05, %v118_v11  ;;  %1904 = vrsqrt.f32 %v119_v12 }
  0x2b   :  { %1906 = vrsqrt.f32 %v121_v13 }
  0x2c   :  { %1908 = vrsqrt.f32 %v120_v14 }
  0x2d   :  { %1910 = vrsqrt.f32 %v122_v15 }
  0x34   :  { %v1905_v16 = vpop.eup %1904 }
  0x35   :  { %v1907_v17 = vpop.eup %1906 }
  0x36   :  { %v1909_v18 = vpop.eup %1908 }
  0x37   :  { %v1911_v19 = vpop.eup %1910  ;;  %v131_v20 = vcombine.low %v1905_v16, %v1909_v18 }
  0x38   :  { %v132_v21 = vcombine.low %v1907_v17, %v1911_v19 }
  0x39   :  { %v1996_v22 = vmul.f32 %v131_v20, %v77_v38  ;;  %v168_v38 = vunpack.c.0.s8 %v167_v36 }
  0x3a   :  { %v1998_v23 = vmul.f32 %v132_v21, %v78_v39  ;;  %v170_v39 = vshrl.u32 %v169_v37, 7 }
  0x3b   :  { %v2001_v24 = vand.u32 2147483647, %v1996_v22 }
  0x3c   :  { %v2004_v25 = vand.u32 2147483647, %v1998_v23  ;;  %v2022_v40 = vsub.s32 %v168_v38, %v170_v39 }
  0x3d   :  { %v2008_v26 = vcombine.high %v2001_v24, %v2001_v24  ;;  %v154_v27 = vsel %vm35_vm0, %v2001_v24, -inf }
  0x3e   :  { %v2014_v28 = vcombine.high %v2004_v25, %v2004_v25  ;;  %v156_v29 = vsel %vm35_vm0, %v2004_v25, -inf }
  0x3f   :  { %v155_v30 = vsel %vm35_vm0, %v2008_v26, -inf }
  0x40   :  { %v157_v31 = vsel %vm35_vm0, %v2014_v28, -inf  ;;  %v158_v32 = vmax.f32 %v154_v27, %v155_v30 }
  0x41   :  { %v159_v33 = vmax.f32 %v156_v29, %v157_v31 }
  0x43   :  { %v160_v34 = vmax.f32 %v158_v32, %v159_v33 }
  0x45   :  { %161 = vmax.xlane.f32.xlu0 %v160_v34 }
  0xd2   :  { %v162_v41 = vpop.xlane.xlu0 %161 }
  0xd3   :  { %v164_v42 = vmul.f32 0.5, %v162_v41 }
  0xd5   :  { %v172_v43 = vrot.slane %v164_v42, %v2022_v40 }
  0xd7   :  { %v174_v44 = vsub.f32 %v2001_v24, %v172_v43  ;;  %v175_v45 = vsub.f32 %v2004_v25, %v172_v43 }
  0xd9   :  { %v176_v46 = vmax.f32 %v174_v44, 0.0  ;;  %v177_v47 = vmax.f32 %v175_v45, 0.0 }
  0xdb   :  { %v180_v48 = vcombine.high %v176_v46, %v176_v46  ;;  %v181_v49 = vcombine.high %v177_v47, %v177_v47  ;;  %v184_v50 = vsel %vm35_vm0, %v176_v46, 0.0  ;;  %v187_v53 = vsel %vm35_vm0, %v177_v47, 0.0 }
  0xdd   :  { %v185_v51 = vsel %vm35_vm0, %v180_v48, 0.0  ;;  %v189_v55 = vsel %vm35_vm0, %v181_v49, 0.0 }
  0xde   :  { %v186_v52 = vadd.f32 %v185_v51, %v184_v50 }
  0xe0   :  { %v188_v54 = vadd.f32 %v187_v53, %v186_v52 }
  0xe2   :  { %v190_v56 = vadd.f32 %v189_v55, %v188_v54 }
  0xe4   :  { %191 = vadd.xlane.f32.xlu0 %v190_v56 }
 0x171   :  { %v192_v57 = vpop.xlane.xlu0 %191 }
 0x172   :  { %vm193_vm1 = vcmp.gt.f32.partialorder %v192_v57, 1.0 }
 0x173   :  { %v194_v58 = vsel %vm193_vm1, %v164_v42, 0.0  ;;  %v195_v59 = vsel %vm193_vm1, %v162_v41, %v164_v42 }
 0x174   :  { %v196_v60 = vadd.f32 %v195_v59, %v194_v58 }
 0x176   :  { %v197_v61 = vmul.f32 0.5, %v196_v60 }
 0x178   :  { %v205_v62 = vrot.slane %v197_v61, %v2022_v40 }
 0x17a   :  { %v207_v63 = vsub.f32 %v2001_v24, %v205_v62  ;;  %v208_v0 = vsub.f32 %v2004_v25, %v205_v62 }
 0x17c   :  { %v209_v1 = vmax.f32 %v207_v63, 0.0  ;;  %v210_v2 = vmax.f32 %v208_v0, 0.0 }
 0x17e   :  { %v213_v3 = vcombine.high %v209_v1, %v209_v1  ;;  %v214_v4 = vcombine.high %v210_v2, %v210_v2  ;;  %v217_v5 = vsel %vm35_vm0, %v209_v1, 0.0  ;;  %v220_v8 = vsel %vm35_vm0, %v210_v2, 0.0 }
 0x180   :  { %v218_v6 = vsel %vm35_vm0, %v213_v3, 0.0  ;;  %v222_v10 = vsel %vm35_vm0, %v214_v4, 0.0 }
 0x181   :  { %v219_v7 = vadd.f32 %v218_v6, %v217_v5 }
 0x183   :  { %v221_v9 = vadd.f32 %v220_v8, %v219_v7 }
 0x185   :  { %v223_v11 = vadd.f32 %v222_v10, %v221_v9 }
 0x187   :  { %224 = vadd.xlane.f32.xlu1 %v223_v11 }
 0x214   :  { %v225_v12 = vpop.xlane.xlu1 %224 }
 0x215   :  { %vm226_vm2 = vcmp.gt.f32.partialorder %v225_v12, 1.0 }
 0x216   :  { %v227_v13 = vsel %vm226_vm2, %v197_v61, %v194_v58  ;;  %v228_v14 = vsel %vm226_vm2, %v195_v59, %v197_v61 }
 0x217   :  { %v229_v15 = vadd.f32 %v228_v14, %v227_v13 }
 0x219   :  { %v230_v16 = vmul.f32 0.5, %v229_v15 }
 0x21b   :  { %v238_v17 = vrot.slane %v230_v16, %v2022_v40 }
 0x21d   :  { %v240_v18 = vsub.f32 %v2001_v24, %v238_v17  ;;  %v241_v19 = vsub.f32 %v2004_v25, %v238_v17 }
 0x21f   :  { %v242_v20 = vmax.f32 %v240_v18, 0.0  ;;  %v243_v21 = vmax.f32 %v241_v19, 0.0 }
 0x221   :  { %v246_v27 = vcombine.high %v242_v20, %v242_v20  ;;  %v247_v29 = vcombine.high %v243_v21, %v243_v21  ;;  %v250_v30 = vsel %vm35_vm0, %v242_v20, 0.0  ;;  %v253_v33 = vsel %vm35_vm0, %v243_v21, 0.0 }
 0x223   :  { %v251_v31 = vsel %vm35_vm0, %v246_v27, 0.0  ;;  %v255_v35 = vsel %vm35_vm0, %v247_v29, 0.0 }
 0x224   :  { %v252_v32 = vadd.f32 %v251_v31, %v250_v30 }
 0x226   :  { %v254_v34 = vadd.f32 %v253_v33, %v252_v32 }
 0x228   :  { %v256_v36 = vadd.f32 %v255_v35, %v254_v34 }
 0x22a   :  { %257 = vadd.xlane.f32.xlu1 %v256_v36 }
 0x2b7   :  { %v258_v37 = vpop.xlane.xlu1 %257 }
 0x2b8   :  { %vm259_vm3 = vcmp.gt.f32.partialorder %v258_v37, 1.0 }
 0x2b9   :  { %v260_v38 = vsel %vm259_vm3, %v230_v16, %v227_v13  ;;  %v261_v39 = vsel %vm259_vm3, %v228_v14, %v230_v16 }
 0x2ba   :  { %v262_v41 = vadd.f32 %v261_v39, %v260_v38 }
 0x2bc   :  { %v263_v42 = vmul.f32 0.5, %v262_v41 }
 0x2be   :  { %v271_v43 = vrot.slane %v263_v42, %v2022_v40 }
 0x2c0   :  { %v273_v44 = vsub.f32 %v2001_v24, %v271_v43  ;;  %v274_v45 = vsub.f32 %v2004_v25, %v271_v43 }
 0x2c2   :  { %v275_v46 = vmax.f32 %v273_v44, 0.0  ;;  %v276_v47 = vmax.f32 %v274_v45, 0.0 }
 0x2c4   :  { %v279_v48 = vcombine.high %v275_v46, %v275_v46  ;;  %v280_v49 = vcombine.high %v276_v47, %v276_v47  ;;  %v283_v50 = vsel %vm35_vm0, %v275_v46, 0.0  ;;  %v286_v53 = vsel %vm35_vm0, %v276_v47, 0.0 }
 0x2c6   :  { %v284_v51 = vsel %vm35_vm0, %v279_v48, 0.0  ;;  %v288_v55 = vsel %vm35_vm0, %v280_v49, 0.0 }
 0x2c7   :  { %v285_v52 = vadd.f32 %v284_v51, %v283_v50 }
 0x2c9   :  { %v287_v54 = vadd.f32 %v286_v53, %v285_v52 }
 0x2cb   :  { %v289_v56 = vadd.f32 %v288_v55, %v287_v54 }
 0x2cd   :  { %290 = vadd.xlane.f32.xlu0 %v289_v56 }
 0x35a   :  { %v291_v57 = vpop.xlane.xlu0 %290 }
 0x35b   :  { %vm292_vm4 = vcmp.gt.f32.partialorder %v291_v57, 1.0 }
 0x35c   :  { %v293_v58 = vsel %vm292_vm4, %v263_v42, %v260_v38  ;;  %v294_v59 = vsel %vm292_vm4, %v261_v39, %v263_v42 }
 0x35d   :  { %v295_v60 = vadd.f32 %v294_v59, %v293_v58 }
 0x35f   :  { %v296_v61 = vmul.f32 0.5, %v295_v60 }
 0x361   :  { %v304_v62 = vrot.slane %v296_v61, %v2022_v40 }
 0x363   :  { %v306_v63 = vsub.f32 %v2001_v24, %v304_v62  ;;  %v307_v0 = vsub.f32 %v2004_v25, %v304_v62 }
 0x365   :  { %v308_v1 = vmax.f32 %v306_v63, 0.0  ;;  %v309_v2 = vmax.f32 %v307_v0, 0.0 }
 0x367   :  { %v312_v3 = vcombine.high %v308_v1, %v308_v1  ;;  %v313_v4 = vcombine.high %v309_v2, %v309_v2  ;;  %v316_v5 = vsel %vm35_vm0, %v308_v1, 0.0  ;;  %v319_v8 = vsel %vm35_vm0, %v309_v2, 0.0 }
 0x369   :  { %v317_v6 = vsel %vm35_vm0, %v312_v3, 0.0  ;;  %v321_v10 = vsel %vm35_vm0, %v313_v4, 0.0 }
 0x36a   :  { %v318_v7 = vadd.f32 %v317_v6, %v316_v5 }
 0x36c   :  { %v320_v9 = vadd.f32 %v319_v8, %v318_v7 }
 0x36e   :  { %v322_v11 = vadd.f32 %v321_v10, %v320_v9 }
 0x370   :  { %323 = vadd.xlane.f32.xlu1 %v322_v11 }
 0x3fd   :  { %v324_v12 = vpop.xlane.xlu1 %323 }
 0x3fe   :  { %vm325_vm5 = vcmp.gt.f32.partialorder %v324_v12, 1.0 }
 0x3ff   :  { %v326_v13 = vsel %vm325_vm5, %v296_v61, %v293_v58  ;;  %v327_v14 = vsel %vm325_vm5, %v294_v59, %v296_v61 }
 0x400   :  { %v328_v15 = vadd.f32 %v327_v14, %v326_v13 }
 0x402   :  { %v329_v16 = vmul.f32 0.5, %v328_v15 }
 0x404   :  { %v337_v17 = vrot.slane %v329_v16, %v2022_v40 }
 0x406   :  { %v339_v18 = vsub.f32 %v2001_v24, %v337_v17  ;;  %v340_v19 = vsub.f32 %v2004_v25, %v337_v17 }
 0x408   :  { %v341_v20 = vmax.f32 %v339_v18, 0.0  ;;  %v342_v21 = vmax.f32 %v340_v19, 0.0 }
 0x40a   :  { %v345_v27 = vcombine.high %v341_v20, %v341_v20  ;;  %v346_v29 = vcombine.high %v342_v21, %v342_v21  ;;  %v349_v30 = vsel %vm35_vm0, %v341_v20, 0.0  ;;  %v352_v33 = vsel %vm35_vm0, %v342_v21, 0.0 }
 0x40c   :  { %v350_v31 = vsel %vm35_vm0, %v345_v27, 0.0  ;;  %v354_v35 = vsel %vm35_vm0, %v346_v29, 0.0 }
 0x40d   :  { %v351_v32 = vadd.f32 %v350_v31, %v349_v30 }
 0x40f   :  { %v353_v34 = vadd.f32 %v352_v33, %v351_v32 }
 0x411   :  { %v355_v36 = vadd.f32 %v354_v35, %v353_v34 }
 0x413   :  { %356 = vadd.xlane.f32.xlu0 %v355_v36 }
 0x4a0   :  { %v357_v37 = vpop.xlane.xlu0 %356 }
 0x4a1   :  { %vm358_vm6 = vcmp.gt.f32.partialorder %v357_v37, 1.0 }
 0x4a2   :  { %v359_v38 = vsel %vm358_vm6, %v329_v16, %v326_v13  ;;  %v360_v39 = vsel %vm358_vm6, %v327_v14, %v329_v16 }
 0x4a3   :  { %v361_v41 = vadd.f32 %v360_v39, %v359_v38 }
 0x4a5   :  { %v362_v42 = vmul.f32 0.5, %v361_v41 }
 0x4a7   :  { %v370_v43 = vrot.slane %v362_v42, %v2022_v40 }
 0x4a9   :  { %v372_v44 = vsub.f32 %v2001_v24, %v370_v43  ;;  %v373_v45 = vsub.f32 %v2004_v25, %v370_v43 }
 0x4ab   :  { %v374_v46 = vmax.f32 %v372_v44, 0.0  ;;  %v375_v47 = vmax.f32 %v373_v45, 0.0 }
 0x4ad   :  { %v378_v48 = vcombine.high %v374_v46, %v374_v46  ;;  %v379_v49 = vcombine.high %v375_v47, %v375_v47  ;;  %v382_v50 = vsel %vm35_vm0, %v374_v46, 0.0  ;;  %v385_v53 = vsel %vm35_vm0, %v375_v47, 0.0 }
 0x4af   :  { %v383_v51 = vsel %vm35_vm0, %v378_v48, 0.0  ;;  %v387_v55 = vsel %vm35_vm0, %v379_v49, 0.0 }
 0x4b0   :  { %v384_v52 = vadd.f32 %v383_v51, %v382_v50 }
 0x4b2   :  { %v386_v54 = vadd.f32 %v385_v53, %v384_v52 }
 0x4b4   :  { %v388_v56 = vadd.f32 %v387_v55, %v386_v54 }
 0x4b6   :  { %389 = vadd.xlane.f32.xlu1 %v388_v56 }
 0x543   :  { %v390_v57 = vpop.xlane.xlu1 %389 }
 0x544   :  { %vm391_vm7 = vcmp.gt.f32.partialorder %v390_v57, 1.0 }
 0x545   :  { %v392_v58 = vsel %vm391_vm7, %v362_v42, %v359_v38  ;;  %v393_v59 = vsel %vm391_vm7, %v360_v39, %v362_v42 }
 0x546   :  { %v394_v60 = vadd.f32 %v393_v59, %v392_v58 }
 0x548   :  { %v395_v61 = vmul.f32 0.5, %v394_v60 }
 0x54a   :  { %v403_v62 = vrot.slane %v395_v61, %v2022_v40 }
 0x54c   :  { %v405_v63 = vsub.f32 %v2001_v24, %v403_v62  ;;  %v406_v0 = vsub.f32 %v2004_v25, %v403_v62 }
 0x54e   :  { %v407_v1 = vmax.f32 %v405_v63, 0.0  ;;  %v408_v2 = vmax.f32 %v406_v0, 0.0 }
 0x550   :  { %v411_v3 = vcombine.high %v407_v1, %v407_v1  ;;  %v412_v4 = vcombine.high %v408_v2, %v408_v2  ;;  %v415_v5 = vsel %vm35_vm0, %v407_v1, 0.0  ;;  %v418_v8 = vsel %vm35_vm0, %v408_v2, 0.0 }
 0x552   :  { %v416_v6 = vsel %vm35_vm0, %v411_v3, 0.0  ;;  %v420_v10 = vsel %vm35_vm0, %v412_v4, 0.0 }
 0x553   :  { %v417_v7 = vadd.f32 %v416_v6, %v415_v5 }
 0x555   :  { %v419_v9 = vadd.f32 %v418_v8, %v417_v7 }
 0x557   :  { %v421_v11 = vadd.f32 %v420_v10, %v419_v9 }
 0x559   :  { %422 = vadd.xlane.f32.xlu0 %v421_v11 }
 0x5e6   :  { %v423_v12 = vpop.xlane.xlu0 %422 }
 0x5e7   :  { %vm424_vm8 = vcmp.gt.f32.partialorder %v423_v12, 1.0 }
 0x5e8   :  { %v425_v13 = vsel %vm424_vm8, %v395_v61, %v392_v58  ;;  %v426_v14 = vsel %vm424_vm8, %v393_v59, %v395_v61 }
 0x5e9   :  { %v427_v15 = vadd.f32 %v426_v14, %v425_v13 }
 0x5eb   :  { %v428_v16 = vmul.f32 0.5, %v427_v15 }
 0x5ed   :  { %v436_v17 = vrot.slane %v428_v16, %v2022_v40 }
 0x5ef   :  { %v438_v18 = vsub.f32 %v2001_v24, %v436_v17  ;;  %v439_v19 = vsub.f32 %v2004_v25, %v436_v17 }
 0x5f1   :  { %v440_v20 = vmax.f32 %v438_v18, 0.0  ;;  %v441_v21 = vmax.f32 %v439_v19, 0.0 }
 0x5f3   :  { %v444_v27 = vcombine.high %v440_v20, %v440_v20  ;;  %v445_v29 = vcombine.high %v441_v21, %v441_v21  ;;  %v448_v30 = vsel %vm35_vm0, %v440_v20, 0.0  ;;  %v451_v33 = vsel %vm35_vm0, %v441_v21, 0.0 }
 0x5f5   :  { %v449_v31 = vsel %vm35_vm0, %v444_v27, 0.0  ;;  %v453_v35 = vsel %vm35_vm0, %v445_v29, 0.0 }
 0x5f6   :  { %v450_v32 = vadd.f32 %v449_v31, %v448_v30 }
 0x5f8   :  { %v452_v34 = vadd.f32 %v451_v33, %v450_v32 }
 0x5fa   :  { %v454_v36 = vadd.f32 %v453_v35, %v452_v34 }
 0x5fc   :  { %455 = vadd.xlane.f32.xlu1 %v454_v36 }
 0x689   :  { %v456_v37 = vpop.xlane.xlu1 %455 }
 0x68a   :  { %vm457_vm9 = vcmp.gt.f32.partialorder %v456_v37, 1.0 }
 0x68b   :  { %v458_v38 = vsel %vm457_vm9, %v428_v16, %v425_v13  ;;  %v459_v39 = vsel %vm457_vm9, %v426_v14, %v428_v16 }
 0x68c   :  { %v460_v41 = vadd.f32 %v459_v39, %v458_v38 }
 0x68e   :  { %v461_v42 = vmul.f32 0.5, %v460_v41 }
 0x690   :  { %v469_v43 = vrot.slane %v461_v42, %v2022_v40 }
 0x692   :  { %v471_v44 = vsub.f32 %v2001_v24, %v469_v43  ;;  %v472_v45 = vsub.f32 %v2004_v25, %v469_v43 }
 0x694   :  { %v473_v46 = vmax.f32 %v471_v44, 0.0  ;;  %v474_v47 = vmax.f32 %v472_v45, 0.0 }
 0x696   :  { %v477_v48 = vcombine.high %v473_v46, %v473_v46  ;;  %v478_v49 = vcombine.high %v474_v47, %v474_v47  ;;  %v481_v50 = vsel %vm35_vm0, %v473_v46, 0.0  ;;  %v484_v53 = vsel %vm35_vm0, %v474_v47, 0.0 }
 0x698   :  { %v482_v51 = vsel %vm35_vm0, %v477_v48, 0.0  ;;  %v486_v55 = vsel %vm35_vm0, %v478_v49, 0.0 }
 0x699   :  { %v483_v52 = vadd.f32 %v482_v51, %v481_v50 }
 0x69b   :  { %v485_v54 = vadd.f32 %v484_v53, %v483_v52 }
 0x69d   :  { %v487_v56 = vadd.f32 %v486_v55, %v485_v54 }
 0x69f   :  { %488 = vadd.xlane.f32.xlu0 %v487_v56 }
 0x72c   :  { %v489_v57 = vpop.xlane.xlu0 %488 }
 0x72d   :  { %vm490_vm10 = vcmp.gt.f32.partialorder %v489_v57, 1.0 }
 0x72e   :  { %v491_v58 = vsel %vm490_vm10, %v461_v42, %v458_v38  ;;  %v492_v59 = vsel %vm490_vm10, %v459_v39, %v461_v42 }
 0x72f   :  { %v493_v60 = vadd.f32 %v492_v59, %v491_v58 }
 0x731   :  { %v494_v61 = vmul.f32 0.5, %v493_v60 }
 0x733   :  { %v502_v62 = vrot.slane %v494_v61, %v2022_v40 }
 0x735   :  { %v504_v63 = vsub.f32 %v2001_v24, %v502_v62  ;;  %v505_v0 = vsub.f32 %v2004_v25, %v502_v62 }
 0x737   :  { %v506_v1 = vmax.f32 %v504_v63, 0.0  ;;  %v507_v2 = vmax.f32 %v505_v0, 0.0 }
 0x739   :  { %v510_v3 = vcombine.high %v506_v1, %v506_v1  ;;  %v511_v4 = vcombine.high %v507_v2, %v507_v2  ;;  %v514_v5 = vsel %vm35_vm0, %v506_v1, 0.0  ;;  %v517_v8 = vsel %vm35_vm0, %v507_v2, 0.0 }
 0x73b   :  { %v515_v6 = vsel %vm35_vm0, %v510_v3, 0.0  ;;  %v519_v10 = vsel %vm35_vm0, %v511_v4, 0.0 }
 0x73c   :  { %v516_v7 = vadd.f32 %v515_v6, %v514_v5 }
 0x73e   :  { %v518_v9 = vadd.f32 %v517_v8, %v516_v7 }
 0x740   :  { %v520_v11 = vadd.f32 %v519_v10, %v518_v9 }
 0x742   :  { %521 = vadd.xlane.f32.xlu1 %v520_v11 }
 0x7cf   :  { %v522_v12 = vpop.xlane.xlu1 %521 }
 0x7d0   :  { %vm523_vm11 = vcmp.gt.f32.partialorder %v522_v12, 1.0 }
 0x7d1   :  { %v524_v13 = vsel %vm523_vm11, %v494_v61, %v491_v58  ;;  %v525_v14 = vsel %vm523_vm11, %v492_v59, %v494_v61 }
 0x7d2   :  { %v526_v15 = vadd.f32 %v525_v14, %v524_v13 }
 0x7d4   :  { %v527_v16 = vmul.f32 0.5, %v526_v15 }
 0x7d6   :  { %v535_v17 = vrot.slane %v527_v16, %v2022_v40 }
 0x7d8   :  { %v537_v18 = vsub.f32 %v2001_v24, %v535_v17  ;;  %v538_v19 = vsub.f32 %v2004_v25, %v535_v17 }
 0x7da   :  { %v539_v20 = vmax.f32 %v537_v18, 0.0  ;;  %v540_v21 = vmax.f32 %v538_v19, 0.0 }
 0x7dc   :  { %v543_v27 = vcombine.high %v539_v20, %v539_v20  ;;  %v544_v29 = vcombine.high %v540_v21, %v540_v21  ;;  %v547_v30 = vsel %vm35_vm0, %v539_v20, 0.0  ;;  %v550_v33 = vsel %vm35_vm0, %v540_v21, 0.0 }
 0x7de   :  { %v548_v31 = vsel %vm35_vm0, %v543_v27, 0.0  ;;  %v552_v35 = vsel %vm35_vm0, %v544_v29, 0.0 }
 0x7df   :  { %v549_v32 = vadd.f32 %v548_v31, %v547_v30 }
 0x7e1   :  { %v551_v34 = vadd.f32 %v550_v33, %v549_v32 }
 0x7e3   :  { %v553_v36 = vadd.f32 %v552_v35, %v551_v34 }
 0x7e5   :  { %554 = vadd.xlane.f32.xlu0 %v553_v36 }
 0x872   :  { %v555_v37 = vpop.xlane.xlu0 %554 }
 0x873   :  { %vm556_vm12 = vcmp.gt.f32.partialorder %v555_v37, 1.0 }
 0x874   :  { %v557_v38 = vsel %vm556_vm12, %v527_v16, %v524_v13  ;;  %v558_v39 = vsel %vm556_vm12, %v525_v14, %v527_v16 }
 0x875   :  { %v559_v41 = vadd.f32 %v558_v39, %v557_v38 }
 0x877   :  { %v560_v42 = vmul.f32 0.5, %v559_v41 }
 0x879   :  { %v568_v43 = vrot.slane %v560_v42, %v2022_v40 }
 0x87b   :  { %v570_v44 = vsub.f32 %v2001_v24, %v568_v43  ;;  %v571_v45 = vsub.f32 %v2004_v25, %v568_v43 }
 0x87d   :  { %v572_v46 = vmax.f32 %v570_v44, 0.0  ;;  %v573_v47 = vmax.f32 %v571_v45, 0.0 }
 0x87f   :  { %v576_v48 = vcombine.high %v572_v46, %v572_v46  ;;  %v577_v49 = vcombine.high %v573_v47, %v573_v47  ;;  %v580_v50 = vsel %vm35_vm0, %v572_v46, 0.0  ;;  %v583_v53 = vsel %vm35_vm0, %v573_v47, 0.0 }
 0x881   :  { %v581_v51 = vsel %vm35_vm0, %v576_v48, 0.0  ;;  %v585_v55 = vsel %vm35_vm0, %v577_v49, 0.0 }
 0x882   :  { %v582_v52 = vadd.f32 %v581_v51, %v580_v50 }
 0x884   :  { %v584_v54 = vadd.f32 %v583_v53, %v582_v52 }
 0x886   :  { %v586_v56 = vadd.f32 %v585_v55, %v584_v54 }
 0x888   :  { %587 = vadd.xlane.f32.xlu1 %v586_v56 }
 0x915   :  { %v588_v57 = vpop.xlane.xlu1 %587 }
 0x916   :  { %vm589_vm13 = vcmp.gt.f32.partialorder %v588_v57, 1.0 }
 0x917   :  { %v590_v58 = vsel %vm589_vm13, %v560_v42, %v557_v38  ;;  %v591_v59 = vsel %vm589_vm13, %v558_v39, %v560_v42 }
 0x918   :  { %v592_v60 = vadd.f32 %v591_v59, %v590_v58 }
 0x91a   :  { %v593_v61 = vmul.f32 0.5, %v592_v60 }
 0x91c   :  { %v601_v62 = vrot.slane %v593_v61, %v2022_v40 }
 0x91e   :  { %v603_v63 = vsub.f32 %v2001_v24, %v601_v62  ;;  %v604_v0 = vsub.f32 %v2004_v25, %v601_v62 }
 0x920   :  { %v605_v1 = vmax.f32 %v603_v63, 0.0  ;;  %v606_v2 = vmax.f32 %v604_v0, 0.0 }
 0x922   :  { %v609_v3 = vcombine.high %v605_v1, %v605_v1  ;;  %v610_v4 = vcombine.high %v606_v2, %v606_v2  ;;  %v613_v5 = vsel %vm35_vm0, %v605_v1, 0.0  ;;  %v616_v8 = vsel %vm35_vm0, %v606_v2, 0.0 }
 0x924   :  { %v614_v6 = vsel %vm35_vm0, %v609_v3, 0.0  ;;  %v618_v10 = vsel %vm35_vm0, %v610_v4, 0.0 }
 0x925   :  { %v615_v7 = vadd.f32 %v614_v6, %v613_v5 }
 0x927   :  { %v617_v9 = vadd.f32 %v616_v8, %v615_v7 }
 0x929   :  { %v619_v11 = vadd.f32 %v618_v10, %v617_v9 }
 0x92b   :  { %620 = vadd.xlane.f32.xlu0 %v619_v11 }
 0x9b8   :  { %v621_v12 = vpop.xlane.xlu0 %620 }
 0x9b9   :  { %vm622_vm14 = vcmp.gt.f32.partialorder %v621_v12, 1.0 }
 0x9ba   :  { %v623_v13 = vsel %vm622_vm14, %v593_v61, %v590_v58  ;;  %v624_v14 = vsel %vm622_vm14, %v591_v59, %v593_v61 }
 0x9bb   :  { %v625_v15 = vadd.f32 %v624_v14, %v623_v13 }
 0x9bd   :  { %v626_v16 = vmul.f32 0.5, %v625_v15 }
 0x9bf   :  { %v634_v17 = vrot.slane %v626_v16, %v2022_v40 }
 0x9c1   :  { %v636_v18 = vsub.f32 %v2001_v24, %v634_v17  ;;  %v637_v19 = vsub.f32 %v2004_v25, %v634_v17 }
 0x9c3   :  { %v638_v20 = vmax.f32 %v636_v18, 0.0  ;;  %v639_v21 = vmax.f32 %v637_v19, 0.0 }
 0x9c5   :  { %v642_v27 = vcombine.high %v638_v20, %v638_v20  ;;  %v643_v29 = vcombine.high %v639_v21, %v639_v21  ;;  %v646_v30 = vsel %vm35_vm0, %v638_v20, 0.0  ;;  %v649_v33 = vsel %vm35_vm0, %v639_v21, 0.0 }
 0x9c7   :  { %v647_v31 = vsel %vm35_vm0, %v642_v27, 0.0  ;;  %v651_v35 = vsel %vm35_vm0, %v643_v29, 0.0 }
 0x9c8   :  { %v648_v32 = vadd.f32 %v647_v31, %v646_v30 }
 0x9ca   :  { %v650_v34 = vadd.f32 %v649_v33, %v648_v32 }
 0x9cc   :  { %v652_v36 = vadd.f32 %v651_v35, %v650_v34 }
 0x9ce   :  { %653 = vadd.xlane.f32.xlu1 %v652_v36 }
 0xa5b   :  { %v654_v37 = vpop.xlane.xlu1 %653 }
 0xa5c   :  { %vm655_vm15 = vcmp.gt.f32.partialorder %v654_v37, 1.0 }
 0xa5d   :  { %v656_v38 = vsel %vm655_vm15, %v626_v16, %v623_v13  ;;  %v657_v39 = vsel %vm655_vm15, %v624_v14, %v626_v16  ;;  %vm1155_vm15 = vcmp.ge.f32.partialorder %v1996_v22, 0.0 }
 0xa5e   :  { %v658_v41 = vadd.f32 %v657_v39, %v656_v38 }
 0xa60   :  { %v659_v42 = vmul.f32 0.5, %v658_v41 }
 0xa62   :  { %v667_v43 = vrot.slane %v659_v42, %v2022_v40 }
 0xa64   :  { %v669_v44 = vsub.f32 %v2001_v24, %v667_v43  ;;  %v670_v45 = vsub.f32 %v2004_v25, %v667_v43 }
 0xa66   :  { %v671_v46 = vmax.f32 %v669_v44, 0.0  ;;  %v672_v47 = vmax.f32 %v670_v45, 0.0 }
 0xa68   :  { %v675_v48 = vcombine.high %v671_v46, %v671_v46  ;;  %v676_v49 = vcombine.high %v672_v47, %v672_v47  ;;  %v679_v50 = vsel %vm35_vm0, %v671_v46, 0.0  ;;  %v682_v53 = vsel %vm35_vm0, %v672_v47, 0.0 }
 0xa6a   :  { %v680_v51 = vsel %vm35_vm0, %v675_v48, 0.0  ;;  %v684_v55 = vsel %vm35_vm0, %v676_v49, 0.0 }
 0xa6b   :  { %v681_v52 = vadd.f32 %v680_v51, %v679_v50 }
 0xa6d   :  { %v683_v54 = vadd.f32 %v682_v53, %v681_v52 }
 0xa6f   :  { %v685_v56 = vadd.f32 %v684_v55, %v683_v54 }
 0xa71   :  { %686 = vadd.xlane.f32.xlu0 %v685_v56 }
 0xafe   :  { %v687_v57 = vpop.xlane.xlu0 %686 }
 0xaff   :  { %vm688_vm1 = vcmp.gt.f32.partialorder %v687_v57, 1.0 }
 0xb00   :  { %v689_v58 = vsel %vm688_vm1, %v659_v42, %v656_v38  ;;  %v690_v59 = vsel %vm688_vm1, %v657_v39, %v659_v42  ;;  %vm1156_vm1 = vcmp.ge.f32.partialorder %v1998_v23, 0.0 }
 0xb01   :  { %v691_v60 = vadd.f32 %v690_v59, %v689_v58 }
 0xb03   :  { %v692_v61 = vmul.f32 0.5, %v691_v60 }
 0xb05   :  { %v700_v62 = vrot.slane %v692_v61, %v2022_v40 }
 0xb07   :  { %v702_v63 = vsub.f32 %v2001_v24, %v700_v62  ;;  %v703_v0 = vsub.f32 %v2004_v25, %v700_v62 }
 0xb09   :  { %v704_v1 = vmax.f32 %v702_v63, 0.0  ;;  %v705_v2 = vmax.f32 %v703_v0, 0.0 }
 0xb0b   :  { %v708_v3 = vcombine.high %v704_v1, %v704_v1  ;;  %v709_v4 = vcombine.high %v705_v2, %v705_v2  ;;  %v712_v5 = vsel %vm35_vm0, %v704_v1, 0.0  ;;  %v715_v8 = vsel %vm35_vm0, %v705_v2, 0.0 }
 0xb0d   :  { %v713_v6 = vsel %vm35_vm0, %v708_v3, 0.0  ;;  %v717_v10 = vsel %vm35_vm0, %v709_v4, 0.0 }
 0xb0e   :  { %v714_v7 = vadd.f32 %v713_v6, %v712_v5 }
 0xb10   :  { %v716_v9 = vadd.f32 %v715_v8, %v714_v7 }
 0xb12   :  { %v718_v11 = vadd.f32 %v717_v10, %v716_v9 }
 0xb14   :  { %719 = vadd.xlane.f32.xlu1 %v718_v11 }
 0xba1   :  { %v720_v12 = vpop.xlane.xlu1 %719 }
 0xba2   :  { %vm721_vm2 = vcmp.gt.f32.partialorder %v720_v12, 1.0 }
 0xba3   :  { %v722_v13 = vsel %vm721_vm2, %v692_v61, %v689_v58  ;;  %v723_v14 = vsel %vm721_vm2, %v690_v59, %v692_v61 }
 0xba4   :  { %v724_v15 = vadd.f32 %v723_v14, %v722_v13 }
 0xba6   :  { %v725_v16 = vmul.f32 0.5, %v724_v15 }
 0xba8   :  { %v733_v17 = vrot.slane %v725_v16, %v2022_v40 }
 0xbaa   :  { %v735_v18 = vsub.f32 %v2001_v24, %v733_v17  ;;  %v736_v19 = vsub.f32 %v2004_v25, %v733_v17 }
 0xbac   :  { %v737_v20 = vmax.f32 %v735_v18, 0.0  ;;  %v738_v21 = vmax.f32 %v736_v19, 0.0 }
 0xbae   :  { %v741_v27 = vcombine.high %v737_v20, %v737_v20  ;;  %v742_v29 = vcombine.high %v738_v21, %v738_v21  ;;  %v745_v30 = vsel %vm35_vm0, %v737_v20, 0.0  ;;  %v748_v33 = vsel %vm35_vm0, %v738_v21, 0.0 }
 0xbb0   :  { %v746_v31 = vsel %vm35_vm0, %v741_v27, 0.0  ;;  %v750_v35 = vsel %vm35_vm0, %v742_v29, 0.0 }
 0xbb1   :  { %v747_v32 = vadd.f32 %v746_v31, %v745_v30 }
 0xbb3   :  { %v749_v34 = vadd.f32 %v748_v33, %v747_v32 }
 0xbb5   :  { %v751_v36 = vadd.f32 %v750_v35, %v749_v34 }
 0xbb7   :  { %752 = vadd.xlane.f32.xlu0 %v751_v36 }
 0xc44   :  { %v753_v37 = vpop.xlane.xlu0 %752 }
 0xc45   :  { %vm754_vm3 = vcmp.gt.f32.partialorder %v753_v37, 1.0 }
 0xc46   :  { %v755_v38 = vsel %vm754_vm3, %v725_v16, %v722_v13  ;;  %v756_v39 = vsel %vm754_vm3, %v723_v14, %v725_v16  ;;  %vm1939_vm3 = vmmov 0  }
 0xc47   :  { %v757_v41 = vadd.f32 %v756_v39, %v755_v38 }
 0xc49   :  { %v758_v42 = vmul.f32 0.5, %v757_v41 }
 0xc4b   :  { %v766_v43 = vrot.slane %v758_v42, %v2022_v40 }
 0xc4d   :  { %v768_v44 = vsub.f32 %v2001_v24, %v766_v43  ;;  %v769_v45 = vsub.f32 %v2004_v25, %v766_v43 }
 0xc4f   :  { %v770_v46 = vmax.f32 %v768_v44, 0.0  ;;  %v771_v47 = vmax.f32 %v769_v45, 0.0 }
 0xc51   :  { %v774_v48 = vcombine.high %v770_v46, %v770_v46  ;;  %v775_v49 = vcombine.high %v771_v47, %v771_v47  ;;  %v778_v50 = vsel %vm35_vm0, %v770_v46, 0.0  ;;  %v781_v53 = vsel %vm35_vm0, %v771_v47, 0.0 }
 0xc53   :  { %v779_v51 = vsel %vm35_vm0, %v774_v48, 0.0  ;;  %v783_v55 = vsel %vm35_vm0, %v775_v49, 0.0 }
 0xc54   :  { %v780_v52 = vadd.f32 %v779_v51, %v778_v50 }
 0xc56   :  { %v782_v54 = vadd.f32 %v781_v53, %v780_v52 }
 0xc58   :  { %v784_v56 = vadd.f32 %v783_v55, %v782_v54 }
 0xc5a   :  { %785 = vadd.xlane.f32.xlu1 %v784_v56 }
 0xce7   :  { %v786_v57 = vpop.xlane.xlu1 %785 }
 0xce8   :  { %vm787_vm4 = vcmp.gt.f32.partialorder %v786_v57, 1.0 }
 0xce9   :  { %v788_v58 = vsel %vm787_vm4, %v758_v42, %v755_v38  ;;  %v789_v59 = vsel %vm787_vm4, %v756_v39, %v758_v42 }
 0xcea   :  { %v790_v60 = vadd.f32 %v789_v59, %v788_v58 }
 0xcec   :  { %v791_v61 = vmul.f32 0.5, %v790_v60 }
 0xcee   :  { %v799_v62 = vrot.slane %v791_v61, %v2022_v40 }
 0xcf0   :  { %v801_v63 = vsub.f32 %v2001_v24, %v799_v62  ;;  %v802_v0 = vsub.f32 %v2004_v25, %v799_v62 }
 0xcf2   :  { %v803_v1 = vmax.f32 %v801_v63, 0.0  ;;  %v804_v2 = vmax.f32 %v802_v0, 0.0 }
 0xcf4   :  { %v807_v3 = vcombine.high %v803_v1, %v803_v1  ;;  %v808_v4 = vcombine.high %v804_v2, %v804_v2  ;;  %v811_v5 = vsel %vm35_vm0, %v803_v1, 0.0  ;;  %v814_v8 = vsel %vm35_vm0, %v804_v2, 0.0 }
 0xcf6   :  { %v812_v6 = vsel %vm35_vm0, %v807_v3, 0.0  ;;  %v816_v10 = vsel %vm35_vm0, %v808_v4, 0.0 }
 0xcf7   :  { %v813_v7 = vadd.f32 %v812_v6, %v811_v5 }
 0xcf9   :  { %v815_v9 = vadd.f32 %v814_v8, %v813_v7 }
 0xcfb   :  { %v817_v11 = vadd.f32 %v816_v10, %v815_v9 }
 0xcfd   :  { %818 = vadd.xlane.f32.xlu0 %v817_v11 }
 0xd8a   :  { %v819_v12 = vpop.xlane.xlu0 %818 }
 0xd8b   :  { %vm820_vm5 = vcmp.gt.f32.partialorder %v819_v12, 1.0 }
 0xd8c   :  { %v821_v13 = vsel %vm820_vm5, %v791_v61, %v788_v58  ;;  %v822_v14 = vsel %vm820_vm5, %v789_v59, %v791_v61 }
 0xd8d   :  { %v823_v15 = vadd.f32 %v822_v14, %v821_v13 }
 0xd8f   :  { %v824_v16 = vmul.f32 0.5, %v823_v15 }
 0xd91   :  { %v832_v17 = vrot.slane %v824_v16, %v2022_v40 }
 0xd93   :  { %v834_v18 = vsub.f32 %v2001_v24, %v832_v17  ;;  %v835_v19 = vsub.f32 %v2004_v25, %v832_v17 }
 0xd95   :  { %v836_v20 = vmax.f32 %v834_v18, 0.0  ;;  %v837_v21 = vmax.f32 %v835_v19, 0.0 }
 0xd97   :  { %v840_v27 = vcombine.high %v836_v20, %v836_v20  ;;  %v841_v29 = vcombine.high %v837_v21, %v837_v21  ;;  %v844_v30 = vsel %vm35_vm0, %v836_v20, 0.0  ;;  %v847_v33 = vsel %vm35_vm0, %v837_v21, 0.0 }
 0xd99   :  { %v845_v31 = vsel %vm35_vm0, %v840_v27, 0.0  ;;  %v849_v35 = vsel %vm35_vm0, %v841_v29, 0.0 }
 0xd9a   :  { %v846_v32 = vadd.f32 %v845_v31, %v844_v30 }
 0xd9c   :  { %v848_v34 = vadd.f32 %v847_v33, %v846_v32 }
 0xd9e   :  { %v850_v36 = vadd.f32 %v849_v35, %v848_v34 }
 0xda0   :  { %851 = vadd.xlane.f32.xlu1 %v850_v36 }
 0xe2d   :  { %v852_v37 = vpop.xlane.xlu1 %851 }
 0xe2e   :  { %vm853_vm6 = vcmp.gt.f32.partialorder %v852_v37, 1.0 }
 0xe2f   :  { %v854_v38 = vsel %vm853_vm6, %v824_v16, %v821_v13  ;;  %v855_v39 = vsel %vm853_vm6, %v822_v14, %v824_v16 }
 0xe30   :  { %v856_v41 = vadd.f32 %v855_v39, %v854_v38 }
 0xe32   :  { %v857_v42 = vmul.f32 0.5, %v856_v41 }
 0xe34   :  { %v865_v43 = vrot.slane %v857_v42, %v2022_v40 }
 0xe36   :  { %v867_v44 = vsub.f32 %v2001_v24, %v865_v43  ;;  %v868_v45 = vsub.f32 %v2004_v25, %v865_v43 }
 0xe38   :  { %v869_v46 = vmax.f32 %v867_v44, 0.0  ;;  %v870_v47 = vmax.f32 %v868_v45, 0.0 }
 0xe3a   :  { %v873_v48 = vcombine.high %v869_v46, %v869_v46  ;;  %v874_v49 = vcombine.high %v870_v47, %v870_v47  ;;  %v877_v50 = vsel %vm35_vm0, %v869_v46, 0.0  ;;  %v880_v53 = vsel %vm35_vm0, %v870_v47, 0.0 }
 0xe3c   :  { %v878_v51 = vsel %vm35_vm0, %v873_v48, 0.0  ;;  %v882_v55 = vsel %vm35_vm0, %v874_v49, 0.0 }
 0xe3d   :  { %v879_v52 = vadd.f32 %v878_v51, %v877_v50 }
 0xe3f   :  { %v881_v54 = vadd.f32 %v880_v53, %v879_v52 }
 0xe41   :  { %v883_v56 = vadd.f32 %v882_v55, %v881_v54 }
 0xe43   :  { %884 = vadd.xlane.f32.xlu0 %v883_v56 }
 0xed0   :  { %v885_v57 = vpop.xlane.xlu0 %884 }
 0xed1   :  { %vm886_vm7 = vcmp.gt.f32.partialorder %v885_v57, 1.0 }
 0xed2   :  { %v887_v58 = vsel %vm886_vm7, %v857_v42, %v854_v38  ;;  %v888_v59 = vsel %vm886_vm7, %v855_v39, %v857_v42 }
 0xed3   :  { %v889_v60 = vadd.f32 %v888_v59, %v887_v58 }
 0xed5   :  { %v890_v61 = vmul.f32 0.5, %v889_v60 }
 0xed7   :  { %v898_v62 = vrot.slane %v890_v61, %v2022_v40 }
 0xed9   :  { %v900_v63 = vsub.f32 %v2001_v24, %v898_v62  ;;  %v901_v0 = vsub.f32 %v2004_v25, %v898_v62 }
 0xedb   :  { %v902_v1 = vmax.f32 %v900_v63, 0.0  ;;  %v903_v2 = vmax.f32 %v901_v0, 0.0 }
 0xedd   :  { %v906_v3 = vcombine.high %v902_v1, %v902_v1  ;;  %v907_v4 = vcombine.high %v903_v2, %v903_v2  ;;  %v910_v5 = vsel %vm35_vm0, %v902_v1, 0.0  ;;  %v913_v8 = vsel %vm35_vm0, %v903_v2, 0.0 }
 0xedf   :  { %v911_v6 = vsel %vm35_vm0, %v906_v3, 0.0  ;;  %v915_v10 = vsel %vm35_vm0, %v907_v4, 0.0 }
 0xee0   :  { %v912_v7 = vadd.f32 %v911_v6, %v910_v5 }
 0xee2   :  { %v914_v9 = vadd.f32 %v913_v8, %v912_v7 }
 0xee4   :  { %v916_v11 = vadd.f32 %v915_v10, %v914_v9 }
 0xee6   :  { %917 = vadd.xlane.f32.xlu1 %v916_v11 }
 0xf73   :  { %v918_v12 = vpop.xlane.xlu1 %917 }
 0xf74   :  { %vm919_vm8 = vcmp.gt.f32.partialorder %v918_v12, 1.0 }
 0xf75   :  { %v920_v13 = vsel %vm919_vm8, %v890_v61, %v887_v58  ;;  %v921_v14 = vsel %vm919_vm8, %v888_v59, %v890_v61 }
 0xf76   :  { %v922_v15 = vadd.f32 %v921_v14, %v920_v13 }
 0xf78   :  { %v923_v16 = vmul.f32 0.5, %v922_v15 }
 0xf7a   :  { %v931_v17 = vrot.slane %v923_v16, %v2022_v40 }
 0xf7c   :  { %v933_v18 = vsub.f32 %v2001_v24, %v931_v17  ;;  %v934_v19 = vsub.f32 %v2004_v25, %v931_v17 }
 0xf7e   :  { %v935_v20 = vmax.f32 %v933_v18, 0.0  ;;  %v936_v21 = vmax.f32 %v934_v19, 0.0 }
 0xf80   :  { %v939_v27 = vcombine.high %v935_v20, %v935_v20  ;;  %v940_v29 = vcombine.high %v936_v21, %v936_v21  ;;  %v943_v30 = vsel %vm35_vm0, %v935_v20, 0.0  ;;  %v946_v33 = vsel %vm35_vm0, %v936_v21, 0.0 }
 0xf82   :  { %v944_v31 = vsel %vm35_vm0, %v939_v27, 0.0  ;;  %v948_v35 = vsel %vm35_vm0, %v940_v29, 0.0 }
 0xf83   :  { %v945_v32 = vadd.f32 %v944_v31, %v943_v30 }
 0xf85   :  { %v947_v34 = vadd.f32 %v946_v33, %v945_v32 }
 0xf87   :  { %v949_v36 = vadd.f32 %v948_v35, %v947_v34 }
 0xf89   :  { %950 = vadd.xlane.f32.xlu0 %v949_v36 }
0x1016   :  { %v951_v37 = vpop.xlane.xlu0 %950 }
0x1017   :  { %vm952_vm9 = vcmp.gt.f32.partialorder %v951_v37, 1.0 }
0x1018   :  { %v953_v38 = vsel %vm952_vm9, %v923_v16, %v920_v13  ;;  %v954_v39 = vsel %vm952_vm9, %v921_v14, %v923_v16 }
0x1019   :  { %v955_v41 = vadd.f32 %v954_v39, %v953_v38 }
0x101b   :  { %v956_v42 = vmul.f32 0.5, %v955_v41 }
0x101d   :  { %v964_v43 = vrot.slane %v956_v42, %v2022_v40 }
0x101f   :  { %v966_v44 = vsub.f32 %v2001_v24, %v964_v43  ;;  %v967_v45 = vsub.f32 %v2004_v25, %v964_v43 }
0x1021   :  { %v968_v46 = vmax.f32 %v966_v44, 0.0  ;;  %v969_v47 = vmax.f32 %v967_v45, 0.0 }
0x1023   :  { %v972_v48 = vcombine.high %v968_v46, %v968_v46  ;;  %v973_v49 = vcombine.high %v969_v47, %v969_v47  ;;  %v976_v50 = vsel %vm35_vm0, %v968_v46, 0.0  ;;  %v979_v53 = vsel %vm35_vm0, %v969_v47, 0.0 }
0x1025   :  { %v977_v51 = vsel %vm35_vm0, %v972_v48, 0.0  ;;  %v981_v55 = vsel %vm35_vm0, %v973_v49, 0.0 }
0x1026   :  { %v978_v52 = vadd.f32 %v977_v51, %v976_v50 }
0x1028   :  { %v980_v54 = vadd.f32 %v979_v53, %v978_v52 }
0x102a   :  { %v982_v56 = vadd.f32 %v981_v55, %v980_v54 }
0x102c   :  { %983 = vadd.xlane.f32.xlu1 %v982_v56 }
0x10b9   :  { %v984_v57 = vpop.xlane.xlu1 %983 }
0x10ba   :  { %vm985_vm10 = vcmp.gt.f32.partialorder %v984_v57, 1.0 }
0x10bb   :  { %v986_v58 = vsel %vm985_vm10, %v956_v42, %v953_v38  ;;  %v987_v59 = vsel %vm985_vm10, %v954_v39, %v956_v42 }
0x10bc   :  { %v988_v60 = vadd.f32 %v987_v59, %v986_v58 }
0x10be   :  { %v989_v61 = vmul.f32 0.5, %v988_v60 }
0x10c0   :  { %v997_v62 = vrot.slane %v989_v61, %v2022_v40 }
0x10c2   :  { %v999_v63 = vsub.f32 %v2001_v24, %v997_v62  ;;  %v1000_v0 = vsub.f32 %v2004_v25, %v997_v62 }
0x10c4   :  { %v1001_v1 = vmax.f32 %v999_v63, 0.0  ;;  %v1002_v2 = vmax.f32 %v1000_v0, 0.0 }
0x10c6   :  { %v1005_v3 = vcombine.high %v1001_v1, %v1001_v1  ;;  %v1006_v4 = vcombine.high %v1002_v2, %v1002_v2  ;;  %v1009_v5 = vsel %vm35_vm0, %v1001_v1, 0.0  ;;  %v1012_v8 = vsel %vm35_vm0, %v1002_v2, 0.0 }
0x10c8   :  { %v1010_v6 = vsel %vm35_vm0, %v1005_v3, 0.0  ;;  %v1014_v10 = vsel %vm35_vm0, %v1006_v4, 0.0 }
0x10c9   :  { %v1011_v7 = vadd.f32 %v1010_v6, %v1009_v5 }
0x10cb   :  { %v1013_v9 = vadd.f32 %v1012_v8, %v1011_v7 }
0x10cd   :  { %v1015_v11 = vadd.f32 %v1014_v10, %v1013_v9 }
0x10cf   :  { %1016 = vadd.xlane.f32.xlu0 %v1015_v11 }
0x115c   :  { %v1017_v12 = vpop.xlane.xlu0 %1016 }
0x115d   :  { %vm1018_vm11 = vcmp.gt.f32.partialorder %v1017_v12, 1.0  ;;  %v145_v12 = vsel %vm35_vm0, %v2001_v24, 0.0 }
0x115e   :  { %v1019_v13 = vsel %vm1018_vm11, %v989_v61, %v986_v58  ;;  %v1020_v14 = vsel %vm1018_vm11, %v987_v59, %v989_v61 }
0x115f   :  { %v1021_v15 = vadd.f32 %v1020_v14, %v1019_v13 }
0x1161   :  { %v1022_v16 = vmul.f32 0.5, %v1021_v15  ;;  %v1209_v15 = vld [vmem:[%s2605_s1 + $0x80] sm:$0xff] }
0x1163   :  { %v1030_v17 = vrot.slane %v1022_v16, %v2022_v40 }
0x1165   :  { %v1032_v18 = vsub.f32 %v2001_v24, %v1030_v17  ;;  %v1033_v19 = vsub.f32 %v2004_v25, %v1030_v17 }
0x1167   :  { %v1034_v20 = vmax.f32 %v1032_v18, 0.0  ;;  %v1035_v21 = vmax.f32 %v1033_v19, 0.0  ;;  %v1241_v19 = vld [vmem:[%s2605_s1 + $0x180] sm:$0xff] }
0x1169   :  { %v1038_v27 = vcombine.high %v1034_v20, %v1034_v20  ;;  %v1039_v29 = vcombine.high %v1035_v21, %v1035_v21  ;;  %v1042_v30 = vsel %vm35_vm0, %v1034_v20, 0.0  ;;  %v1045_v33 = vsel %vm35_vm0, %v1035_v21, 0.0  ;;  %v1193_v20 = vld [vmem:[%s2605_s1] sm:$0xff] }
0x116a   :  { %v150_v21 = vsel %vm35_vm0, %v2014_v28, 0.0  ;;  %v1211_v28 = vld [vmem:[%s2605_s1 + $0x90] sm:$0xff] }
0x116b   :  { %v1043_v31 = vsel %vm35_vm0, %v1038_v27, 0.0  ;;  %v1047_v35 = vsel %vm35_vm0, %v1039_v29, 0.0  ;;  %v1194_v29 = vld [vmem:[%s2605_s1 + $0x8] sm:$0xff] }
0x116c   :  { %v1044_v32 = vadd.f32 %v1043_v31, %v1042_v30  ;;  %v1225_v30 = vld [vmem:[%s2605_s1 + $0x100] sm:$0xff]  ;;  %v1226_v31 = vld [vmem:[%s2605_s1 + $0x108] sm:$0xff] }
0x116e   :  { %v1046_v34 = vadd.f32 %v1045_v33, %v1044_v32  ;;  %v1786_v33 = vpack.c.bf16 %v1194_v29, %v1193_v20 }
0x1170   :  { %v1048_v36 = vadd.f32 %v1047_v35, %v1046_v34  ;;  %v1818_v34 = vpack.c.bf16 %v1226_v31, %v1225_v30  ;;  %v1212_v35 = vld [vmem:[%s2605_s1 + $0x98] sm:$0xff] }
0x1172   :  { %1049 = vadd.xlane.f32.xlu1 %v1048_v36  ;;  %v1243_v36 = vld [vmem:[%s2605_s1 + $0x190] sm:$0xff] }
0x11ff   :  { %v1050_v37 = vpop.xlane.xlu1 %1049 }
0x1200   :  { %vm1051_vm12 = vcmp.gt.f32.partialorder %v1050_v37, 1.0  ;;  %v1788_v37 = vpack.c.bf16 %v1212_v35, %v1211_v28  ;;  %v1250_v35 = vld [vmem:[%s2605_s1 + $0x1c8] sm:$0xff] }
0x1201   :  { %v1052_v38 = vsel %vm1051_vm12, %v1022_v16, %v1019_v13  ;;  %v1053_v39 = vsel %vm1051_vm12, %v1020_v14, %v1022_v16  ;;  %v146_v13 = vsel %vm35_vm0, %v2008_v26, 0.0  ;;  %v148_v14 = vsel %vm35_vm0, %v2004_v25, 0.0  ;;  %v1210_v16 = vld [vmem:[%s2605_s1 + $0x88] sm:$0xff] }
0x1202   :  { %v1054_v41 = vadd.f32 %v1053_v39, %v1052_v38  ;;  %v147_v17 = vadd.f32 %v146_v13, %v145_v12  ;;  %v1784_v18 = vpack.c.bf16 %v1210_v16, %v1209_v15  ;;  %v1242_v26 = vld [vmem:[%s2605_s1 + $0x188] sm:$0xff] }
0x1203   :  { %v1816_v27 = vpack.c.bf16 %v1242_v26, %v1241_v19 }
0x1204   :  { %v1055_v42 = vmul.f32 0.5, %v1054_v41  ;;  %v149_v32 = vadd.f32 %v148_v14, %v147_v17  ;;  %1785 = vmatprep.subr.bf16.mxu0 %v1784_v18  ;;  %v1196_v41 = vld [vmem:[%s2605_s1 + $0x18] sm:$0xff] }
0x1205   :  { %1817 = vmatprep.subr.bf16.mxu1 %v1816_v27  ;;  %1787 = vmatpush3.bf16.msra.mxu0 %v1786_v33  ;;  %v1218_v33 = vld [vmem:[%s2605_s1 + $0xc8] sm:$0xff] }
0x1206   :  { %v1063_v43 = vrot.slane %v1055_v42, %v2022_v40  ;;  %1819 = vmatpush3.bf16.msra.mxu1 %v1818_v34  ;;  %1789 = vmatprep.subr.bf16.mxu0 %v1788_v37  ;;  %v1249_v34 = vld [vmem:[%s2605_s1 + $0x1c0] sm:$0xff]  ;;  %v1202_v37 = vld [vmem:[%s2605_s1 + $0x48] sm:$0xff] }
0x1208   :  { %v1065_v44 = vsub.f32 %v2001_v24, %v1063_v43  ;;  %v1066_v45 = vsub.f32 %v2004_v25, %v1063_v43 }
0x120a   :  { %v1067_v46 = vmax.f32 %v1065_v44, 0.0  ;;  %v1068_v47 = vmax.f32 %v1066_v45, 0.0  ;;  %v1227_v45 = vld [vmem:[%s2605_s1 + $0x110] sm:$0xff] }
0x120c   :  { %v1071_v48 = vcombine.high %v1067_v46, %v1067_v46  ;;  %v1072_v49 = vcombine.high %v1068_v47, %v1068_v47  ;;  %v1075_v50 = vsel %vm35_vm0, %v1067_v46, 0.0  ;;  %v1078_v53 = vsel %vm35_vm0, %v1068_v47, 0.0  ;;  %v1228_v46 = vld [vmem:[%s2605_s1 + $0x118] sm:$0xff]  ;;  %v1213_v47 = vld [vmem:[%s2605_s1 + $0xa0] sm:$0xff] }
0x120e   :  { %v1076_v51 = vsel %vm35_vm0, %v1071_v48, 0.0  ;;  %v1080_v55 = vsel %vm35_vm0, %v1072_v49, 0.0  ;;  %v1822_v48 = vpack.c.bf16 %v1228_v46, %v1227_v45  ;;  %v1214_v49 = vld [vmem:[%s2605_s1 + $0xa8] sm:$0xff]  ;;  %v1220_v45 = vld [vmem:[%s2605_s1 + $0xd8] sm:$0xff]  ;;  %v1251_v46 = vld [vmem:[%s2605_s1 + $0x1d0] sm:$0xff] }
0x120f   :  { %v1077_v52 = vadd.f32 %v1076_v51, %v1075_v50  ;;  %v1245_v50 = vld [vmem:[%s2605_s1 + $0x1a0] sm:$0xff]  ;;  %v1246_v51 = vld [vmem:[%s2605_s1 + $0x1a8] sm:$0xff] }
0x1211   :  { %v1079_v54 = vadd.f32 %v1078_v53, %v1077_v52  ;;  %v1792_v52 = vpack.c.bf16 %v1214_v49, %v1213_v47  ;;  %v1824_v53 = vpack.c.bf16 %v1246_v51, %v1245_v50  ;;  %v1203_v49 = vld [vmem:[%s2605_s1 + $0x50] sm:$0xff]  ;;  %v1204_v50 = vld [vmem:[%s2605_s1 + $0x58] sm:$0xff] }
0x1213   :  { %v1081_v56 = vadd.f32 %v1080_v55, %v1079_v54  ;;  %v1197_v54 = vld [vmem:[%s2605_s1 + $0x20] sm:$0xff]  ;;  %v1198_v55 = vld [vmem:[%s2605_s1 + $0x28] sm:$0xff] }
0x1215   :  { %1082 = vadd.xlane.f32.xlu0 %v1081_v56  ;;  %v1229_v56 = vld [vmem:[%s2605_s1 + $0x120] sm:$0xff] }
0x12a2   :  { %v1083_v57 = vpop.xlane.xlu0 %1082 }
0x12a3   :  { %vm1084_vm13 = vcmp.gt.f32.partialorder %v1083_v57, 1.0  ;;  %v1230_v57 = vld [vmem:[%s2605_s1 + $0x128] sm:$0xff] }
0x12a4   :  { %v2220_v58 = vsel %vm1084_vm13, %v1055_v42, %v1052_v38  ;;  %v2222_v59 = vsel %vm1084_vm13, %v1053_v39, %v1055_v42  ;;  %v1244_v38 = vld [vmem:[%s2605_s1 + $0x198] sm:$0xff]  ;;  %v1195_v39 = vld [vmem:[%s2605_s1 + $0x10] sm:$0xff]  ;;  %v151_v42 = vadd.f32 %v150_v21, %v149_v32  ;;  %v1217_v32 = vld [vmem:[%s2605_s1 + $0xc0] sm:$0xff] }
0x12a5   :  { %v1087_v60 = vadd.f32 %v2222_v59, %v2220_v58  ;;  %v1820_v43 = vpack.c.bf16 %v1244_v38, %v1243_v36  ;;  %v1790_v44 = vpack.c.bf16 %v1196_v41, %v1195_v39  ;;  %v1800_v28 = vpack.c.bf16 %v1218_v33, %v1217_v32  ;;  %v1201_v36 = vld [vmem:[%s2605_s1 + $0x40] sm:$0xff] }
0x12a6   :  { %v1832_v38 = vpack.c.bf16 %v1250_v35, %v1249_v34  ;;  %v1802_v39 = vpack.c.bf16 %v1202_v37, %v1201_v36  ;;  %v1233_v41 = vld [vmem:[%s2605_s1 + $0x140] sm:$0xff]  ;;  %v1938_v33 = vmov -1.0  }
0x12a7   :  { %v2226_v61 = vmul.f32 0.5, %v1087_v60  ;;  %1821 = vmatprep.subr.bf16.mxu1 %v1820_v43  ;;  %v1215_v60 = vld [vmem:[%s2605_s1 + $0xb0] sm:$0xff]  ;;  %1791 = vmatpush3.bf16.msra.mxu0 %v1790_v44  ;;  %v1157_v34 = vsel %vm1155_vm15, 1.0, %v1938_v33 }
0x12a8   :  { %1823 = vmatpush3.bf16.msra.mxu1 %v1822_v48  ;;  %1793 = vmatprep.subr.bf16.mxu0 %v1792_v52  ;;  %v1219_v44 = vld [vmem:[%s2605_s1 + $0xd0] sm:$0xff]  ;;  %v1252_v48 = vld [vmem:[%s2605_s1 + $0x1d8] sm:$0xff]  ;;  %v1806_v52 = vpack.c.bf16 %v1204_v50, %v1203_v49  ;;  %v1409_v49 = vld [vmem:[%s2607_s3 + $0x20] sm:$0xff] }
0x12a9   :  { %v1096_v62 = vrot.slane %v2226_v61, %v2022_v40  ;;  %1825 = vmatprep.subr.bf16.mxu1 %v1824_v53  ;;  %v1804_v47 = vpack.c.bf16 %v1220_v45, %v1219_v44  ;;  %v1836_v51 = vpack.c.bf16 %v1252_v48, %v1251_v46  ;;  %v1235_v53 = vld [vmem:[%s2605_s1 + $0x150] sm:$0xff]  ;;  %v1408_v45 = vld [vmem:[%s2607_s3 + $0x18] sm:$0xff]  ;;  %v1410_v50 = vld [vmem:[%s2607_s3 + $0x28] sm:$0xff] }
0x12aa   :  { %v1407_v44 = vld [vmem:[%s2607_s3 + $0x10] sm:$0xff] }
0x12ab   :  { %v1098_v63 = vsub.f32 %v2001_v24, %v1096_v62  ;;  %v1099_v0 = vsub.f32 %v2004_v25, %v1096_v62  ;;  %v1216_v62 = vld [vmem:[%s2605_s1 + $0xb8] sm:$0xff]  ;;  %v1852_v48 = vpack.c.bf16 %v1408_v45, %v1407_v44 }
0x12ad   :  { %v1100_v1 = vmax.f32 %v1098_v63, 0.0  ;;  %v1101_v2 = vmax.f32 %v1099_v0, 0.0  ;;  %v1794_v63 = vpack.c.bf16 %v1198_v55, %v1197_v54  ;;  %v1826_v0 = vpack.c.bf16 %v1230_v57, %v1229_v56  ;;  %v1236_v54 = vld [vmem:[%s2605_s1 + $0x158] sm:$0xff]  ;;  %v1221_v56 = vld [vmem:[%s2605_s1 + $0xe0] sm:$0xff]  ;;  %v1222_v57 = vld [vmem:[%s2605_s1 + $0xe8] sm:$0xff] }
0x12ae   :  { %v1838_v55 = vpack.c.bf16 %v1236_v54, %v1235_v53  ;;  %v1413_v53 = vld [vmem:[%s2607_s3 + $0x40] sm:$0xff]  ;;  %v1414_v54 = vld [vmem:[%s2607_s3 + $0x48] sm:$0xff] }
0x12af   :  { %v1104_v3 = vcombine.high %v1100_v1, %v1100_v1  ;;  %v1105_v4 = vcombine.high %v1101_v2, %v1101_v2  ;;  %v1108_v5 = vsel %vm35_vm0, %v1100_v1, 0.0  ;;  %v1111_v8 = vsel %vm35_vm0, %v1101_v2, 0.0  ;;  %v1247_v1 = vld [vmem:[%s2605_s1 + $0x1b0] sm:$0xff]  ;;  %v1248_v2 = vld [vmem:[%s2605_s1 + $0x1b8] sm:$0xff]  ;;  %1795 = vmatpush3.bf16.msra.mxu0 %v1794_v63  ;;  %1827 = vmatpush3.bf16.msra.mxu1 %v1826_v0  ;;  %v1254_v63 = vld [vmem:[%s2605_s1 + $0x1e8] sm:$0xff] }
0x12b0   :  { %v1205_v0 = vld [vmem:[%s2605_s1 + $0x60] sm:$0xff] }
0x12b1   :  { %v1109_v6 = vsel %vm35_vm0, %v1104_v3, 0.0  ;;  %v1113_v10 = vsel %vm35_vm0, %v1105_v4, 0.0  ;;  %v1199_v3 = vld [vmem:[%s2605_s1 + $0x30] sm:$0xff]  ;;  %v1796_v4 = vpack.c.bf16 %v1216_v62, %v1215_v60  ;;  %v1253_v60 = vld [vmem:[%s2605_s1 + $0x1e0] sm:$0xff]  ;;  %v1808_v62 = vpack.c.bf16 %v1222_v57, %v1221_v56  ;;  %v1416_v57 = vld [vmem:[%s2607_s3 + $0x58] sm:$0xff] }
0x12b2   :  { %v1110_v7 = vadd.f32 %v1109_v6, %v1108_v5  ;;  %v1828_v5 = vpack.c.bf16 %v1248_v2, %v1247_v1  ;;  %v1200_v6 = vld [vmem:[%s2605_s1 + $0x38] sm:$0xff]  ;;  %v1206_v1 = vld [vmem:[%s2605_s1 + $0x68] sm:$0xff]  ;;  %v1840_v2 = vpack.c.bf16 %v1254_v63, %v1253_v60  ;;  %v1415_v56 = vld [vmem:[%s2607_s3 + $0x50] sm:$0xff] }
0x12b3   :  { %1797 = vmatprep.subr.bf16.mxu0 %v1796_v4  ;;  %v1237_v4 = vld [vmem:[%s2605_s1 + $0x160] sm:$0xff]  ;;  %v1864_v60 = vpack.c.bf16 %v1416_v57, %v1415_v56  ;;  %v1418_v63 = vld [vmem:[%s2607_s3 + $0x68] sm:$0xff] }
0x12b4   :  { %v1112_v9 = vadd.f32 %v1111_v8, %v1110_v7  ;;  %v1231_v7 = vld [vmem:[%s2605_s1 + $0x130] sm:$0xff]  ;;  %v1232_v8 = vld [vmem:[%s2605_s1 + $0x138] sm:$0xff]  ;;  %1829 = vmatprep.subr.bf16.mxu1 %v1828_v5  ;;  %v1238_v5 = vld [vmem:[%s2605_s1 + $0x168] sm:$0xff] }
0x12b6   :  { %v1114_v11 = vadd.f32 %v1113_v10, %v1112_v9  ;;  %v1798_v9 = vpack.c.bf16 %v1200_v6, %v1199_v3  ;;  %v1830_v10 = vpack.c.bf16 %v1232_v8, %v1231_v7  ;;  %v1810_v3 = vpack.c.bf16 %v1206_v1, %v1205_v0  ;;  %v1223_v7 = vld [vmem:[%s2605_s1 + $0xf0] sm:$0xff]  ;;  %v1224_v8 = vld [vmem:[%s2605_s1 + $0xf8] sm:$0xff] }
0x12b7   :  { %v1842_v6 = vpack.c.bf16 %v1238_v5, %v1237_v4  ;;  %v1419_v1 = vld [vmem:[%s2607_s3 + $0x70] sm:$0xff]  ;;  %v1940_v4 = vmov 0.0   ;;  %v1499_v5 = vld [vmem:[%s2609_s5] sm:$0xff] }
0x12b8   :  { %1115 = vadd.xlane.f32.xlu1 %v1114_v11  ;;  %1799 = vmatpush3.bf16.msra.mxu0 %v1798_v9  ;;  %v1255_v9 = vld [vmem:[%s2605_s1 + $0x1f0] sm:$0xff] }
0x12b9   :  { %1831 = vmatpush3.bf16.msra.mxu1 %v1830_v10  ;;  %1801 = vmatprep.subr.bf16.mxu0 %v1800_v28  ;;  %v1812_v10 = vpack.c.bf16 %v1224_v8, %v1223_v7  ;;  %v1158_v28 = vsel %vm1156_vm1, 1.0, %v1938_v33  ;;  %v1501_v7 = vld [vmem:[%s2609_s5 + $0x10] sm:$0xff] }
0x12ba   :  { %1833 = vmatprep.subr.bf16.mxu1 %v1832_v38 }
0x12bc   :  { %152 = vadd.xlane.f32.xlu1 %v151_v42  ;;  %v1234_v42 = vld [vmem:[%s2605_s1 + $0x148] sm:$0xff]  ;;  %1803 = vmatpush3.bf16.msra.mxu0 %v1802_v39 }
0x12bd   :  { %v1834_v43 = vpack.c.bf16 %v1234_v42, %v1233_v41  ;;  %1805 = vmatprep.subr.bf16.mxu0 %v1804_v47 }
0x12bf   :  { %1835 = vmatpush3.bf16.msra.mxu1 %v1834_v43 }
0x12c0   :  { %1837 = vmatprep.subr.bf16.mxu1 %v1836_v51  ;;  %1807 = vmatpush3.bf16.msra.mxu0 %v1806_v52  ;;  %v1855_v51 = vpack.c.bf16 %v1410_v50, %v1409_v49 }
0x12c1   :  { %1809 = vmatprep.subr.bf16.mxu0 %v1808_v62  ;;  %v1417_v62 = vld [vmem:[%s2607_s3 + $0x60] sm:$0xff] }
0x12c2   :  { %v1867_v0 = vpack.c.bf16 %v1418_v63, %v1417_v62 }
0x12c3   :  { %1839 = vmatpush3.bf16.msra.mxu1 %v1838_v55  ;;  %v1861_v55 = vpack.c.bf16 %v1414_v54, %v1413_v53 }
0x12c4   :  { %1841 = vmatprep.subr.bf16.mxu1 %v1840_v2  ;;  %1811 = vmatpush3.bf16.msra.mxu0 %v1810_v3  ;;  %v1420_v2 = vld [vmem:[%s2607_s3 + $0x78] sm:$0xff] }
0x12c5   :  { %1813 = vmatprep.subr.bf16.mxu0 %v1812_v10  ;;  %v1870_v3 = vpack.c.bf16 %v1420_v2, %v1419_v1 }
0x12c7   :  { %1843 = vmatpush3.bf16.msra.mxu1 %v1842_v6  ;;  %v1500_v6 = vld [vmem:[%s2609_s5 + $0x8] sm:$0xff] }
0x12c8   :  { %v1873_v8 = vpack.c.bf16 %v1500_v6, %v1499_v5 }
0x1345   :  { %v1116_v11 = vpop.xlane.xlu1 %1115 }
0x1346   :  { %vm1117_vm14 = vcmp.gt.f32.partialorder %v1116_v11, 1.0  ;;  %v1256_v11 = vld [vmem:[%s2605_s1 + $0x1f8] sm:$0xff] }
0x1347   :  { %v2342_v12 = vsel %vm1117_vm14, %v2226_v61, %v2220_v58  ;;  %v2346_v13 = vsel %vm1117_vm14, %v2222_v59, %v2226_v61 }
0x1348   :  { %v1120_v14 = vadd.f32 %v2346_v13, %v2342_v12 }
0x1349   :  { %v153_v36 = vpop.xlane.xlu1 %152 }
0x134a   :  { %v2350_v15 = vmul.f32 0.5, %v1120_v14  ;;  %v1207_v14 = vld [vmem:[%s2605_s1 + $0x70] sm:$0xff]  ;;  %vm1174_vm2 = vcmp.le.f32.partialorder %v153_v36, 1.0 }
0x134c   :  { %v1129_v16 = vrot.slane %v2350_v15, %v2022_v40 }
0x134e   :  { %v1131_v17 = vsub.f32 %v2001_v24, %v1129_v16  ;;  %v1132_v18 = vsub.f32 %v2004_v25, %v1129_v16  ;;  %v1208_v16 = vld [vmem:[%s2605_s1 + $0x78] sm:$0xff] }
0x1350   :  { %v1133_v19 = vmax.f32 %v1131_v17, 0.0  ;;  %v1134_v26 = vmax.f32 %v1132_v18, 0.0  ;;  %v1844_v17 = vpack.c.bf16 %v1256_v11, %v1255_v9  ;;  %v1814_v18 = vpack.c.bf16 %v1208_v16, %v1207_v14  ;;  %v1502_v9 = vld [vmem:[%s2609_s5 + $0x18] sm:$0xff]  ;;  %v1503_v11 = vld [vmem:[%s2609_s5 + $0x20] sm:$0xff]  ;;  %v1504_v14 = vld [vmem:[%s2609_s5 + $0x28] sm:$0xff] }
0x1351   :  { %v1876_v10 = vpack.c.bf16 %v1502_v9, %v1501_v7  ;;  %v1879_v16 = vpack.c.bf16 %v1504_v14, %v1503_v11 }
0x1352   :  { %v1137_v58 = vcombine.high %v1133_v19, %v1133_v19  ;;  %v1138_v20 = vcombine.high %v1134_v26, %v1134_v26  ;;  %v1141_v21 = vsel %vm35_vm0, %v1133_v19, 0.0  ;;  %v1144_v27 = vsel %vm35_vm0, %v1134_v26, 0.0  ;;  %v1239_v19 = vld [vmem:[%s2605_s1 + $0x170] sm:$0xff]  ;;  %v1240_v26 = vld [vmem:[%s2605_s1 + $0x178] sm:$0xff]  ;;  %1845 = vmatprep.subr.bf16.mxu1 %v1844_v17  ;;  %1815 = vmatpush3.bf16.msra.mxu0 %v1814_v18 }
0x1353   :  { %v1505_v17 = vld [vmem:[%s2609_s5 + $0x30] sm:$0xff]  ;;  %v1506_v18 = vld [vmem:[%s2609_s5 + $0x38] sm:$0xff] }
0x1354   :  { %v1142_v59 = vsel %vm35_vm0, %v1137_v58, 0.0  ;;  %v1146_v30 = vsel %vm35_vm0, %v1138_v20, 0.0  ;;  %v1846_v58 = vpack.c.bf16 %v1240_v26, %v1239_v19  ;;  %v1937_v20 = vmov 0.0|0.0   ;;  %v1507_v26 = vld [vmem:[%s2609_s5 + $0x40] sm:$0xff] }
0x1355   :  { %v1143_v61 = vadd.f32 %v1142_v59, %v1141_v21  ;;  %1848 = vmatprep.subr.bf16.mxu0 %v1937_v20  ;;  %v1882_v19 = vpack.c.bf16 %v1506_v18, %v1505_v17 }
0x1356   :  { %1847 = vmatpush3.bf16.msra.mxu1 %v1846_v58  ;;  %v1508_v58 = vld [vmem:[%s2609_s5 + $0x48] sm:$0xff] }
0x1357   :  { %v1145_v29 = vadd.f32 %v1144_v27, %v1143_v61  ;;  %1872 = vmatprep.subr.bf16.mxu1 %v1937_v20 }
0x1359   :  { %v1147_v31 = vadd.f32 %v1146_v30, %v1145_v29 }
0x135b   :  { %1148 = vadd.xlane.f32.xlu0 %v1147_v31 }
0x13e8   :  { %v1149_v21 = vpop.xlane.xlu0 %1148 }
0x13e9   :  { %vm1150_vm0 = vcmp.gt.f32.partialorder %v1149_v21, 1.0  ;;  %v1885_v21 = vpack.c.bf16 %v1508_v58, %v1507_v26 }
0x13ea   :  { %v1151_v59 = vsel %vm1150_vm0, %v2350_v15, %v2342_v12  ;;  %v1152_v61 = vsel %vm1150_vm0, %v2346_v13, %v2350_v15  ;;  %v1179_v13 = vcombine.high %v1996_v22, %v1996_v22 }
0x13eb   :  { %v1153_v27 = vadd.f32 %v1152_v61, %v1151_v59  ;;  %v1509_v59 = vld [vmem:[%s2609_s5 + $0x50] sm:$0xff]  ;;  %v1510_v61 = vld [vmem:[%s2609_s5 + $0x58] sm:$0xff] }
0x13ed   :  { %v1154_v29 = vmul.f32 0.5, %v1153_v27  ;;  %v1888_v27 = vpack.c.bf16 %v1510_v61, %v1509_v59 }
0x13ef   :  { %v1166_v30 = vrot.slane %v1154_v29, %v2022_v40  ;;  %v1180_v40 = vcombine.high %v1998_v23, %v1998_v23  ;;  %v1511_v29 = vld [vmem:[%s2609_s5 + $0x60] sm:$0xff] }
0x13f1   :  { %v1168_v31 = vsub.f32 %v2001_v24, %v1166_v30  ;;  %v1169_v32 = vsub.f32 %v2004_v25, %v1166_v30  ;;  %v1405_v24 = vld [vmem:[%s2607_s3] sm:$0xff]  ;;  %v1406_v25 = vld [vmem:[%s2607_s3 + $0x8] sm:$0xff] }
0x13f2   :  { %v1849_v41 = vpack.c.bf16 %v1406_v25, %v1405_v24  ;;  %v1512_v30 = vld [vmem:[%s2609_s5 + $0x68] sm:$0xff]  ;;  %v1608_v25 = vld [vmem:[%s2608_s4] ss:$0 sm:$0xff] }
0x13f3   :  { %v1170_v35 = vmax.f32 %v1168_v31, 0.0  ;;  %v1171_v12 = vmax.f32 %v1169_v32, 0.0  ;;  %v1891_v31 = vpack.c.bf16 %v1512_v30, %v1511_v29 }
0x13f5   :  { %v1172_v37 = vmul.f32 %v1170_v35, %v1157_v34  ;;  %v1173_v15 = vmul.f32 %v1171_v12, %v1158_v28  ;;  %v1607_v34 = vld [vmem:[%s2606_s2] ss:$0 sm:$0xff] }
0x13f7   :  { %v1185_v38 = vcombine.high %v1172_v37, %v1172_v37  ;;  %v1186_v39 = vcombine.high %v1173_v15, %v1173_v15  ;;  %v1189_v46 = vsel %vm1174_vm2, %v1996_v22, %v1172_v37  ;;  %v1191_v47 = vsel %vm1174_vm2, %v1998_v23, %v1173_v15  ;;  %v1411_v22 = vld [vmem:[%s2607_s3 + $0x30] sm:$0xff]  ;;  %v1412_v23 = vld [vmem:[%s2607_s3 + $0x38] sm:$0xff] }
0x13f8   :  { %v1858_v52 = vpack.c.bf16 %v1412_v23, %v1411_v22 }
0x13f9   :  { %v1190_v42 = vsel %vm1174_vm2, %v1179_v13, %v1185_v38  ;;  %v1192_v43 = vsel %vm1174_vm2, %v1180_v40, %v1186_v39  ;;  %v1513_v40 = vld [vmem:[%s2609_s5 + $0x70] sm:$0xff] }
0x13fa   :  { %1328 = vmatprep.mubr.f32.mxu0 %v1190_v42  ;;  %1398 = vmatprep.mubr.f32.mxu1 %v1192_v43  ;;  %v1609_v43 = vld [vmem:[%s2610_s6] ss:$0 sm:$0xff] }
0x13fb   :  { %1329 = vmatmul.mubr.f32.vlgmr.msra.gmra.mrb[0].mxu0 %v1189_v46  ;;  %1399 = vmatmul.mubr.f32.vlgmr.msra.gmra.mrb[0].mxu1 %v1191_v47 }
0x13fc   :  { %1850 = vmatpush3.bf16.msra.mxu0 %v1849_v41  ;;  %1746 = vmatprep.mubr.msk.f32.mxu0 %vm1939_vm3, %v1940_v4 }
0x13fd   :  { %1851 = vmatprep.subr.bf16.mxu0 %v1937_v20  ;;  %1781 = vmatprep.mubr.msk.f32.mxu1 %vm1939_vm3, %v1940_v4 }
0x13fe   :  { %1874 = vmatpush3.bf16.msra.mxu1 %v1873_v8 }
0x13ff   :  { %1875 = vmatprep.subr.bf16.mxu1 %v1937_v20 }
0x1400   :  { %1853 = vmatpush3.bf16.msra.mxu0 %v1852_v48 }
0x1401   :  { %1854 = vmatprep.subr.bf16.mxu0 %v1937_v20 }
0x1402   :  { %1877 = vmatpush3.bf16.msra.mxu1 %v1876_v10 }
0x1403   :  { %1878 = vmatprep.subr.bf16.mxu1 %v1937_v20 }
0x1404   :  { %1856 = vmatpush3.bf16.msra.mxu0 %v1855_v51 }
0x1405   :  { %1857 = vmatprep.subr.bf16.mxu0 %v1937_v20 }
0x1406   :  { %1880 = vmatpush3.bf16.msra.mxu1 %v1879_v16 }
0x1407   :  { %1881 = vmatprep.subr.bf16.mxu1 %v1937_v20 }
0x1408   :  { %1859 = vmatpush3.bf16.msra.mxu0 %v1858_v52 }
0x1409   :  { %1860 = vmatprep.subr.bf16.mxu0 %v1937_v20 }
0x140a   :  { %1883 = vmatpush3.bf16.msra.mxu1 %v1882_v19 }
0x140b   :  { %1884 = vmatprep.subr.bf16.mxu1 %v1937_v20 }
0x140c   :  { %1862 = vmatpush3.bf16.msra.mxu0 %v1861_v55 }
0x140d   :  { %1863 = vmatprep.subr.bf16.mxu0 %v1937_v20 }
0x140e   :  { %1886 = vmatpush3.bf16.msra.mxu1 %v1885_v21 }
0x140f   :  { %1887 = vmatprep.subr.bf16.mxu1 %v1937_v20 }
0x1410   :  { %1865 = vmatpush3.bf16.msra.mxu0 %v1864_v60 }
0x1411   :  { %1866 = vmatprep.subr.bf16.mxu0 %v1937_v20 }
0x1412   :  { %1889 = vmatpush3.bf16.msra.mxu1 %v1888_v27 }
0x1413   :  { %1890 = vmatprep.subr.bf16.mxu1 %v1937_v20 }
0x1414   :  { %1868 = vmatpush3.bf16.msra.mxu0 %v1867_v0 }
0x1415   :  { %1869 = vmatprep.subr.bf16.mxu0 %v1937_v20 }
0x1416   :  { %1892 = vmatpush3.bf16.msra.mxu1 %v1891_v31 }
0x1417   :  { %1893 = vmatprep.subr.bf16.mxu1 %v1937_v20  ;;  %v1514_v20 = vld [vmem:[%s2609_s5 + $0x78] sm:$0xff]  ;;  %s1912_s5 = scalar_lea.vmem %s1600_s28, 64 }
0x1418   :  { %1871 = vmatpush3.bf16.msra.mxu0 %v1870_v3  ;;  %v1894_v24 = vpack.c.bf16 %v1514_v20, %v1513_v40  ;;  %p1913_p0 = scmp.ne.s32.totalorder %s1600_s28, %s1912_s5  ;;  %p1918_p2 = scmp.lt.s32.totalorder %s1912_s5, %s1912_s5 }
0x141a   :  { %1895 = vmatpush3.bf16.msra.mxu1 %v1894_v24  ;;  %p1919_p3 = por %p1918_p2, %p1917_p1 }
0x141c   :  { %p1920_p4 = pnand %p1919_p3, %p1913_p0 }
0x14ce   :  { %v1642_v32 = vpop.f32.mrb[0].mxu0  ;;  %v1677_v33 = vpop.f32.mrb[0].mxu1 }
0x14cf   :  { %v1643_v28 = vpop.f32.mrb[1].mxu0  ;;  %v1678_v35 = vpop.f32.mrb[1].mxu1 }
0x14d0   :  { %v1644_v12 = vadd.f32 %v1643_v28, %v1642_v32  ;;  %v1679_v36 = vadd.f32 %v1678_v35, %v1677_v33 }
0x14d2   :  { %v1331_v37 = vadd.f32 %v1644_v12, %v1607_v34 }
0x14d4   :  { %v1401_v13 = vadd.f32 %v1679_v36, %v1331_v37 }
0x14d6   :  { %v1404_v15 = vmax.f32 %v1401_v13, 0.0 }
0x14d8   :  { %1747 = vmatmul.mubr.f32.vlgmr.msra.gmra.mrb[2].mxu0 %v1404_v15 }
0x15ab   :  { %v1494_v38 = vpop.f32.mrb[2].mxu0 }
0x15ac   :  { %v1495_v39 = vadd.f32 %v1608_v25, %v1494_v38  ;;  %v1748_v41 = vpop.f32.mrb[3].mxu0 }
0x15ae   :  { %v1498_v42 = vmax.f32 %v1495_v39, 0.0 }
0x15b0   :  { %1782 = vmatmul.mubr.f32.vlgmr.msra.gmra.mrb[2].mxu1 %v1498_v42 }
0x1683   :  { %v1588_v44 = vpop.f32.mrb[2].mxu1 }
0x1684   :  { %v1589_v45 = vadd.f32 %v1609_v43, %v1588_v44  ;;  %v1783_v46 = vpop.f32.mrb[3].mxu1 }
0x1686   :  { %1592 = vst [vmem:[#allocation2] sm:$0xf] %v1589_v45 }
0x1687   :  { %1923 = shalt.err (!%p1920_p4)
}
0x1688   :  { %s1924_s30 = scalar_lea.hbm %s2611_s7, 64 }
0x1689   :  { %p1925_p5 = scmp.ne.s32.totalorder %s2611_s7, %s1924_s30  ;;  %p1928_p6 = scmp.lt.u32.totalorder %s1924_s30, %s2611_s7 }
0x168b   :  { %p1930_p7 = pnand %p1928_p6, %p1925_p5 }
0x168d   :  { %1933 = shalt.err (!%p1930_p7)
}
0x168e   :  { %1602 = dma.vmem_to_hbm [thread:$0]  %s1600_s28, 64, %s2611_s7, [#allocation3]  }
0x168f   :  { %1934 = dma.done.wait [#allocation3], 64  }
0x1690   :  { %1935 = vsyncadd [#allocation3], 4294967232 }
0x1691   :  { %1606 = vsyncpa [#allocation3], 1 }

</bundles_post_ra>
